<compile_context>
chip_gen: v6e
topology: v6e:2x2x1
jax: 0.10.0
libtpu: 0.0.40
codegen_flags: <defaults>
</compile_context>

<pallas_src>
import jax
import jax.numpy as jnp
from jax import lax
from jax.experimental import pallas as pl
from jax.experimental.pallas import tpu as pltpu

# ---- model dims (small, consistent with a CLIP-like text encoder) ----
N = 2          # number of prompts (batch)
L = 8          # context length
D = 32         # transformer width
H = 4          # attention heads
HD = D // H    # head dim
LAYERS = 2
PROJ = 16      # text projection / embedding dim
PROJ_PAD = 128 # lane-dense padded projection width (output sliced back to PROJ)
EPS = 1e-5


def _layernorm(v, g, b):
    mu = jnp.mean(v, axis=-1, keepdims=True)
    var = jnp.mean((v - mu) ** 2, axis=-1, keepdims=True)
    return (v - mu) * lax.rsqrt(var + EPS) * g + b


# ---------------------------------------------------------------------------
# Single fused kernel: positional add -> LAYERS x residual attention block
#                      -> EOT gather -> ln_final -> text projection
# ---------------------------------------------------------------------------
def text_encoder_kernel(eot_ref,                       # SMEM (N,) int32
                        p_ref, pos_ref,                # VMEM (N,L,D), (L,D)
                        ln1g_ref, ln1b_ref, wqkv_ref, bqkv_ref, wo_ref, bo_ref,
                        ln2g_ref, ln2b_ref, w1_ref, b1_ref, w2_ref, b2_ref,
                        lnfg_ref, lnfb_ref, proj_ref,  # (1,D), (1,D), (D,PROJ_PAD)
                        o_ref,                         # (N, PROJ_PAD)
                        attn_scr):                     # VMEM scratch (N*L, D)
    pos = pos_ref[...]                                                 # (L, D)
    # x = prompts + positional_embedding, flattened batch-first to (N*L, D)
    x = jnp.concatenate([p_ref[n] + pos for n in range(N)], axis=0)    # (16, 32)

    # causal mask built once per kernel invocation (shared by all layers / batch)
    row = lax.broadcasted_iota(jnp.int32, (L, L), 0)
    col = lax.broadcasted_iota(jnp.int32, (L, L), 1)
    causal = col <= row
    scale = 1.0 / (HD ** 0.5)

    for li in range(LAYERS):                                           # static unroll
        # --- multi-head causal self-attention ---
        h = _layernorm(x, ln1g_ref[li], ln1b_ref[li])
        qkv = jnp.dot(h, wqkv_ref[li],
                      preferred_element_type=jnp.float32) + bqkv_ref[li]   # (16, 96)
        q = qkv[:, 0:D]
        k = qkv[:, D:2 * D]
        v = qkv[:, 2 * D:3 * D]

        # head outputs are written directly into VMEM scratch (no concatenate)
        for n in range(N):
            r0 = n * L
            for hh in range(H):
                c0 = hh * HD
                qh = q[r0:r0 + L, c0:c0 + HD]
                kh = k[r0:r0 + L, c0:c0 + HD]
                vh = v[r0:r0 + L, c0:c0 + HD]
                s = jnp.dot(qh, kh.T, preferred_element_type=jnp.float32) * scale
                s = jnp.where(causal, s, -1e30)
                s = s - jnp.max(s, axis=-1, keepdims=True)
                p = jnp.exp(s)
                p = p * pl.reciprocal(jnp.sum(p, axis=-1, keepdims=True), approx=True)
                attn_scr[r0:r0 + L, c0:c0 + HD] = jnp.dot(
                    p, vh, preferred_element_type=jnp.float32)

        x = x + jnp.dot(attn_scr[...], wo_ref[li],
                        preferred_element_type=jnp.float32) + bo_ref[li]

        # --- MLP with QuickGELU ---
        h2 = _layernorm(x, ln2g_ref[li], ln2b_ref[li])
        m = jnp.dot(h2, w1_ref[li], preferred_element_type=jnp.float32) + b1_ref[li]
        m = m * jax.nn.sigmoid(1.702 * m)
        x = x + jnp.dot(m, w2_ref[li], preferred_element_type=jnp.float32) + b2_ref[li]

    # --- in-kernel EOT gather via one-hot select (indices live in SMEM) ---
    liota = lax.broadcasted_iota(jnp.int32, (L, 1), 0)
    rows = []
    for n in range(N):
        sel = (liota == eot_ref[n]).astype(jnp.float32)                # (L, 1)
        rows.append(jnp.sum(x[n * L:(n + 1) * L, :] * sel, axis=0, keepdims=True))
    x_eot = jnp.concatenate(rows, axis=0)                              # (N, D)

    # ln_final + text_projection (lane-dense padded output)
    hf = _layernorm(x_eot, lnfg_ref[...], lnfb_ref[...])
    o_ref[...] = jnp.dot(hf, proj_ref[...], preferred_element_type=jnp.float32)


def _full_spec(a):
    zeros = (0,) * a.ndim
    return pl.BlockSpec(a.shape, lambda: zeros)


def text_encoder_forward(prompts, tokenized_prompts, params):
    # tokenized_prompts.argmax(-1): tiny op on the token ids (does not touch x)
    eot_idx = jnp.argmax(tokenized_prompts, axis=-1).astype(jnp.int32)   # (N,)

    vmem_inputs = (prompts, params["pos"], *params["layers"],
                   params["ln_f_g"], params["ln_f_b"], params["proj"])

    out_pad = pl.pallas_call(
        text_encoder_kernel,
        out_shape=jax.ShapeDtypeStruct((N, PROJ_PAD), jnp.float32),
        in_specs=[pl.BlockSpec(memory_space=pltpu.MemorySpace.SMEM)]
                 + [_full_spec(a) for a in vmem_inputs],
        out_specs=pl.BlockSpec((N, PROJ_PAD), lambda: (0, 0)),
        scratch_shapes=[pltpu.VMEM((N * L, D), jnp.float32)],
    )(eot_idx, *vmem_inputs)

    return out_pad[:, :PROJ]


# ---------------------------------------------------------------------------
# Parameter construction (deterministic, synthetic clip_model)
# ---------------------------------------------------------------------------
def init_params(key):
    def normal(k, shape, scale=0.02):
        return scale * jax.random.normal(k, shape, dtype=jnp.float32)

    keys = jax.random.split(key, 2 + LAYERS)

    # text projection zero-padded to 128 lanes for an unmasked output store
    proj = jnp.zeros((D, PROJ_PAD), jnp.float32)
    proj = proj.at[:, :PROJ].set(normal(keys[1], (D, PROJ), scale=D ** -0.5))

    def make_layer(k):
        kk = jax.random.split(k, 4)
        return (
            jnp.ones((1, D), jnp.float32),           # ln1 gamma
            jnp.zeros((1, D), jnp.float32),          # ln1 beta
            normal(kk[0], (D, 3 * D)),               # W_qkv
            jnp.zeros((1, 3 * D), jnp.float32),      # b_qkv
            normal(kk[1], (D, D)),                   # W_out
            jnp.zeros((1, D), jnp.float32),          # b_out
            jnp.ones((1, D), jnp.float32),           # ln2 gamma
            jnp.zeros((1, D), jnp.float32),          # ln2 beta
            normal(kk[2], (D, 4 * D)),               # mlp W1
            jnp.zeros((1, 4 * D), jnp.float32),      # mlp b1
            normal(kk[3], (4 * D, D)),               # mlp W2
            jnp.zeros((1, D), jnp.float32),          # mlp b2
        )

    per_layer = [make_layer(keys[2 + li]) for li in range(LAYERS)]
    stacked = tuple(jnp.stack(ps) for ps in zip(*per_layer))  # 12 arrays, (LAYERS, ...)

    return {
        "pos": normal(keys[0], (L, D)),
        "ln_f_g": jnp.ones((1, D), jnp.float32),
        "ln_f_b": jnp.zeros((1, D), jnp.float32),
        "proj": proj,
        "layers": stacked,
    }


if __name__ == "__main__":
    key = jax.random.PRNGKey(0)
    k_par, k_prompt, k_tok = jax.random.split(key, 3)

    params = init_params(k_par)

    prompts = 0.1 * jax.random.normal(k_prompt, (N, L, D), dtype=jnp.float32)

    # tokenized prompts: random token ids with an EOT (largest id) somewhere per row
    tokens = jax.random.randint(k_tok, (N, L), 1, 100, dtype=jnp.int32)
    eot_positions = jnp.array([5, 3], dtype=jnp.int32)
    tokens = tokens.at[jnp.arange(N), eot_positions].set(49407)

    fwd = jax.jit(text_encoder_forward)
    out = fwd(prompts, tokens, params)
    out = jax.block_until_ready(out)
    assert out.shape == (N, PROJ) and out.dtype == jnp.float32
    print("KERNEL_OK")
</pallas_src>

<mosaic_0001>
module attributes {stable_mosaic.version = 11 : i64} {
  func.func @text_encoder_kernel(%arg0: memref<2xi32, #tpu.memory_space<smem>>, %arg1: memref<2x8x32xf32, #tpu.memory_space<vmem>>, %arg2: memref<8x32xf32, #tpu.memory_space<vmem>>, %arg3: memref<2x1x32xf32, #tpu.memory_space<vmem>>, %arg4: memref<2x1x32xf32, #tpu.memory_space<vmem>>, %arg5: memref<2x32x96xf32, #tpu.memory_space<vmem>>, %arg6: memref<2x1x96xf32, #tpu.memory_space<vmem>>, %arg7: memref<2x32x32xf32, #tpu.memory_space<vmem>>, %arg8: memref<2x1x32xf32, #tpu.memory_space<vmem>>, %arg9: memref<2x1x32xf32, #tpu.memory_space<vmem>>, %arg10: memref<2x1x32xf32, #tpu.memory_space<vmem>>, %arg11: memref<2x32x128xf32, #tpu.memory_space<vmem>>, %arg12: memref<2x1x128xf32, #tpu.memory_space<vmem>>, %arg13: memref<2x128x32xf32, #tpu.memory_space<vmem>>, %arg14: memref<2x1x32xf32, #tpu.memory_space<vmem>>, %arg15: memref<1x32xf32, #tpu.memory_space<vmem>>, %arg16: memref<1x32xf32, #tpu.memory_space<vmem>>, %arg17: memref<32x128xf32, #tpu.memory_space<vmem>>, %arg18: memref<2x128xf32, #tpu.memory_space<vmem>>, %arg19: memref<16x32xf32, #tpu.memory_space<vmem>>) attributes {dimension_semantics = [], scalar_prefetch = 0 : i64, scratch_operands = 1 : i64, tpu.core_type = #tpu.core_type<tc>} {
    %c0 = arith.constant 0 : index
    %c0_0 = arith.constant 0 : index
    %0 = vector.load %arg2[%c0, %c0_0] : memref<8x32xf32, #tpu.memory_space<vmem>>, vector<8x32xf32>
    %c0_1 = arith.constant 0 : index
    %c0_2 = arith.constant 0 : index
    %c0_3 = arith.constant 0 : index
    %1 = vector.load %arg1[%c0_1, %c0_2, %c0_3] : memref<2x8x32xf32, #tpu.memory_space<vmem>>, vector<1x8x32xf32>
    %2 = vector.shape_cast %1 : vector<1x8x32xf32> to vector<8x32xf32>
    %3 = arith.addf %2, %0 : vector<8x32xf32>
    %c1 = arith.constant 1 : index
    %c0_4 = arith.constant 0 : index
    %c0_5 = arith.constant 0 : index
    %4 = vector.load %arg1[%c1, %c0_4, %c0_5] : memref<2x8x32xf32, #tpu.memory_space<vmem>>, vector<1x8x32xf32>
    %5 = vector.shape_cast %4 : vector<1x8x32xf32> to vector<8x32xf32>
    %6 = arith.addf %5, %0 : vector<8x32xf32>
    %7 = tpu.concatenate %3, %6 in 0 : vector<8x32xf32>, vector<8x32xf32> -> vector<16x32xf32>
    %8 = tpu.iota {dimensions = array<i32: 0>} : vector<8x8xi32>
    %9 = tpu.iota {dimensions = array<i32: 1>} : vector<8x8xi32>
    %10 = arith.cmpi sle, %9, %8 : vector<8x8xi32>
    %c0_6 = arith.constant 0 : index
    %c0_7 = arith.constant 0 : index
    %c0_8 = arith.constant 0 : index
    %11 = vector.load %arg3[%c0_6, %c0_7, %c0_8] : memref<2x1x32xf32, #tpu.memory_space<vmem>>, vector<1x1x32xf32>
    %12 = vector.shape_cast %11 : vector<1x1x32xf32> to vector<1x32xf32>
    %c0_9 = arith.constant 0 : index
    %c0_10 = arith.constant 0 : index
    %c0_11 = arith.constant 0 : index
    %13 = vector.load %arg4[%c0_9, %c0_10, %c0_11] : memref<2x1x32xf32, #tpu.memory_space<vmem>>, vector<1x1x32xf32>
    %14 = vector.shape_cast %13 : vector<1x1x32xf32> to vector<1x32xf32>
    %cst = arith.constant dense<0.000000e+00> : vector<16xf32>
    %15 = vector.multi_reduction <add>, %7, %cst [1] : vector<16x32xf32> to vector<16xf32>
    %16 = vector.shape_cast %15 : vector<16xf32> to vector<16x1xf32>
    %cst_12 = arith.constant 3.200000e+01 : f32
    %17 = vector.broadcast %cst_12 : f32 to vector<16x1xf32>
    %18 = arith.divf %16, %17 : vector<16x1xf32>
    %19 = vector.broadcast %18 : vector<16x1xf32> to vector<16x32xf32>
    %20 = arith.subf %7, %19 : vector<16x32xf32>
    %21 = arith.mulf %20, %20 : vector<16x32xf32>
    %cst_13 = arith.constant dense<0.000000e+00> : vector<16xf32>
    %22 = vector.multi_reduction <add>, %21, %cst_13 [1] : vector<16x32xf32> to vector<16xf32>
    %23 = vector.shape_cast %22 : vector<16xf32> to vector<16x1xf32>
    %cst_14 = arith.constant 3.200000e+01 : f32
    %24 = vector.broadcast %cst_14 : f32 to vector<16x1xf32>
    %25 = arith.divf %23, %24 : vector<16x1xf32>
    %26 = vector.broadcast %18 : vector<16x1xf32> to vector<16x32xf32>
    %27 = arith.subf %7, %26 : vector<16x32xf32>
    %cst_15 = arith.constant 9.99999974E-6 : f32
    %28 = vector.broadcast %cst_15 : f32 to vector<16x1xf32>
    %29 = arith.addf %25, %28 : vector<16x1xf32>
    %30 = math.rsqrt %29 : vector<16x1xf32>
    %31 = vector.broadcast %30 : vector<16x1xf32> to vector<16x32xf32>
    %32 = arith.mulf %27, %31 : vector<16x32xf32>
    %33 = vector.broadcast %12 : vector<1x32xf32> to vector<16x32xf32>
    %34 = arith.mulf %32, %33 : vector<16x32xf32>
    %35 = vector.broadcast %14 : vector<1x32xf32> to vector<16x32xf32>
    %36 = arith.addf %34, %35 : vector<16x32xf32>
    %c0_16 = arith.constant 0 : index
    %c0_17 = arith.constant 0 : index
    %c0_18 = arith.constant 0 : index
    %37 = vector.load %arg5[%c0_16, %c0_17, %c0_18] : memref<2x32x96xf32, #tpu.memory_space<vmem>>, vector<1x32x96xf32>
    %38 = vector.shape_cast %37 : vector<1x32x96xf32> to vector<32x96xf32>
    %cst_19 = arith.constant dense<0.000000e+00> : vector<16x96xf32>
    %39 = tpu.matmul %36, %38, %cst_19 {dimension_numbers = #tpu.dot_dimension_numbers<[1], [0], [0], [1], [0, 0, 1, 1], [], []>} : vector<16x32xf32>, vector<32x96xf32>, vector<16x96xf32> -> vector<16x96xf32>
    %c0_20 = arith.constant 0 : index
    %c0_21 = arith.constant 0 : index
    %c0_22 = arith.constant 0 : index
    %40 = vector.load %arg6[%c0_20, %c0_21, %c0_22] : memref<2x1x96xf32, #tpu.memory_space<vmem>>, vector<1x1x96xf32>
    %41 = vector.shape_cast %40 : vector<1x1x96xf32> to vector<1x96xf32>
    %42 = vector.broadcast %41 : vector<1x96xf32> to vector<16x96xf32>
    %43 = arith.addf %39, %42 : vector<16x96xf32>
    %44 = vector.extract_strided_slice %43 {offsets = [0, 0], sizes = [16, 32], strides = [1, 1]} : vector<16x96xf32> to vector<16x32xf32>
    %45 = vector.extract_strided_slice %43 {offsets = [0, 32], sizes = [16, 32], strides = [1, 1]} : vector<16x96xf32> to vector<16x32xf32>
    %46 = vector.extract_strided_slice %43 {offsets = [0, 64], sizes = [16, 32], strides = [1, 1]} : vector<16x96xf32> to vector<16x32xf32>
    %47 = vector.extract_strided_slice %44 {offsets = [0, 0], sizes = [8, 8], strides = [1, 1]} : vector<16x32xf32> to vector<8x8xf32>
    %48 = vector.extract_strided_slice %45 {offsets = [0, 0], sizes = [8, 8], strides = [1, 1]} : vector<16x32xf32> to vector<8x8xf32>
    %49 = vector.extract_strided_slice %46 {offsets = [0, 0], sizes = [8, 8], strides = [1, 1]} : vector<16x32xf32> to vector<8x8xf32>
    %50 = tpu.transpose %48, [1, 0] : vector<8x8xf32> -> vector<8x8xf32>
    %cst_23 = arith.constant dense<0.000000e+00> : vector<8x8xf32>
    %51 = tpu.matmul %47, %50, %cst_23 {dimension_numbers = #tpu.dot_dimension_numbers<[1], [0], [0], [1], [0, 0, 1, 1], [], []>} : vector<8x8xf32>, vector<8x8xf32>, vector<8x8xf32> -> vector<8x8xf32>
    %cst_24 = arith.constant 0.353553385 : f32
    %52 = vector.broadcast %cst_24 : f32 to vector<8x8xf32>
    %53 = arith.mulf %51, %52 : vector<8x8xf32>
    %cst_25 = arith.constant -1.000000e+30 : f32
    %54 = vector.broadcast %cst_25 : f32 to vector<8x8xf32>
    %55 = arith.select %10, %53, %54 : vector<8x8xi1>, vector<8x8xf32>
    %cst_26 = arith.constant dense<0xFF800000> : vector<8xf32>
    %56 = vector.multi_reduction <maximumf>, %55, %cst_26 [1] : vector<8x8xf32> to vector<8xf32>
    %57 = vector.shape_cast %56 : vector<8xf32> to vector<8x1xf32>
    %58 = vector.broadcast %57 : vector<8x1xf32> to vector<8x8xf32>
    %59 = arith.subf %55, %58 : vector<8x8xf32>
    %60 = math.exp %59 : vector<8x8xf32>
    %cst_27 = arith.constant dense<0.000000e+00> : vector<8xf32>
    %61 = vector.multi_reduction <add>, %60, %cst_27 [1] : vector<8x8xf32> to vector<8xf32>
    %62 = vector.shape_cast %61 : vector<8xf32> to vector<8x1xf32>
    %63 = tpu.reciprocal %62 {approx = true} : vector<8x1xf32> -> vector<8x1xf32>
    %64 = vector.broadcast %63 : vector<8x1xf32> to vector<8x8xf32>
    %65 = arith.mulf %60, %64 : vector<8x8xf32>
    %cst_28 = arith.constant dense<0.000000e+00> : vector<8x8xf32>
    %66 = tpu.matmul %65, %49, %cst_28 {dimension_numbers = #tpu.dot_dimension_numbers<[1], [0], [0], [1], [0, 0, 1, 1], [], []>} : vector<8x8xf32>, vector<8x8xf32>, vector<8x8xf32> -> vector<8x8xf32>
    %c0_29 = arith.constant 0 : index
    %c0_30 = arith.constant 0 : index
    %67 = vector.load %arg19[%c0_29, %c0_30] : memref<16x32xf32, #tpu.memory_space<vmem>>, vector<8x8xf32>
    tpu.vector_store %arg19[%c0_29, %c0_30], %66 {strides = array<i32>} : memref<16x32xf32, #tpu.memory_space<vmem>>, vector<8x8xf32>,
    %68 = vector.extract_strided_slice %44 {offsets = [0, 8], sizes = [8, 8], strides = [1, 1]} : vector<16x32xf32> to vector<8x8xf32>
    %69 = vector.extract_strided_slice %45 {offsets = [0, 8], sizes = [8, 8], strides = [1, 1]} : vector<16x32xf32> to vector<8x8xf32>
    %70 = vector.extract_strided_slice %46 {offsets = [0, 8], sizes = [8, 8], strides = [1, 1]} : vector<16x32xf32> to vector<8x8xf32>
    %71 = tpu.transpose %69, [1, 0] : vector<8x8xf32> -> vector<8x8xf32>
    %cst_31 = arith.constant dense<0.000000e+00> : vector<8x8xf32>
    %72 = tpu.matmul %68, %71, %cst_31 {dimension_numbers = #tpu.dot_dimension_numbers<[1], [0], [0], [1], [0, 0, 1, 1], [], []>} : vector<8x8xf32>, vector<8x8xf32>, vector<8x8xf32> -> vector<8x8xf32>
    %cst_32 = arith.constant 0.353553385 : f32
    %73 = vector.broadcast %cst_32 : f32 to vector<8x8xf32>
    %74 = arith.mulf %72, %73 : vector<8x8xf32>
    %cst_33 = arith.constant -1.000000e+30 : f32
    %75 = vector.broadcast %cst_33 : f32 to vector<8x8xf32>
    %76 = arith.select %10, %74, %75 : vector<8x8xi1>, vector<8x8xf32>
    %cst_34 = arith.constant dense<0xFF800000> : vector<8xf32>
    %77 = vector.multi_reduction <maximumf>, %76, %cst_34 [1] : vector<8x8xf32> to vector<8xf32>
    %78 = vector.shape_cast %77 : vector<8xf32> to vector<8x1xf32>
    %79 = vector.broadcast %78 : vector<8x1xf32> to vector<8x8xf32>
    %80 = arith.subf %76, %79 : vector<8x8xf32>
    %81 = math.exp %80 : vector<8x8xf32>
    %cst_35 = arith.constant dense<0.000000e+00> : vector<8xf32>
    %82 = vector.multi_reduction <add>, %81, %cst_35 [1] : vector<8x8xf32> to vector<8xf32>
    %83 = vector.shape_cast %82 : vector<8xf32> to vector<8x1xf32>
    %84 = tpu.reciprocal %83 {approx = true} : vector<8x1xf32> -> vector<8x1xf32>
    %85 = vector.broadcast %84 : vector<8x1xf32> to vector<8x8xf32>
    %86 = arith.mulf %81, %85 : vector<8x8xf32>
    %cst_36 = arith.constant dense<0.000000e+00> : vector<8x8xf32>
    %87 = tpu.matmul %86, %70, %cst_36 {dimension_numbers = #tpu.dot_dimension_numbers<[1], [0], [0], [1], [0, 0, 1, 1], [], []>} : vector<8x8xf32>, vector<8x8xf32>, vector<8x8xf32> -> vector<8x8xf32>
    %c0_37 = arith.constant 0 : index
    %c8 = arith.constant 8 : index
    %88 = vector.load %arg19[%c0_37, %c8] : memref<16x32xf32, #tpu.memory_space<vmem>>, vector<8x8xf32>
    tpu.vector_store %arg19[%c0_37, %c8], %87 {strides = array<i32>} : memref<16x32xf32, #tpu.memory_space<vmem>>, vector<8x8xf32>,
    %89 = vector.extract_strided_slice %44 {offsets = [0, 16], sizes = [8, 8], strides = [1, 1]} : vector<16x32xf32> to vector<8x8xf32>
    %90 = vector.extract_strided_slice %45 {offsets = [0, 16], sizes = [8, 8], strides = [1, 1]} : vector<16x32xf32> to vector<8x8xf32>
    %91 = vector.extract_strided_slice %46 {offsets = [0, 16], sizes = [8, 8], strides = [1, 1]} : vector<16x32xf32> to vector<8x8xf32>
    %92 = tpu.transpose %90, [1, 0] : vector<8x8xf32> -> vector<8x8xf32>
    %cst_38 = arith.constant dense<0.000000e+00> : vector<8x8xf32>
    %93 = tpu.matmul %89, %92, %cst_38 {dimension_numbers = #tpu.dot_dimension_numbers<[1], [0], [0], [1], [0, 0, 1, 1], [], []>} : vector<8x8xf32>, vector<8x8xf32>, vector<8x8xf32> -> vector<8x8xf32>
    %cst_39 = arith.constant 0.353553385 : f32
    %94 = vector.broadcast %cst_39 : f32 to vector<8x8xf32>
    %95 = arith.mulf %93, %94 : vector<8x8xf32>
    %cst_40 = arith.constant -1.000000e+30 : f32
    %96 = vector.broadcast %cst_40 : f32 to vector<8x8xf32>
    %97 = arith.select %10, %95, %96 : vector<8x8xi1>, vector<8x8xf32>
    %cst_41 = arith.constant dense<0xFF800000> : vector<8xf32>
    %98 = vector.multi_reduction <maximumf>, %97, %cst_41 [1] : vector<8x8xf32> to vector<8xf32>
    %99 = vector.shape_cast %98 : vector<8xf32> to vector<8x1xf32>
    %100 = vector.broadcast %99 : vector<8x1xf32> to vector<8x8xf32>
    %101 = arith.subf %97, %100 : vector<8x8xf32>
    %102 = math.exp %101 : vector<8x8xf32>
    %cst_42 = arith.constant dense<0.000000e+00> : vector<8xf32>
    %103 = vector.multi_reduction <add>, %102, %cst_42 [1] : vector<8x8xf32> to vector<8xf32>
    %104 = vector.shape_cast %103 : vector<8xf32> to vector<8x1xf32>
    %105 = tpu.reciprocal %104 {approx = true} : vector<8x1xf32> -> vector<8x1xf32>
    %106 = vector.broadcast %105 : vector<8x1xf32> to vector<8x8xf32>
    %107 = arith.mulf %102, %106 : vector<8x8xf32>
    %cst_43 = arith.constant dense<0.000000e+00> : vector<8x8xf32>
    %108 = tpu.matmul %107, %91, %cst_43 {dimension_numbers = #tpu.dot_dimension_numbers<[1], [0], [0], [1], [0, 0, 1, 1], [], []>} : vector<8x8xf32>, vector<8x8xf32>, vector<8x8xf32> -> vector<8x8xf32>
    %c0_44 = arith.constant 0 : index
    %c16 = arith.constant 16 : index
    %109 = vector.load %arg19[%c0_44, %c16] : memref<16x32xf32, #tpu.memory_space<vmem>>, vector<8x8xf32>
    tpu.vector_store %arg19[%c0_44, %c16], %108 {strides = array<i32>} : memref<16x32xf32, #tpu.memory_space<vmem>>, vector<8x8xf32>,
    %110 = vector.extract_strided_slice %44 {offsets = [0, 24], sizes = [8, 8], strides = [1, 1]} : vector<16x32xf32> to vector<8x8xf32>
    %111 = vector.extract_strided_slice %45 {offsets = [0, 24], sizes = [8, 8], strides = [1, 1]} : vector<16x32xf32> to vector<8x8xf32>
    %112 = vector.extract_strided_slice %46 {offsets = [0, 24], sizes = [8, 8], strides = [1, 1]} : vector<16x32xf32> to vector<8x8xf32>
    %113 = tpu.transpose %111, [1, 0] : vector<8x8xf32> -> vector<8x8xf32>
    %cst_45 = arith.constant dense<0.000000e+00> : vector<8x8xf32>
    %114 = tpu.matmul %110, %113, %cst_45 {dimension_numbers = #tpu.dot_dimension_numbers<[1], [0], [0], [1], [0, 0, 1, 1], [], []>} : vector<8x8xf32>, vector<8x8xf32>, vector<8x8xf32> -> vector<8x8xf32>
    %cst_46 = arith.constant 0.353553385 : f32
    %115 = vector.broadcast %cst_46 : f32 to vector<8x8xf32>
    %116 = arith.mulf %114, %115 : vector<8x8xf32>
    %cst_47 = arith.constant -1.000000e+30 : f32
    %117 = vector.broadcast %cst_47 : f32 to vector<8x8xf32>
    %118 = arith.select %10, %116, %117 : vector<8x8xi1>, vector<8x8xf32>
    %cst_48 = arith.constant dense<0xFF800000> : vector<8xf32>
    %119 = vector.multi_reduction <maximumf>, %118, %cst_48 [1] : vector<8x8xf32> to vector<8xf32>
    %120 = vector.shape_cast %119 : vector<8xf32> to vector<8x1xf32>
    %121 = vector.broadcast %120 : vector<8x1xf32> to vector<8x8xf32>
    %122 = arith.subf %118, %121 : vector<8x8xf32>
    %123 = math.exp %122 : vector<8x8xf32>
    %cst_49 = arith.constant dense<0.000000e+00> : vector<8xf32>
    %124 = vector.multi_reduction <add>, %123, %cst_49 [1] : vector<8x8xf32> to vector<8xf32>
    %125 = vector.shape_cast %124 : vector<8xf32> to vector<8x1xf32>
    %126 = tpu.reciprocal %125 {approx = true} : vector<8x1xf32> -> vector<8x1xf32>
    %127 = vector.broadcast %126 : vector<8x1xf32> to vector<8x8xf32>
    %128 = arith.mulf %123, %127 : vector<8x8xf32>
    %cst_50 = arith.constant dense<0.000000e+00> : vector<8x8xf32>
    %129 = tpu.matmul %128, %112, %cst_50 {dimension_numbers = #tpu.dot_dimension_numbers<[1], [0], [0], [1], [0, 0, 1, 1], [], []>} : vector<8x8xf32>, vector<8x8xf32>, vector<8x8xf32> -> vector<8x8xf32>
    %c0_51 = arith.constant 0 : index
    %c24 = arith.constant 24 : index
    %130 = vector.load %arg19[%c0_51, %c24] : memref<16x32xf32, #tpu.memory_space<vmem>>, vector<8x8xf32>
    tpu.vector_store %arg19[%c0_51, %c24], %129 {strides = array<i32>} : memref<16x32xf32, #tpu.memory_space<vmem>>, vector<8x8xf32>,
    %131 = vector.extract_strided_slice %44 {offsets = [8, 0], sizes = [8, 8], strides = [1, 1]} : vector<16x32xf32> to vector<8x8xf32>
    %132 = vector.extract_strided_slice %45 {offsets = [8, 0], sizes = [8, 8], strides = [1, 1]} : vector<16x32xf32> to vector<8x8xf32>
    %133 = vector.extract_strided_slice %46 {offsets = [8, 0], sizes = [8, 8], strides = [1, 1]} : vector<16x32xf32> to vector<8x8xf32>
    %134 = tpu.transpose %132, [1, 0] : vector<8x8xf32> -> vector<8x8xf32>
    %cst_52 = arith.constant dense<0.000000e+00> : vector<8x8xf32>
    %135 = tpu.matmul %131, %134, %cst_52 {dimension_numbers = #tpu.dot_dimension_numbers<[1], [0], [0], [1], [0, 0, 1, 1], [], []>} : vector<8x8xf32>, vector<8x8xf32>, vector<8x8xf32> -> vector<8x8xf32>
    %cst_53 = arith.constant 0.353553385 : f32
    %136 = vector.broadcast %cst_53 : f32 to vector<8x8xf32>
    %137 = arith.mulf %135, %136 : vector<8x8xf32>
    %cst_54 = arith.constant -1.000000e+30 : f32
    %138 = vector.broadcast %cst_54 : f32 to vector<8x8xf32>
    %139 = arith.select %10, %137, %138 : vector<8x8xi1>, vector<8x8xf32>
    %cst_55 = arith.constant dense<0xFF800000> : vector<8xf32>
    %140 = vector.multi_reduction <maximumf>, %139, %cst_55 [1] : vector<8x8xf32> to vector<8xf32>
    %141 = vector.shape_cast %140 : vector<8xf32> to vector<8x1xf32>
    %142 = vector.broadcast %141 : vector<8x1xf32> to vector<8x8xf32>
    %143 = arith.subf %139, %142 : vector<8x8xf32>
    %144 = math.exp %143 : vector<8x8xf32>
    %cst_56 = arith.constant dense<0.000000e+00> : vector<8xf32>
    %145 = vector.multi_reduction <add>, %144, %cst_56 [1] : vector<8x8xf32> to vector<8xf32>
    %146 = vector.shape_cast %145 : vector<8xf32> to vector<8x1xf32>
    %147 = tpu.reciprocal %146 {approx = true} : vector<8x1xf32> -> vector<8x1xf32>
    %148 = vector.broadcast %147 : vector<8x1xf32> to vector<8x8xf32>
    %149 = arith.mulf %144, %148 : vector<8x8xf32>
    %cst_57 = arith.constant dense<0.000000e+00> : vector<8x8xf32>
    %150 = tpu.matmul %149, %133, %cst_57 {dimension_numbers = #tpu.dot_dimension_numbers<[1], [0], [0], [1], [0, 0, 1, 1], [], []>} : vector<8x8xf32>, vector<8x8xf32>, vector<8x8xf32> -> vector<8x8xf32>
    %c8_58 = arith.constant 8 : index
    %c0_59 = arith.constant 0 : index
    %151 = vector.load %arg19[%c8_58, %c0_59] : memref<16x32xf32, #tpu.memory_space<vmem>>, vector<8x8xf32>
    tpu.vector_store %arg19[%c8_58, %c0_59], %150 {strides = array<i32>} : memref<16x32xf32, #tpu.memory_space<vmem>>, vector<8x8xf32>,
    %152 = vector.extract_strided_slice %44 {offsets = [8, 8], sizes = [8, 8], strides = [1, 1]} : vector<16x32xf32> to vector<8x8xf32>
    %153 = vector.extract_strided_slice %45 {offsets = [8, 8], sizes = [8, 8], strides = [1, 1]} : vector<16x32xf32> to vector<8x8xf32>
    %154 = vector.extract_strided_slice %46 {offsets = [8, 8], sizes = [8, 8], strides = [1, 1]} : vector<16x32xf32> to vector<8x8xf32>
    %155 = tpu.transpose %153, [1, 0] : vector<8x8xf32> -> vector<8x8xf32>
    %cst_60 = arith.constant dense<0.000000e+00> : vector<8x8xf32>
    %156 = tpu.matmul %152, %155, %cst_60 {dimension_numbers = #tpu.dot_dimension_numbers<[1], [0], [0], [1], [0, 0, 1, 1], [], []>} : vector<8x8xf32>, vector<8x8xf32>, vector<8x8xf32> -> vector<8x8xf32>
    %cst_61 = arith.constant 0.353553385 : f32
    %157 = vector.broadcast %cst_61 : f32 to vector<8x8xf32>
    %158 = arith.mulf %156, %157 : vector<8x8xf32>
    %cst_62 = arith.constant -1.000000e+30 : f32
    %159 = vector.broadcast %cst_62 : f32 to vector<8x8xf32>
    %160 = arith.select %10, %158, %159 : vector<8x8xi1>, vector<8x8xf32>
    %cst_63 = arith.constant dense<0xFF800000> : vector<8xf32>
    %161 = vector.multi_reduction <maximumf>, %160, %cst_63 [1] : vector<8x8xf32> to vector<8xf32>
    %162 = vector.shape_cast %161 : vector<8xf32> to vector<8x1xf32>
    %163 = vector.broadcast %162 : vector<8x1xf32> to vector<8x8xf32>
    %164 = arith.subf %160, %163 : vector<8x8xf32>
    %165 = math.exp %164 : vector<8x8xf32>
    %cst_64 = arith.constant dense<0.000000e+00> : vector<8xf32>
    %166 = vector.multi_reduction <add>, %165, %cst_64 [1] : vector<8x8xf32> to vector<8xf32>
    %167 = vector.shape_cast %166 : vector<8xf32> to vector<8x1xf32>
    %168 = tpu.reciprocal %167 {approx = true} : vector<8x1xf32> -> vector<8x1xf32>
    %169 = vector.broadcast %168 : vector<8x1xf32> to vector<8x8xf32>
    %170 = arith.mulf %165, %169 : vector<8x8xf32>
    %cst_65 = arith.constant dense<0.000000e+00> : vector<8x8xf32>
    %171 = tpu.matmul %170, %154, %cst_65 {dimension_numbers = #tpu.dot_dimension_numbers<[1], [0], [0], [1], [0, 0, 1, 1], [], []>} : vector<8x8xf32>, vector<8x8xf32>, vector<8x8xf32> -> vector<8x8xf32>
    %c8_66 = arith.constant 8 : index
    %c8_67 = arith.constant 8 : index
    %172 = vector.load %arg19[%c8_66, %c8_67] : memref<16x32xf32, #tpu.memory_space<vmem>>, vector<8x8xf32>
    tpu.vector_store %arg19[%c8_66, %c8_67], %171 {strides = array<i32>} : memref<16x32xf32, #tpu.memory_space<vmem>>, vector<8x8xf32>,
    %173 = vector.extract_strided_slice %44 {offsets = [8, 16], sizes = [8, 8], strides = [1, 1]} : vector<16x32xf32> to vector<8x8xf32>
    %174 = vector.extract_strided_slice %45 {offsets = [8, 16], sizes = [8, 8], strides = [1, 1]} : vector<16x32xf32> to vector<8x8xf32>
    %175 = vector.extract_strided_slice %46 {offsets = [8, 16], sizes = [8, 8], strides = [1, 1]} : vector<16x32xf32> to vector<8x8xf32>
    %176 = tpu.transpose %174, [1, 0] : vector<8x8xf32> -> vector<8x8xf32>
    %cst_68 = arith.constant dense<0.000000e+00> : vector<8x8xf32>
    %177 = tpu.matmul %173, %176, %cst_68 {dimension_numbers = #tpu.dot_dimension_numbers<[1], [0], [0], [1], [0, 0, 1, 1], [], []>} : vector<8x8xf32>, vector<8x8xf32>, vector<8x8xf32> -> vector<8x8xf32>
    %cst_69 = arith.constant 0.353553385 : f32
    %178 = vector.broadcast %cst_69 : f32 to vector<8x8xf32>
    %179 = arith.mulf %177, %178 : vector<8x8xf32>
    %cst_70 = arith.constant -1.000000e+30 : f32
    %180 = vector.broadcast %cst_70 : f32 to vector<8x8xf32>
    %181 = arith.select %10, %179, %180 : vector<8x8xi1>, vector<8x8xf32>
    %cst_71 = arith.constant dense<0xFF800000> : vector<8xf32>
    %182 = vector.multi_reduction <maximumf>, %181, %cst_71 [1] : vector<8x8xf32> to vector<8xf32>
    %183 = vector.shape_cast %182 : vector<8xf32> to vector<8x1xf32>
    %184 = vector.broadcast %183 : vector<8x1xf32> to vector<8x8xf32>
    %185 = arith.subf %181, %184 : vector<8x8xf32>
    %186 = math.exp %185 : vector<8x8xf32>
    %cst_72 = arith.constant dense<0.000000e+00> : vector<8xf32>
    %187 = vector.multi_reduction <add>, %186, %cst_72 [1] : vector<8x8xf32> to vector<8xf32>
    %188 = vector.shape_cast %187 : vector<8xf32> to vector<8x1xf32>
    %189 = tpu.reciprocal %188 {approx = true} : vector<8x1xf32> -> vector<8x1xf32>
    %190 = vector.broadcast %189 : vector<8x1xf32> to vector<8x8xf32>
    %191 = arith.mulf %186, %190 : vector<8x8xf32>
    %cst_73 = arith.constant dense<0.000000e+00> : vector<8x8xf32>
    %192 = tpu.matmul %191, %175, %cst_73 {dimension_numbers = #tpu.dot_dimension_numbers<[1], [0], [0], [1], [0, 0, 1, 1], [], []>} : vector<8x8xf32>, vector<8x8xf32>, vector<8x8xf32> -> vector<8x8xf32>
    %c8_74 = arith.constant 8 : index
    %c16_75 = arith.constant 16 : index
    %193 = vector.load %arg19[%c8_74, %c16_75] : memref<16x32xf32, #tpu.memory_space<vmem>>, vector<8x8xf32>
    tpu.vector_store %arg19[%c8_74, %c16_75], %192 {strides = array<i32>} : memref<16x32xf32, #tpu.memory_space<vmem>>, vector<8x8xf32>,
    %194 = vector.extract_strided_slice %44 {offsets = [8, 24], sizes = [8, 8], strides = [1, 1]} : vector<16x32xf32> to vector<8x8xf32>
    %195 = vector.extract_strided_slice %45 {offsets = [8, 24], sizes = [8, 8], strides = [1, 1]} : vector<16x32xf32> to vector<8x8xf32>
    %196 = vector.extract_strided_slice %46 {offsets = [8, 24], sizes = [8, 8], strides = [1, 1]} : vector<16x32xf32> to vector<8x8xf32>
    %197 = tpu.transpose %195, [1, 0] : vector<8x8xf32> -> vector<8x8xf32>
    %cst_76 = arith.constant dense<0.000000e+00> : vector<8x8xf32>
    %198 = tpu.matmul %194, %197, %cst_76 {dimension_numbers = #tpu.dot_dimension_numbers<[1], [0], [0], [1], [0, 0, 1, 1], [], []>} : vector<8x8xf32>, vector<8x8xf32>, vector<8x8xf32> -> vector<8x8xf32>
    %cst_77 = arith.constant 0.353553385 : f32
    %199 = vector.broadcast %cst_77 : f32 to vector<8x8xf32>
    %200 = arith.mulf %198, %199 : vector<8x8xf32>
    %cst_78 = arith.constant -1.000000e+30 : f32
    %201 = vector.broadcast %cst_78 : f32 to vector<8x8xf32>
    %202 = arith.select %10, %200, %201 : vector<8x8xi1>, vector<8x8xf32>
    %cst_79 = arith.constant dense<0xFF800000> : vector<8xf32>
    %203 = vector.multi_reduction <maximumf>, %202, %cst_79 [1] : vector<8x8xf32> to vector<8xf32>
    %204 = vector.shape_cast %203 : vector<8xf32> to vector<8x1xf32>
    %205 = vector.broadcast %204 : vector<8x1xf32> to vector<8x8xf32>
    %206 = arith.subf %202, %205 : vector<8x8xf32>
    %207 = math.exp %206 : vector<8x8xf32>
    %cst_80 = arith.constant dense<0.000000e+00> : vector<8xf32>
    %208 = vector.multi_reduction <add>, %207, %cst_80 [1] : vector<8x8xf32> to vector<8xf32>
    %209 = vector.shape_cast %208 : vector<8xf32> to vector<8x1xf32>
    %210 = tpu.reciprocal %209 {approx = true} : vector<8x1xf32> -> vector<8x1xf32>
    %211 = vector.broadcast %210 : vector<8x1xf32> to vector<8x8xf32>
    %212 = arith.mulf %207, %211 : vector<8x8xf32>
    %cst_81 = arith.constant dense<0.000000e+00> : vector<8x8xf32>
    %213 = tpu.matmul %212, %196, %cst_81 {dimension_numbers = #tpu.dot_dimension_numbers<[1], [0], [0], [1], [0, 0, 1, 1], [], []>} : vector<8x8xf32>, vector<8x8xf32>, vector<8x8xf32> -> vector<8x8xf32>
    %c8_82 = arith.constant 8 : index
    %c24_83 = arith.constant 24 : index
    %214 = vector.load %arg19[%c8_82, %c24_83] : memref<16x32xf32, #tpu.memory_space<vmem>>, vector<8x8xf32>
    tpu.vector_store %arg19[%c8_82, %c24_83], %213 {strides = array<i32>} : memref<16x32xf32, #tpu.memory_space<vmem>>, vector<8x8xf32>,
    %c0_84 = arith.constant 0 : index
    %c0_85 = arith.constant 0 : index
    %215 = vector.load %arg19[%c0_84, %c0_85] : memref<16x32xf32, #tpu.memory_space<vmem>>, vector<16x32xf32>
    %c0_86 = arith.constant 0 : index
    %c0_87 = arith.constant 0 : index
    %c0_88 = arith.constant 0 : index
    %216 = vector.load %arg7[%c0_86, %c0_87, %c0_88] : memref<2x32x32xf32, #tpu.memory_space<vmem>>, vector<1x32x32xf32>
    %217 = vector.shape_cast %216 : vector<1x32x32xf32> to vector<32x32xf32>
    %cst_89 = arith.constant dense<0.000000e+00> : vector<16x32xf32>
    %218 = tpu.matmul %215, %217, %cst_89 {dimension_numbers = #tpu.dot_dimension_numbers<[1], [0], [0], [1], [0, 0, 1, 1], [], []>} : vector<16x32xf32>, vector<32x32xf32>, vector<16x32xf32> -> vector<16x32xf32>
    %219 = arith.addf %7, %218 : vector<16x32xf32>
    %c0_90 = arith.constant 0 : index
    %c0_91 = arith.constant 0 : index
    %c0_92 = arith.constant 0 : index
    %220 = vector.load %arg8[%c0_90, %c0_91, %c0_92] : memref<2x1x32xf32, #tpu.memory_space<vmem>>, vector<1x1x32xf32>
    %221 = vector.shape_cast %220 : vector<1x1x32xf32> to vector<1x32xf32>
    %222 = vector.broadcast %221 : vector<1x32xf32> to vector<16x32xf32>
    %223 = arith.addf %219, %222 : vector<16x32xf32>
    %c0_93 = arith.constant 0 : index
    %c0_94 = arith.constant 0 : index
    %c0_95 = arith.constant 0 : index
    %224 = vector.load %arg9[%c0_93, %c0_94, %c0_95] : memref<2x1x32xf32, #tpu.memory_space<vmem>>, vector<1x1x32xf32>
    %225 = vector.shape_cast %224 : vector<1x1x32xf32> to vector<1x32xf32>
    %c0_96 = arith.constant 0 : index
    %c0_97 = arith.constant 0 : index
    %c0_98 = arith.constant 0 : index
    %226 = vector.load %arg10[%c0_96, %c0_97, %c0_98] : memref<2x1x32xf32, #tpu.memory_space<vmem>>, vector<1x1x32xf32>
    %227 = vector.shape_cast %226 : vector<1x1x32xf32> to vector<1x32xf32>
    %cst_99 = arith.constant dense<0.000000e+00> : vector<16xf32>
    %228 = vector.multi_reduction <add>, %223, %cst_99 [1] : vector<16x32xf32> to vector<16xf32>
    %229 = vector.shape_cast %228 : vector<16xf32> to vector<16x1xf32>
    %cst_100 = arith.constant 3.200000e+01 : f32
    %230 = vector.broadcast %cst_100 : f32 to vector<16x1xf32>
    %231 = arith.divf %229, %230 : vector<16x1xf32>
    %232 = vector.broadcast %231 : vector<16x1xf32> to vector<16x32xf32>
    %233 = arith.subf %223, %232 : vector<16x32xf32>
    %234 = arith.mulf %233, %233 : vector<16x32xf32>
    %cst_101 = arith.constant dense<0.000000e+00> : vector<16xf32>
    %235 = vector.multi_reduction <add>, %234, %cst_101 [1] : vector<16x32xf32> to vector<16xf32>
    %236 = vector.shape_cast %235 : vector<16xf32> to vector<16x1xf32>
    %cst_102 = arith.constant 3.200000e+01 : f32
    %237 = vector.broadcast %cst_102 : f32 to vector<16x1xf32>
    %238 = arith.divf %236, %237 : vector<16x1xf32>
    %239 = vector.broadcast %231 : vector<16x1xf32> to vector<16x32xf32>
    %240 = arith.subf %223, %239 : vector<16x32xf32>
    %cst_103 = arith.constant 9.99999974E-6 : f32
    %241 = vector.broadcast %cst_103 : f32 to vector<16x1xf32>
    %242 = arith.addf %238, %241 : vector<16x1xf32>
    %243 = math.rsqrt %242 : vector<16x1xf32>
    %244 = vector.broadcast %243 : vector<16x1xf32> to vector<16x32xf32>
    %245 = arith.mulf %240, %244 : vector<16x32xf32>
    %246 = vector.broadcast %225 : vector<1x32xf32> to vector<16x32xf32>
    %247 = arith.mulf %245, %246 : vector<16x32xf32>
    %248 = vector.broadcast %227 : vector<1x32xf32> to vector<16x32xf32>
    %249 = arith.addf %247, %248 : vector<16x32xf32>
    %c0_104 = arith.constant 0 : index
    %c0_105 = arith.constant 0 : index
    %c0_106 = arith.constant 0 : index
    %250 = vector.load %arg11[%c0_104, %c0_105, %c0_106] : memref<2x32x128xf32, #tpu.memory_space<vmem>>, vector<1x32x128xf32>
    %251 = vector.shape_cast %250 : vector<1x32x128xf32> to vector<32x128xf32>
    %cst_107 = arith.constant dense<0.000000e+00> : vector<16x128xf32>
    %252 = tpu.matmul %249, %251, %cst_107 {dimension_numbers = #tpu.dot_dimension_numbers<[1], [0], [0], [1], [0, 0, 1, 1], [], []>} : vector<16x32xf32>, vector<32x128xf32>, vector<16x128xf32> -> vector<16x128xf32>
    %c0_108 = arith.constant 0 : index
    %c0_109 = arith.constant 0 : index
    %c0_110 = arith.constant 0 : index
    %253 = vector.load %arg12[%c0_108, %c0_109, %c0_110] : memref<2x1x128xf32, #tpu.memory_space<vmem>>, vector<1x1x128xf32>
    %254 = vector.shape_cast %253 : vector<1x1x128xf32> to vector<1x128xf32>
    %255 = vector.broadcast %254 : vector<1x128xf32> to vector<16x128xf32>
    %256 = arith.addf %252, %255 : vector<16x128xf32>
    %cst_111 = arith.constant 1.702000e+00 : f32
    %257 = vector.broadcast %cst_111 : f32 to vector<16x128xf32>
    %258 = arith.mulf %257, %256 : vector<16x128xf32>
    %259 = arith.negf %258 : vector<16x128xf32>
    %260 = math.exp %259 : vector<16x128xf32>
    %cst_112 = arith.constant 1.000000e+00 : f32
    %261 = vector.broadcast %cst_112 : f32 to vector<16x128xf32>
    %262 = arith.addf %261, %260 : vector<16x128xf32>
    %263 = arith.divf %261, %262 : vector<16x128xf32>
    %264 = arith.mulf %256, %263 : vector<16x128xf32>
    %c0_113 = arith.constant 0 : index
    %c0_114 = arith.constant 0 : index
    %c0_115 = arith.constant 0 : index
    %265 = vector.load %arg13[%c0_113, %c0_114, %c0_115] : memref<2x128x32xf32, #tpu.memory_space<vmem>>, vector<1x128x32xf32>
    %266 = vector.shape_cast %265 : vector<1x128x32xf32> to vector<128x32xf32>
    %cst_116 = arith.constant dense<0.000000e+00> : vector<16x32xf32>
    %267 = tpu.matmul %264, %266, %cst_116 {dimension_numbers = #tpu.dot_dimension_numbers<[1], [0], [0], [1], [0, 0, 1, 1], [], []>} : vector<16x128xf32>, vector<128x32xf32>, vector<16x32xf32> -> vector<16x32xf32>
    %268 = arith.addf %223, %267 : vector<16x32xf32>
    %c0_117 = arith.constant 0 : index
    %c0_118 = arith.constant 0 : index
    %c0_119 = arith.constant 0 : index
    %269 = vector.load %arg14[%c0_117, %c0_118, %c0_119] : memref<2x1x32xf32, #tpu.memory_space<vmem>>, vector<1x1x32xf32>
    %270 = vector.shape_cast %269 : vector<1x1x32xf32> to vector<1x32xf32>
    %271 = vector.broadcast %270 : vector<1x32xf32> to vector<16x32xf32>
    %272 = arith.addf %268, %271 : vector<16x32xf32>
    %c1_120 = arith.constant 1 : index
    %c0_121 = arith.constant 0 : index
    %c0_122 = arith.constant 0 : index
    %273 = vector.load %arg3[%c1_120, %c0_121, %c0_122] : memref<2x1x32xf32, #tpu.memory_space<vmem>>, vector<1x1x32xf32>
    %274 = vector.shape_cast %273 : vector<1x1x32xf32> to vector<1x32xf32>
    %c1_123 = arith.constant 1 : index
    %c0_124 = arith.constant 0 : index
    %c0_125 = arith.constant 0 : index
    %275 = vector.load %arg4[%c1_123, %c0_124, %c0_125] : memref<2x1x32xf32, #tpu.memory_space<vmem>>, vector<1x1x32xf32>
    %276 = vector.shape_cast %275 : vector<1x1x32xf32> to vector<1x32xf32>
    %cst_126 = arith.constant dense<0.000000e+00> : vector<16xf32>
    %277 = vector.multi_reduction <add>, %272, %cst_126 [1] : vector<16x32xf32> to vector<16xf32>
    %278 = vector.shape_cast %277 : vector<16xf32> to vector<16x1xf32>
    %cst_127 = arith.constant 3.200000e+01 : f32
    %279 = vector.broadcast %cst_127 : f32 to vector<16x1xf32>
    %280 = arith.divf %278, %279 : vector<16x1xf32>
    %281 = vector.broadcast %280 : vector<16x1xf32> to vector<16x32xf32>
    %282 = arith.subf %272, %281 : vector<16x32xf32>
    %283 = arith.mulf %282, %282 : vector<16x32xf32>
    %cst_128 = arith.constant dense<0.000000e+00> : vector<16xf32>
    %284 = vector.multi_reduction <add>, %283, %cst_128 [1] : vector<16x32xf32> to vector<16xf32>
    %285 = vector.shape_cast %284 : vector<16xf32> to vector<16x1xf32>
    %cst_129 = arith.constant 3.200000e+01 : f32
    %286 = vector.broadcast %cst_129 : f32 to vector<16x1xf32>
    %287 = arith.divf %285, %286 : vector<16x1xf32>
    %288 = vector.broadcast %280 : vector<16x1xf32> to vector<16x32xf32>
    %289 = arith.subf %272, %288 : vector<16x32xf32>
    %cst_130 = arith.constant 9.99999974E-6 : f32
    %290 = vector.broadcast %cst_130 : f32 to vector<16x1xf32>
    %291 = arith.addf %287, %290 : vector<16x1xf32>
    %292 = math.rsqrt %291 : vector<16x1xf32>
    %293 = vector.broadcast %292 : vector<16x1xf32> to vector<16x32xf32>
    %294 = arith.mulf %289, %293 : vector<16x32xf32>
    %295 = vector.broadcast %274 : vector<1x32xf32> to vector<16x32xf32>
    %296 = arith.mulf %294, %295 : vector<16x32xf32>
    %297 = vector.broadcast %276 : vector<1x32xf32> to vector<16x32xf32>
    %298 = arith.addf %296, %297 : vector<16x32xf32>
    %c1_131 = arith.constant 1 : index
    %c0_132 = arith.constant 0 : index
    %c0_133 = arith.constant 0 : index
    %299 = vector.load %arg5[%c1_131, %c0_132, %c0_133] : memref<2x32x96xf32, #tpu.memory_space<vmem>>, vector<1x32x96xf32>
    %300 = vector.shape_cast %299 : vector<1x32x96xf32> to vector<32x96xf32>
    %cst_134 = arith.constant dense<0.000000e+00> : vector<16x96xf32>
    %301 = tpu.matmul %298, %300, %cst_134 {dimension_numbers = #tpu.dot_dimension_numbers<[1], [0], [0], [1], [0, 0, 1, 1], [], []>} : vector<16x32xf32>, vector<32x96xf32>, vector<16x96xf32> -> vector<16x96xf32>
    %c1_135 = arith.constant 1 : index
    %c0_136 = arith.constant 0 : index
    %c0_137 = arith.constant 0 : index
    %302 = vector.load %arg6[%c1_135, %c0_136, %c0_137] : memref<2x1x96xf32, #tpu.memory_space<vmem>>, vector<1x1x96xf32>
    %303 = vector.shape_cast %302 : vector<1x1x96xf32> to vector<1x96xf32>
    %304 = vector.broadcast %303 : vector<1x96xf32> to vector<16x96xf32>
    %305 = arith.addf %301, %304 : vector<16x96xf32>
    %306 = vector.extract_strided_slice %305 {offsets = [0, 0], sizes = [16, 32], strides = [1, 1]} : vector<16x96xf32> to vector<16x32xf32>
    %307 = vector.extract_strided_slice %305 {offsets = [0, 32], sizes = [16, 32], strides = [1, 1]} : vector<16x96xf32> to vector<16x32xf32>
    %308 = vector.extract_strided_slice %305 {offsets = [0, 64], sizes = [16, 32], strides = [1, 1]} : vector<16x96xf32> to vector<16x32xf32>
    %309 = vector.extract_strided_slice %306 {offsets = [0, 0], sizes = [8, 8], strides = [1, 1]} : vector<16x32xf32> to vector<8x8xf32>
    %310 = vector.extract_strided_slice %307 {offsets = [0, 0], sizes = [8, 8], strides = [1, 1]} : vector<16x32xf32> to vector<8x8xf32>
    %311 = vector.extract_strided_slice %308 {offsets = [0, 0], sizes = [8, 8], strides = [1, 1]} : vector<16x32xf32> to vector<8x8xf32>
    %312 = tpu.transpose %310, [1, 0] : vector<8x8xf32> -> vector<8x8xf32>
    %cst_138 = arith.constant dense<0.000000e+00> : vector<8x8xf32>
    %313 = tpu.matmul %309, %312, %cst_138 {dimension_numbers = #tpu.dot_dimension_numbers<[1], [0], [0], [1], [0, 0, 1, 1], [], []>} : vector<8x8xf32>, vector<8x8xf32>, vector<8x8xf32> -> vector<8x8xf32>
    %cst_139 = arith.constant 0.353553385 : f32
    %314 = vector.broadcast %cst_139 : f32 to vector<8x8xf32>
    %315 = arith.mulf %313, %314 : vector<8x8xf32>
    %cst_140 = arith.constant -1.000000e+30 : f32
    %316 = vector.broadcast %cst_140 : f32 to vector<8x8xf32>
    %317 = arith.select %10, %315, %316 : vector<8x8xi1>, vector<8x8xf32>
    %cst_141 = arith.constant dense<0xFF800000> : vector<8xf32>
    %318 = vector.multi_reduction <maximumf>, %317, %cst_141 [1] : vector<8x8xf32> to vector<8xf32>
    %319 = vector.shape_cast %318 : vector<8xf32> to vector<8x1xf32>
    %320 = vector.broadcast %319 : vector<8x1xf32> to vector<8x8xf32>
    %321 = arith.subf %317, %320 : vector<8x8xf32>
    %322 = math.exp %321 : vector<8x8xf32>
    %cst_142 = arith.constant dense<0.000000e+00> : vector<8xf32>
    %323 = vector.multi_reduction <add>, %322, %cst_142 [1] : vector<8x8xf32> to vector<8xf32>
    %324 = vector.shape_cast %323 : vector<8xf32> to vector<8x1xf32>
    %325 = tpu.reciprocal %324 {approx = true} : vector<8x1xf32> -> vector<8x1xf32>
    %326 = vector.broadcast %325 : vector<8x1xf32> to vector<8x8xf32>
    %327 = arith.mulf %322, %326 : vector<8x8xf32>
    %cst_143 = arith.constant dense<0.000000e+00> : vector<8x8xf32>
    %328 = tpu.matmul %327, %311, %cst_143 {dimension_numbers = #tpu.dot_dimension_numbers<[1], [0], [0], [1], [0, 0, 1, 1], [], []>} : vector<8x8xf32>, vector<8x8xf32>, vector<8x8xf32> -> vector<8x8xf32>
    %c0_144 = arith.constant 0 : index
    %c0_145 = arith.constant 0 : index
    %329 = vector.load %arg19[%c0_144, %c0_145] : memref<16x32xf32, #tpu.memory_space<vmem>>, vector<8x8xf32>
    tpu.vector_store %arg19[%c0_144, %c0_145], %328 {strides = array<i32>} : memref<16x32xf32, #tpu.memory_space<vmem>>, vector<8x8xf32>,
    %330 = vector.extract_strided_slice %306 {offsets = [0, 8], sizes = [8, 8], strides = [1, 1]} : vector<16x32xf32> to vector<8x8xf32>
    %331 = vector.extract_strided_slice %307 {offsets = [0, 8], sizes = [8, 8], strides = [1, 1]} : vector<16x32xf32> to vector<8x8xf32>
    %332 = vector.extract_strided_slice %308 {offsets = [0, 8], sizes = [8, 8], strides = [1, 1]} : vector<16x32xf32> to vector<8x8xf32>
    %333 = tpu.transpose %331, [1, 0] : vector<8x8xf32> -> vector<8x8xf32>
    %cst_146 = arith.constant dense<0.000000e+00> : vector<8x8xf32>
    %334 = tpu.matmul %330, %333, %cst_146 {dimension_numbers = #tpu.dot_dimension_numbers<[1], [0], [0], [1], [0, 0, 1, 1], [], []>} : vector<8x8xf32>, vector<8x8xf32>, vector<8x8xf32> -> vector<8x8xf32>
    %cst_147 = arith.constant 0.353553385 : f32
    %335 = vector.broadcast %cst_147 : f32 to vector<8x8xf32>
    %336 = arith.mulf %334, %335 : vector<8x8xf32>
    %cst_148 = arith.constant -1.000000e+30 : f32
    %337 = vector.broadcast %cst_148 : f32 to vector<8x8xf32>
    %338 = arith.select %10, %336, %337 : vector<8x8xi1>, vector<8x8xf32>
    %cst_149 = arith.constant dense<0xFF800000> : vector<8xf32>
    %339 = vector.multi_reduction <maximumf>, %338, %cst_149 [1] : vector<8x8xf32> to vector<8xf32>
    %340 = vector.shape_cast %339 : vector<8xf32> to vector<8x1xf32>
    %341 = vector.broadcast %340 : vector<8x1xf32> to vector<8x8xf32>
    %342 = arith.subf %338, %341 : vector<8x8xf32>
    %343 = math.exp %342 : vector<8x8xf32>
    %cst_150 = arith.constant dense<0.000000e+00> : vector<8xf32>
    %344 = vector.multi_reduction <add>, %343, %cst_150 [1] : vector<8x8xf32> to vector<8xf32>
    %345 = vector.shape_cast %344 : vector<8xf32> to vector<8x1xf32>
    %346 = tpu.reciprocal %345 {approx = true} : vector<8x1xf32> -> vector<8x1xf32>
    %347 = vector.broadcast %346 : vector<8x1xf32> to vector<8x8xf32>
    %348 = arith.mulf %343, %347 : vector<8x8xf32>
    %cst_151 = arith.constant dense<0.000000e+00> : vector<8x8xf32>
    %349 = tpu.matmul %348, %332, %cst_151 {dimension_numbers = #tpu.dot_dimension_numbers<[1], [0], [0], [1], [0, 0, 1, 1], [], []>} : vector<8x8xf32>, vector<8x8xf32>, vector<8x8xf32> -> vector<8x8xf32>
    %c0_152 = arith.constant 0 : index
    %c8_153 = arith.constant 8 : index
    %350 = vector.load %arg19[%c0_152, %c8_153] : memref<16x32xf32, #tpu.memory_space<vmem>>, vector<8x8xf32>
    tpu.vector_store %arg19[%c0_152, %c8_153], %349 {strides = array<i32>} : memref<16x32xf32, #tpu.memory_space<vmem>>, vector<8x8xf32>,
    %351 = vector.extract_strided_slice %306 {offsets = [0, 16], sizes = [8, 8], strides = [1, 1]} : vector<16x32xf32> to vector<8x8xf32>
    %352 = vector.extract_strided_slice %307 {offsets = [0, 16], sizes = [8, 8], strides = [1, 1]} : vector<16x32xf32> to vector<8x8xf32>
    %353 = vector.extract_strided_slice %308 {offsets = [0, 16], sizes = [8, 8], strides = [1, 1]} : vector<16x32xf32> to vector<8x8xf32>
    %354 = tpu.transpose %352, [1, 0] : vector<8x8xf32> -> vector<8x8xf32>
    %cst_154 = arith.constant dense<0.000000e+00> : vector<8x8xf32>
    %355 = tpu.matmul %351, %354, %cst_154 {dimension_numbers = #tpu.dot_dimension_numbers<[1], [0], [0], [1], [0, 0, 1, 1], [], []>} : vector<8x8xf32>, vector<8x8xf32>, vector<8x8xf32> -> vector<8x8xf32>
    %cst_155 = arith.constant 0.353553385 : f32
    %356 = vector.broadcast %cst_155 : f32 to vector<8x8xf32>
    %357 = arith.mulf %355, %356 : vector<8x8xf32>
    %cst_156 = arith.constant -1.000000e+30 : f32
    %358 = vector.broadcast %cst_156 : f32 to vector<8x8xf32>
    %359 = arith.select %10, %357, %358 : vector<8x8xi1>, vector<8x8xf32>
    %cst_157 = arith.constant dense<0xFF800000> : vector<8xf32>
    %360 = vector.multi_reduction <maximumf>, %359, %cst_157 [1] : vector<8x8xf32> to vector<8xf32>
    %361 = vector.shape_cast %360 : vector<8xf32> to vector<8x1xf32>
    %362 = vector.broadcast %361 : vector<8x1xf32> to vector<8x8xf32>
    %363 = arith.subf %359, %362 : vector<8x8xf32>
    %364 = math.exp %363 : vector<8x8xf32>
    %cst_158 = arith.constant dense<0.000000e+00> : vector<8xf32>
    %365 = vector.multi_reduction <add>, %364, %cst_158 [1] : vector<8x8xf32> to vector<8xf32>
    %366 = vector.shape_cast %365 : vector<8xf32> to vector<8x1xf32>
    %367 = tpu.reciprocal %366 {approx = true} : vector<8x1xf32> -> vector<8x1xf32>
    %368 = vector.broadcast %367 : vector<8x1xf32> to vector<8x8xf32>
    %369 = arith.mulf %364, %368 : vector<8x8xf32>
    %cst_159 = arith.constant dense<0.000000e+00> : vector<8x8xf32>
    %370 = tpu.matmul %369, %353, %cst_159 {dimension_numbers = #tpu.dot_dimension_numbers<[1], [0], [0], [1], [0, 0, 1, 1], [], []>} : vector<8x8xf32>, vector<8x8xf32>, vector<8x8xf32> -> vector<8x8xf32>
    %c0_160 = arith.constant 0 : index
    %c16_161 = arith.constant 16 : index
    %371 = vector.load %arg19[%c0_160, %c16_161] : memref<16x32xf32, #tpu.memory_space<vmem>>, vector<8x8xf32>
    tpu.vector_store %arg19[%c0_160, %c16_161], %370 {strides = array<i32>} : memref<16x32xf32, #tpu.memory_space<vmem>>, vector<8x8xf32>,
    %372 = vector.extract_strided_slice %306 {offsets = [0, 24], sizes = [8, 8], strides = [1, 1]} : vector<16x32xf32> to vector<8x8xf32>
    %373 = vector.extract_strided_slice %307 {offsets = [0, 24], sizes = [8, 8], strides = [1, 1]} : vector<16x32xf32> to vector<8x8xf32>
    %374 = vector.extract_strided_slice %308 {offsets = [0, 24], sizes = [8, 8], strides = [1, 1]} : vector<16x32xf32> to vector<8x8xf32>
    %375 = tpu.transpose %373, [1, 0] : vector<8x8xf32> -> vector<8x8xf32>
    %cst_162 = arith.constant dense<0.000000e+00> : vector<8x8xf32>
    %376 = tpu.matmul %372, %375, %cst_162 {dimension_numbers = #tpu.dot_dimension_numbers<[1], [0], [0], [1], [0, 0, 1, 1], [], []>} : vector<8x8xf32>, vector<8x8xf32>, vector<8x8xf32> -> vector<8x8xf32>
    %cst_163 = arith.constant 0.353553385 : f32
    %377 = vector.broadcast %cst_163 : f32 to vector<8x8xf32>
    %378 = arith.mulf %376, %377 : vector<8x8xf32>
    %cst_164 = arith.constant -1.000000e+30 : f32
    %379 = vector.broadcast %cst_164 : f32 to vector<8x8xf32>
    %380 = arith.select %10, %378, %379 : vector<8x8xi1>, vector<8x8xf32>
    %cst_165 = arith.constant dense<0xFF800000> : vector<8xf32>
    %381 = vector.multi_reduction <maximumf>, %380, %cst_165 [1] : vector<8x8xf32> to vector<8xf32>
    %382 = vector.shape_cast %381 : vector<8xf32> to vector<8x1xf32>
    %383 = vector.broadcast %382 : vector<8x1xf32> to vector<8x8xf32>
    %384 = arith.subf %380, %383 : vector<8x8xf32>
    %385 = math.exp %384 : vector<8x8xf32>
    %cst_166 = arith.constant dense<0.000000e+00> : vector<8xf32>
    %386 = vector.multi_reduction <add>, %385, %cst_166 [1] : vector<8x8xf32> to vector<8xf32>
    %387 = vector.shape_cast %386 : vector<8xf32> to vector<8x1xf32>
    %388 = tpu.reciprocal %387 {approx = true} : vector<8x1xf32> -> vector<8x1xf32>
    %389 = vector.broadcast %388 : vector<8x1xf32> to vector<8x8xf32>
    %390 = arith.mulf %385, %389 : vector<8x8xf32>
    %cst_167 = arith.constant dense<0.000000e+00> : vector<8x8xf32>
    %391 = tpu.matmul %390, %374, %cst_167 {dimension_numbers = #tpu.dot_dimension_numbers<[1], [0], [0], [1], [0, 0, 1, 1], [], []>} : vector<8x8xf32>, vector<8x8xf32>, vector<8x8xf32> -> vector<8x8xf32>
    %c0_168 = arith.constant 0 : index
    %c24_169 = arith.constant 24 : index
    %392 = vector.load %arg19[%c0_168, %c24_169] : memref<16x32xf32, #tpu.memory_space<vmem>>, vector<8x8xf32>
    tpu.vector_store %arg19[%c0_168, %c24_169], %391 {strides = array<i32>} : memref<16x32xf32, #tpu.memory_space<vmem>>, vector<8x8xf32>,
    %393 = vector.extract_strided_slice %306 {offsets = [8, 0], sizes = [8, 8], strides = [1, 1]} : vector<16x32xf32> to vector<8x8xf32>
    %394 = vector.extract_strided_slice %307 {offsets = [8, 0], sizes = [8, 8], strides = [1, 1]} : vector<16x32xf32> to vector<8x8xf32>
    %395 = vector.extract_strided_slice %308 {offsets = [8, 0], sizes = [8, 8], strides = [1, 1]} : vector<16x32xf32> to vector<8x8xf32>
    %396 = tpu.transpose %394, [1, 0] : vector<8x8xf32> -> vector<8x8xf32>
    %cst_170 = arith.constant dense<0.000000e+00> : vector<8x8xf32>
    %397 = tpu.matmul %393, %396, %cst_170 {dimension_numbers = #tpu.dot_dimension_numbers<[1], [0], [0], [1], [0, 0, 1, 1], [], []>} : vector<8x8xf32>, vector<8x8xf32>, vector<8x8xf32> -> vector<8x8xf32>
    %cst_171 = arith.constant 0.353553385 : f32
    %398 = vector.broadcast %cst_171 : f32 to vector<8x8xf32>
    %399 = arith.mulf %397, %398 : vector<8x8xf32>
    %cst_172 = arith.constant -1.000000e+30 : f32
    %400 = vector.broadcast %cst_172 : f32 to vector<8x8xf32>
    %401 = arith.select %10, %399, %400 : vector<8x8xi1>, vector<8x8xf32>
    %cst_173 = arith.constant dense<0xFF800000> : vector<8xf32>
    %402 = vector.multi_reduction <maximumf>, %401, %cst_173 [1] : vector<8x8xf32> to vector<8xf32>
    %403 = vector.shape_cast %402 : vector<8xf32> to vector<8x1xf32>
    %404 = vector.broadcast %403 : vector<8x1xf32> to vector<8x8xf32>
    %405 = arith.subf %401, %404 : vector<8x8xf32>
    %406 = math.exp %405 : vector<8x8xf32>
    %cst_174 = arith.constant dense<0.000000e+00> : vector<8xf32>
    %407 = vector.multi_reduction <add>, %406, %cst_174 [1] : vector<8x8xf32> to vector<8xf32>
    %408 = vector.shape_cast %407 : vector<8xf32> to vector<8x1xf32>
    %409 = tpu.reciprocal %408 {approx = true} : vector<8x1xf32> -> vector<8x1xf32>
    %410 = vector.broadcast %409 : vector<8x1xf32> to vector<8x8xf32>
    %411 = arith.mulf %406, %410 : vector<8x8xf32>
    %cst_175 = arith.constant dense<0.000000e+00> : vector<8x8xf32>
    %412 = tpu.matmul %411, %395, %cst_175 {dimension_numbers = #tpu.dot_dimension_numbers<[1], [0], [0], [1], [0, 0, 1, 1], [], []>} : vector<8x8xf32>, vector<8x8xf32>, vector<8x8xf32> -> vector<8x8xf32>
    %c8_176 = arith.constant 8 : index
    %c0_177 = arith.constant 0 : index
    %413 = vector.load %arg19[%c8_176, %c0_177] : memref<16x32xf32, #tpu.memory_space<vmem>>, vector<8x8xf32>
    tpu.vector_store %arg19[%c8_176, %c0_177], %412 {strides = array<i32>} : memref<16x32xf32, #tpu.memory_space<vmem>>, vector<8x8xf32>,
    %414 = vector.extract_strided_slice %306 {offsets = [8, 8], sizes = [8, 8], strides = [1, 1]} : vector<16x32xf32> to vector<8x8xf32>
    %415 = vector.extract_strided_slice %307 {offsets = [8, 8], sizes = [8, 8], strides = [1, 1]} : vector<16x32xf32> to vector<8x8xf32>
    %416 = vector.extract_strided_slice %308 {offsets = [8, 8], sizes = [8, 8], strides = [1, 1]} : vector<16x32xf32> to vector<8x8xf32>
    %417 = tpu.transpose %415, [1, 0] : vector<8x8xf32> -> vector<8x8xf32>
    %cst_178 = arith.constant dense<0.000000e+00> : vector<8x8xf32>
    %418 = tpu.matmul %414, %417, %cst_178 {dimension_numbers = #tpu.dot_dimension_numbers<[1], [0], [0], [1], [0, 0, 1, 1], [], []>} : vector<8x8xf32>, vector<8x8xf32>, vector<8x8xf32> -> vector<8x8xf32>
    %cst_179 = arith.constant 0.353553385 : f32
    %419 = vector.broadcast %cst_179 : f32 to vector<8x8xf32>
    %420 = arith.mulf %418, %419 : vector<8x8xf32>
    %cst_180 = arith.constant -1.000000e+30 : f32
    %421 = vector.broadcast %cst_180 : f32 to vector<8x8xf32>
    %422 = arith.select %10, %420, %421 : vector<8x8xi1>, vector<8x8xf32>
    %cst_181 = arith.constant dense<0xFF800000> : vector<8xf32>
    %423 = vector.multi_reduction <maximumf>, %422, %cst_181 [1] : vector<8x8xf32> to vector<8xf32>
    %424 = vector.shape_cast %423 : vector<8xf32> to vector<8x1xf32>
    %425 = vector.broadcast %424 : vector<8x1xf32> to vector<8x8xf32>
    %426 = arith.subf %422, %425 : vector<8x8xf32>
    %427 = math.exp %426 : vector<8x8xf32>
    %cst_182 = arith.constant dense<0.000000e+00> : vector<8xf32>
    %428 = vector.multi_reduction <add>, %427, %cst_182 [1] : vector<8x8xf32> to vector<8xf32>
    %429 = vector.shape_cast %428 : vector<8xf32> to vector<8x1xf32>
    %430 = tpu.reciprocal %429 {approx = true} : vector<8x1xf32> -> vector<8x1xf32>
    %431 = vector.broadcast %430 : vector<8x1xf32> to vector<8x8xf32>
    %432 = arith.mulf %427, %431 : vector<8x8xf32>
    %cst_183 = arith.constant dense<0.000000e+00> : vector<8x8xf32>
    %433 = tpu.matmul %432, %416, %cst_183 {dimension_numbers = #tpu.dot_dimension_numbers<[1], [0], [0], [1], [0, 0, 1, 1], [], []>} : vector<8x8xf32>, vector<8x8xf32>, vector<8x8xf32> -> vector<8x8xf32>
    %c8_184 = arith.constant 8 : index
    %c8_185 = arith.constant 8 : index
    %434 = vector.load %arg19[%c8_184, %c8_185] : memref<16x32xf32, #tpu.memory_space<vmem>>, vector<8x8xf32>
    tpu.vector_store %arg19[%c8_184, %c8_185], %433 {strides = array<i32>} : memref<16x32xf32, #tpu.memory_space<vmem>>, vector<8x8xf32>,
    %435 = vector.extract_strided_slice %306 {offsets = [8, 16], sizes = [8, 8], strides = [1, 1]} : vector<16x32xf32> to vector<8x8xf32>
    %436 = vector.extract_strided_slice %307 {offsets = [8, 16], sizes = [8, 8], strides = [1, 1]} : vector<16x32xf32> to vector<8x8xf32>
    %437 = vector.extract_strided_slice %308 {offsets = [8, 16], sizes = [8, 8], strides = [1, 1]} : vector<16x32xf32> to vector<8x8xf32>
    %438 = tpu.transpose %436, [1, 0] : vector<8x8xf32> -> vector<8x8xf32>
    %cst_186 = arith.constant dense<0.000000e+00> : vector<8x8xf32>
    %439 = tpu.matmul %435, %438, %cst_186 {dimension_numbers = #tpu.dot_dimension_numbers<[1], [0], [0], [1], [0, 0, 1, 1], [], []>} : vector<8x8xf32>, vector<8x8xf32>, vector<8x8xf32> -> vector<8x8xf32>
    %cst_187 = arith.constant 0.353553385 : f32
    %440 = vector.broadcast %cst_187 : f32 to vector<8x8xf32>
    %441 = arith.mulf %439, %440 : vector<8x8xf32>
    %cst_188 = arith.constant -1.000000e+30 : f32
    %442 = vector.broadcast %cst_188 : f32 to vector<8x8xf32>
    %443 = arith.select %10, %441, %442 : vector<8x8xi1>, vector<8x8xf32>
    %cst_189 = arith.constant dense<0xFF800000> : vector<8xf32>
    %444 = vector.multi_reduction <maximumf>, %443, %cst_189 [1] : vector<8x8xf32> to vector<8xf32>
    %445 = vector.shape_cast %444 : vector<8xf32> to vector<8x1xf32>
    %446 = vector.broadcast %445 : vector<8x1xf32> to vector<8x8xf32>
    %447 = arith.subf %443, %446 : vector<8x8xf32>
    %448 = math.exp %447 : vector<8x8xf32>
    %cst_190 = arith.constant dense<0.000000e+00> : vector<8xf32>
    %449 = vector.multi_reduction <add>, %448, %cst_190 [1] : vector<8x8xf32> to vector<8xf32>
    %450 = vector.shape_cast %449 : vector<8xf32> to vector<8x1xf32>
    %451 = tpu.reciprocal %450 {approx = true} : vector<8x1xf32> -> vector<8x1xf32>
    %452 = vector.broadcast %451 : vector<8x1xf32> to vector<8x8xf32>
    %453 = arith.mulf %448, %452 : vector<8x8xf32>
    %cst_191 = arith.constant dense<0.000000e+00> : vector<8x8xf32>
    %454 = tpu.matmul %453, %437, %cst_191 {dimension_numbers = #tpu.dot_dimension_numbers<[1], [0], [0], [1], [0, 0, 1, 1], [], []>} : vector<8x8xf32>, vector<8x8xf32>, vector<8x8xf32> -> vector<8x8xf32>
    %c8_192 = arith.constant 8 : index
    %c16_193 = arith.constant 16 : index
    %455 = vector.load %arg19[%c8_192, %c16_193] : memref<16x32xf32, #tpu.memory_space<vmem>>, vector<8x8xf32>
    tpu.vector_store %arg19[%c8_192, %c16_193], %454 {strides = array<i32>} : memref<16x32xf32, #tpu.memory_space<vmem>>, vector<8x8xf32>,
    %456 = vector.extract_strided_slice %306 {offsets = [8, 24], sizes = [8, 8], strides = [1, 1]} : vector<16x32xf32> to vector<8x8xf32>
    %457 = vector.extract_strided_slice %307 {offsets = [8, 24], sizes = [8, 8], strides = [1, 1]} : vector<16x32xf32> to vector<8x8xf32>
    %458 = vector.extract_strided_slice %308 {offsets = [8, 24], sizes = [8, 8], strides = [1, 1]} : vector<16x32xf32> to vector<8x8xf32>
    %459 = tpu.transpose %457, [1, 0] : vector<8x8xf32> -> vector<8x8xf32>
    %cst_194 = arith.constant dense<0.000000e+00> : vector<8x8xf32>
    %460 = tpu.matmul %456, %459, %cst_194 {dimension_numbers = #tpu.dot_dimension_numbers<[1], [0], [0], [1], [0, 0, 1, 1], [], []>} : vector<8x8xf32>, vector<8x8xf32>, vector<8x8xf32> -> vector<8x8xf32>
    %cst_195 = arith.constant 0.353553385 : f32
    %461 = vector.broadcast %cst_195 : f32 to vector<8x8xf32>
    %462 = arith.mulf %460, %461 : vector<8x8xf32>
    %cst_196 = arith.constant -1.000000e+30 : f32
    %463 = vector.broadcast %cst_196 : f32 to vector<8x8xf32>
    %464 = arith.select %10, %462, %463 : vector<8x8xi1>, vector<8x8xf32>
    %cst_197 = arith.constant dense<0xFF800000> : vector<8xf32>
    %465 = vector.multi_reduction <maximumf>, %464, %cst_197 [1] : vector<8x8xf32> to vector<8xf32>
    %466 = vector.shape_cast %465 : vector<8xf32> to vector<8x1xf32>
    %467 = vector.broadcast %466 : vector<8x1xf32> to vector<8x8xf32>
    %468 = arith.subf %464, %467 : vector<8x8xf32>
    %469 = math.exp %468 : vector<8x8xf32>
    %cst_198 = arith.constant dense<0.000000e+00> : vector<8xf32>
    %470 = vector.multi_reduction <add>, %469, %cst_198 [1] : vector<8x8xf32> to vector<8xf32>
    %471 = vector.shape_cast %470 : vector<8xf32> to vector<8x1xf32>
    %472 = tpu.reciprocal %471 {approx = true} : vector<8x1xf32> -> vector<8x1xf32>
    %473 = vector.broadcast %472 : vector<8x1xf32> to vector<8x8xf32>
    %474 = arith.mulf %469, %473 : vector<8x8xf32>
    %cst_199 = arith.constant dense<0.000000e+00> : vector<8x8xf32>
    %475 = tpu.matmul %474, %458, %cst_199 {dimension_numbers = #tpu.dot_dimension_numbers<[1], [0], [0], [1], [0, 0, 1, 1], [], []>} : vector<8x8xf32>, vector<8x8xf32>, vector<8x8xf32> -> vector<8x8xf32>
    %c8_200 = arith.constant 8 : index
    %c24_201 = arith.constant 24 : index
    %476 = vector.load %arg19[%c8_200, %c24_201] : memref<16x32xf32, #tpu.memory_space<vmem>>, vector<8x8xf32>
    tpu.vector_store %arg19[%c8_200, %c24_201], %475 {strides = array<i32>} : memref<16x32xf32, #tpu.memory_space<vmem>>, vector<8x8xf32>,
    %c0_202 = arith.constant 0 : index
    %c0_203 = arith.constant 0 : index
    %477 = vector.load %arg19[%c0_202, %c0_203] : memref<16x32xf32, #tpu.memory_space<vmem>>, vector<16x32xf32>
    %c1_204 = arith.constant 1 : index
    %c0_205 = arith.constant 0 : index
    %c0_206 = arith.constant 0 : index
    %478 = vector.load %arg7[%c1_204, %c0_205, %c0_206] : memref<2x32x32xf32, #tpu.memory_space<vmem>>, vector<1x32x32xf32>
    %479 = vector.shape_cast %478 : vector<1x32x32xf32> to vector<32x32xf32>
    %cst_207 = arith.constant dense<0.000000e+00> : vector<16x32xf32>
    %480 = tpu.matmul %477, %479, %cst_207 {dimension_numbers = #tpu.dot_dimension_numbers<[1], [0], [0], [1], [0, 0, 1, 1], [], []>} : vector<16x32xf32>, vector<32x32xf32>, vector<16x32xf32> -> vector<16x32xf32>
    %481 = arith.addf %272, %480 : vector<16x32xf32>
    %c1_208 = arith.constant 1 : index
    %c0_209 = arith.constant 0 : index
    %c0_210 = arith.constant 0 : index
    %482 = vector.load %arg8[%c1_208, %c0_209, %c0_210] : memref<2x1x32xf32, #tpu.memory_space<vmem>>, vector<1x1x32xf32>
    %483 = vector.shape_cast %482 : vector<1x1x32xf32> to vector<1x32xf32>
    %484 = vector.broadcast %483 : vector<1x32xf32> to vector<16x32xf32>
    %485 = arith.addf %481, %484 : vector<16x32xf32>
    %c1_211 = arith.constant 1 : index
    %c0_212 = arith.constant 0 : index
    %c0_213 = arith.constant 0 : index
    %486 = vector.load %arg9[%c1_211, %c0_212, %c0_213] : memref<2x1x32xf32, #tpu.memory_space<vmem>>, vector<1x1x32xf32>
    %487 = vector.shape_cast %486 : vector<1x1x32xf32> to vector<1x32xf32>
    %c1_214 = arith.constant 1 : index
    %c0_215 = arith.constant 0 : index
    %c0_216 = arith.constant 0 : index
    %488 = vector.load %arg10[%c1_214, %c0_215, %c0_216] : memref<2x1x32xf32, #tpu.memory_space<vmem>>, vector<1x1x32xf32>
    %489 = vector.shape_cast %488 : vector<1x1x32xf32> to vector<1x32xf32>
    %cst_217 = arith.constant dense<0.000000e+00> : vector<16xf32>
    %490 = vector.multi_reduction <add>, %485, %cst_217 [1] : vector<16x32xf32> to vector<16xf32>
    %491 = vector.shape_cast %490 : vector<16xf32> to vector<16x1xf32>
    %cst_218 = arith.constant 3.200000e+01 : f32
    %492 = vector.broadcast %cst_218 : f32 to vector<16x1xf32>
    %493 = arith.divf %491, %492 : vector<16x1xf32>
    %494 = vector.broadcast %493 : vector<16x1xf32> to vector<16x32xf32>
    %495 = arith.subf %485, %494 : vector<16x32xf32>
    %496 = arith.mulf %495, %495 : vector<16x32xf32>
    %cst_219 = arith.constant dense<0.000000e+00> : vector<16xf32>
    %497 = vector.multi_reduction <add>, %496, %cst_219 [1] : vector<16x32xf32> to vector<16xf32>
    %498 = vector.shape_cast %497 : vector<16xf32> to vector<16x1xf32>
    %cst_220 = arith.constant 3.200000e+01 : f32
    %499 = vector.broadcast %cst_220 : f32 to vector<16x1xf32>
    %500 = arith.divf %498, %499 : vector<16x1xf32>
    %501 = vector.broadcast %493 : vector<16x1xf32> to vector<16x32xf32>
    %502 = arith.subf %485, %501 : vector<16x32xf32>
    %cst_221 = arith.constant 9.99999974E-6 : f32
    %503 = vector.broadcast %cst_221 : f32 to vector<16x1xf32>
    %504 = arith.addf %500, %503 : vector<16x1xf32>
    %505 = math.rsqrt %504 : vector<16x1xf32>
    %506 = vector.broadcast %505 : vector<16x1xf32> to vector<16x32xf32>
    %507 = arith.mulf %502, %506 : vector<16x32xf32>
    %508 = vector.broadcast %487 : vector<1x32xf32> to vector<16x32xf32>
    %509 = arith.mulf %507, %508 : vector<16x32xf32>
    %510 = vector.broadcast %489 : vector<1x32xf32> to vector<16x32xf32>
    %511 = arith.addf %509, %510 : vector<16x32xf32>
    %c1_222 = arith.constant 1 : index
    %c0_223 = arith.constant 0 : index
    %c0_224 = arith.constant 0 : index
    %512 = vector.load %arg11[%c1_222, %c0_223, %c0_224] : memref<2x32x128xf32, #tpu.memory_space<vmem>>, vector<1x32x128xf32>
    %513 = vector.shape_cast %512 : vector<1x32x128xf32> to vector<32x128xf32>
    %cst_225 = arith.constant dense<0.000000e+00> : vector<16x128xf32>
    %514 = tpu.matmul %511, %513, %cst_225 {dimension_numbers = #tpu.dot_dimension_numbers<[1], [0], [0], [1], [0, 0, 1, 1], [], []>} : vector<16x32xf32>, vector<32x128xf32>, vector<16x128xf32> -> vector<16x128xf32>
    %c1_226 = arith.constant 1 : index
    %c0_227 = arith.constant 0 : index
    %c0_228 = arith.constant 0 : index
    %515 = vector.load %arg12[%c1_226, %c0_227, %c0_228] : memref<2x1x128xf32, #tpu.memory_space<vmem>>, vector<1x1x128xf32>
    %516 = vector.shape_cast %515 : vector<1x1x128xf32> to vector<1x128xf32>
    %517 = vector.broadcast %516 : vector<1x128xf32> to vector<16x128xf32>
    %518 = arith.addf %514, %517 : vector<16x128xf32>
    %cst_229 = arith.constant 1.702000e+00 : f32
    %519 = vector.broadcast %cst_229 : f32 to vector<16x128xf32>
    %520 = arith.mulf %519, %518 : vector<16x128xf32>
    %521 = arith.negf %520 : vector<16x128xf32>
    %522 = math.exp %521 : vector<16x128xf32>
    %cst_230 = arith.constant 1.000000e+00 : f32
    %523 = vector.broadcast %cst_230 : f32 to vector<16x128xf32>
    %524 = arith.addf %523, %522 : vector<16x128xf32>
    %525 = arith.divf %523, %524 : vector<16x128xf32>
    %526 = arith.mulf %518, %525 : vector<16x128xf32>
    %c1_231 = arith.constant 1 : index
    %c0_232 = arith.constant 0 : index
    %c0_233 = arith.constant 0 : index
    %527 = vector.load %arg13[%c1_231, %c0_232, %c0_233] : memref<2x128x32xf32, #tpu.memory_space<vmem>>, vector<1x128x32xf32>
    %528 = vector.shape_cast %527 : vector<1x128x32xf32> to vector<128x32xf32>
    %cst_234 = arith.constant dense<0.000000e+00> : vector<16x32xf32>
    %529 = tpu.matmul %526, %528, %cst_234 {dimension_numbers = #tpu.dot_dimension_numbers<[1], [0], [0], [1], [0, 0, 1, 1], [], []>} : vector<16x128xf32>, vector<128x32xf32>, vector<16x32xf32> -> vector<16x32xf32>
    %530 = arith.addf %485, %529 : vector<16x32xf32>
    %c1_235 = arith.constant 1 : index
    %c0_236 = arith.constant 0 : index
    %c0_237 = arith.constant 0 : index
    %531 = vector.load %arg14[%c1_235, %c0_236, %c0_237] : memref<2x1x32xf32, #tpu.memory_space<vmem>>, vector<1x1x32xf32>
    %532 = vector.shape_cast %531 : vector<1x1x32xf32> to vector<1x32xf32>
    %533 = vector.broadcast %532 : vector<1x32xf32> to vector<16x32xf32>
    %534 = arith.addf %530, %533 : vector<16x32xf32>
    %535 = tpu.iota {dimensions = array<i32: 0>} : vector<8x1xi32>
    %c0_238 = arith.constant 0 : index
    %536 = memref.load %arg0[%c0_238] : memref<2xi32, #tpu.memory_space<smem>>
    %537 = vector.broadcast %536 : i32 to vector<8x1xi32>
    %538 = arith.cmpi eq, %535, %537 : vector<8x1xi32>
    %539 = arith.extui %538 : vector<8x1xi1> to vector<8x1xi32>
    %540 = arith.sitofp %539 : vector<8x1xi32> to vector<8x1xf32>
    %541 = vector.extract_strided_slice %534 {offsets = [0, 0], sizes = [8, 32], strides = [1, 1]} : vector<16x32xf32> to vector<8x32xf32>
    %542 = vector.broadcast %540 : vector<8x1xf32> to vector<8x32xf32>
    %543 = arith.mulf %541, %542 : vector<8x32xf32>
    %cst_239 = arith.constant dense<0.000000e+00> : vector<32xf32>
    %544 = vector.multi_reduction <add>, %543, %cst_239 [0] : vector<8x32xf32> to vector<32xf32>
    %545 = vector.shape_cast %544 : vector<32xf32> to vector<1x32xf32>
    %c1_240 = arith.constant 1 : index
    %546 = memref.load %arg0[%c1_240] : memref<2xi32, #tpu.memory_space<smem>>
    %547 = vector.broadcast %546 : i32 to vector<8x1xi32>
    %548 = arith.cmpi eq, %535, %547 : vector<8x1xi32>
    %549 = arith.extui %548 : vector<8x1xi1> to vector<8x1xi32>
    %550 = arith.sitofp %549 : vector<8x1xi32> to vector<8x1xf32>
    %551 = vector.extract_strided_slice %534 {offsets = [8, 0], sizes = [8, 32], strides = [1, 1]} : vector<16x32xf32> to vector<8x32xf32>
    %552 = vector.broadcast %550 : vector<8x1xf32> to vector<8x32xf32>
    %553 = arith.mulf %551, %552 : vector<8x32xf32>
    %cst_241 = arith.constant dense<0.000000e+00> : vector<32xf32>
    %554 = vector.multi_reduction <add>, %553, %cst_241 [0] : vector<8x32xf32> to vector<32xf32>
    %555 = vector.shape_cast %554 : vector<32xf32> to vector<1x32xf32>
    %556 = tpu.concatenate %545, %555 in 0 : vector<1x32xf32>, vector<1x32xf32> -> vector<2x32xf32>
    %c0_242 = arith.constant 0 : index
    %c0_243 = arith.constant 0 : index
    %557 = vector.load %arg15[%c0_242, %c0_243] : memref<1x32xf32, #tpu.memory_space<vmem>>, vector<1x32xf32>
    %c0_244 = arith.constant 0 : index
    %c0_245 = arith.constant 0 : index
    %558 = vector.load %arg16[%c0_244, %c0_245] : memref<1x32xf32, #tpu.memory_space<vmem>>, vector<1x32xf32>
    %cst_246 = arith.constant dense<0.000000e+00> : vector<2xf32>
    %559 = vector.multi_reduction <add>, %556, %cst_246 [1] : vector<2x32xf32> to vector<2xf32>
    %560 = vector.shape_cast %559 : vector<2xf32> to vector<2x1xf32>
    %cst_247 = arith.constant 3.200000e+01 : f32
    %561 = vector.broadcast %cst_247 : f32 to vector<2x1xf32>
    %562 = arith.divf %560, %561 : vector<2x1xf32>
    %563 = vector.broadcast %562 : vector<2x1xf32> to vector<2x32xf32>
    %564 = arith.subf %556, %563 : vector<2x32xf32>
    %565 = arith.mulf %564, %564 : vector<2x32xf32>
    %cst_248 = arith.constant dense<0.000000e+00> : vector<2xf32>
    %566 = vector.multi_reduction <add>, %565, %cst_248 [1] : vector<2x32xf32> to vector<2xf32>
    %567 = vector.shape_cast %566 : vector<2xf32> to vector<2x1xf32>
    %cst_249 = arith.constant 3.200000e+01 : f32
    %568 = vector.broadcast %cst_249 : f32 to vector<2x1xf32>
    %569 = arith.divf %567, %568 : vector<2x1xf32>
    %570 = vector.broadcast %562 : vector<2x1xf32> to vector<2x32xf32>
    %571 = arith.subf %556, %570 : vector<2x32xf32>
    %cst_250 = arith.constant 9.99999974E-6 : f32
    %572 = vector.broadcast %cst_250 : f32 to vector<2x1xf32>
    %573 = arith.addf %569, %572 : vector<2x1xf32>
    %574 = math.rsqrt %573 : vector<2x1xf32>
    %575 = vector.broadcast %574 : vector<2x1xf32> to vector<2x32xf32>
    %576 = arith.mulf %571, %575 : vector<2x32xf32>
    %577 = vector.broadcast %557 : vector<1x32xf32> to vector<2x32xf32>
    %578 = arith.mulf %576, %577 : vector<2x32xf32>
    %579 = vector.broadcast %558 : vector<1x32xf32> to vector<2x32xf32>
    %580 = arith.addf %578, %579 : vector<2x32xf32>
    %c0_251 = arith.constant 0 : index
    %c0_252 = arith.constant 0 : index
    %581 = vector.load %arg17[%c0_251, %c0_252] : memref<32x128xf32, #tpu.memory_space<vmem>>, vector<32x128xf32>
    %cst_253 = arith.constant dense<0.000000e+00> : vector<2x128xf32>
    %582 = tpu.matmul %580, %581, %cst_253 {dimension_numbers = #tpu.dot_dimension_numbers<[1], [0], [0], [1], [0, 0, 1, 1], [], []>} : vector<2x32xf32>, vector<32x128xf32>, vector<2x128xf32> -> vector<2x128xf32>
    %c0_254 = arith.constant 0 : index
    %c0_255 = arith.constant 0 : index
    %583 = vector.load %arg18[%c0_254, %c0_255] : memref<2x128xf32, #tpu.memory_space<vmem>>, vector<2x128xf32>
    tpu.vector_store %arg18[%c0_254, %c0_255], %582 {strides = array<i32>} : memref<2x128xf32, #tpu.memory_space<vmem>>, vector<2x128xf32>,
    return
  }
}

</mosaic_0001>

<bundles_post_ra>
// kernel: text_encoder_forward.1
= control target key start
LH: loop header
LB: loop body
LE: loop exit
PB: predicated region body
PF: predicated region fallthrough
CT: control target
= control target key end

     0   :  { %s5505_s0 = inlined_call_operand.vmem [shape: s32[2], index: 0, kind: input, shape index: {}]   ;;  %s5506_s1 = inlined_call_operand.vmem [shape: f32[2,8,32], index: 1, kind: input, shape index: {}]   ;;  %s5507_s2 = inlined_call_operand.vmem [shape: f32[8,32], index: 2, kind: input, shape index: {}]   ;;  %s5508_s3 = inlined_call_operand.vmem [shape: f32[2,1,32], index: 3, kind: input, shape index: {}]   ;;  %s5509_s4 = inlined_call_operand.vmem [shape: f32[2,1,32], index: 4, kind: input, shape index: {}]   ;;  %s5510_s5 = inlined_call_operand.vmem [shape: f32[2,32,96], index: 5, kind: input, shape index: {}]   ;;  %s5511_s6 = inlined_call_operand.vmem [shape: f32[2,1,96], index: 6, kind: input, shape index: {}]   ;;  %s5512_s7 = inlined_call_operand.vmem [shape: f32[2,32,32], index: 7, kind: input, shape index: {}]   ;;  %s5513_s8 = inlined_call_operand.vmem [shape: f32[2,1,32], index: 8, kind: input, shape index: {}]   ;;  %s5514_s9 = inlined_call_operand.vmem [shape: f32[2,1,32], index: 9, kind: input, shape index: {}]   ;;  %s5515_s10 = inlined_call_operand.vmem [shape: f32[2,1,32], index: 10, kind: input, shape index: {}]   ;;  %s5516_s11 = inlined_call_operand.vmem [shape: f32[2,32,128], index: 11, kind: input, shape index: {}]   ;;  %s5517_s12 = inlined_call_operand.vmem [shape: f32[2,1,128], index: 12, kind: input, shape index: {}]   ;;  %s5518_s13 = inlined_call_operand.vmem [shape: f32[2,128,32], index: 13, kind: input, shape index: {}]   ;;  %s5519_s14 = inlined_call_operand.vmem [shape: f32[2,1,32], index: 14, kind: input, shape index: {}]   ;;  %s5520_s15 = inlined_call_operand.vmem [shape: f32[1,32], index: 15, kind: input, shape index: {}]   ;;  %s5521_s16 = inlined_call_operand.vmem [shape: f32[1,32], index: 16, kind: input, shape index: {}]   ;;  %s5522_s17 = inlined_call_operand.vmem [shape: f32[32,128], index: 17, kind: input, shape index: {}]   ;;  %s5523_s18 = inlined_call_operand.hbm [shape: f32[2,128], index: 18, kind: output, shape index: {}]  }
   0x1   :  { %5539 = sst [smem:[#allocation9_spill]] %s5505_s0 }
   0x2   :  { %5540 = sst [smem:[#allocation10_spill]] %s5506_s1 }
   0x3   :  { %5541 = sst [smem:[#allocation11_spill]] %s5507_s2 }
   0x4   :  { %23 = vsyncpa [#allocation5], 0 }
   0x5   :  { %24 = vsyncpa [#allocation4], 0  ;;  %s5542_s29 = sld [smem:[#allocation9_spill]] }
   0xb   :  { %s31_s30 = sshll.u32 %s5542_s29, 4  ;;  %s32_s30 = int_to_ptr.vmem [resolvable:$true] %s31_s30 }
   0xc   :  { %s4648_s0 = scalar_lea.vmem %s32_s30, 16  ;;  %p4653_p1 = scmp.lt.s32.totalorder %s32_s30, %s32_s30 }
   0xd   :  { %p4649_p0 = scmp.ne.s32.totalorder %s32_s30, %s4648_s0  ;;  %p4654_p2 = scmp.lt.s32.totalorder %s4648_s0, %s4648_s0 }
   0xf   :  { %p4655_p3 = por %p4654_p2, %p4653_p1 }
  0x11   :  { %p4656_p4 = pnand %p4655_p3, %p4649_p0 }
  0x13   :  { %4659 = shalt.err (!%p4656_p4)
}
  0x14   :  { %s4684_s19 = smov [#allocation3]  }
  0x15   :  { %34 = dma.vmem_to_smem %s32_s30, 16, %s4684_s19, [#allocation5]  }
  0x16   :  { %4680 = dma.done.wait [#allocation5], 16  }
  0x17   :  { %4681 = vsyncadd [#allocation5], 4294967280 }
  0x18   :  { %72 = sfence }
  0x19   :  { %s5543_s21 = sld [smem:[#allocation11_spill]]  ;;  %vm86_vm0 = vcmask 261120   ;;  %v133_v17 = vld [vmem:[%s5510_s5 + $0x18] sm:$0xff]  ;;  %v132_v18 = vld [vmem:[%s5510_s5 + $0x10] sm:$0xff]  ;;  %v131_v19 = vld [vmem:[%s5510_s5 + $0x8] sm:$0xff]  ;;  %v4685_v37 = vmov 0.0   ;;  %v79_v46 = vlaneseq }
  0x1a   :  { %s5544_s23 = sld [smem:[#allocation10_spill]]  ;;  %4225 = vmatprep.subr.mxu1 %v133_v17  ;;  %v130_v20 = vld [vmem:[%s5510_s5] sm:$0xff]  ;;  %4256 = vmatprep.subr.mxu0 %v4685_v37  ;;  %vm4686_vm1 = vmmov 0   ;;  %s4687_s25 = smov 96   ;;  %vm225_vm2 = vcmask 64512   ;;  %vm561_vm4 = vcmask 130112  }
  0x1b   :  { %4226 = vmatpush3.msra.mxu1 %v133_v17  ;;  %v3962_v28 = vld [vmem:[%s5508_s3] ss:$0 sm:$0xff]  ;;  %4258 = vmatprep.mubr.msk.f32.mxu0 %vm4686_vm1, %v4685_v37  ;;  %s4688_s26 = smov 88   ;;  %s5537_s27 = smov 80   ;;  %v4878_v47 = vshrl.u32 %v79_v46, 7  ;;  %v82_v48 = vand.u32 127, %v79_v46 }
  0x1c   :  { %4227 = vmatprep.subr.mxu1 %v132_v18  ;;  %v3963_v30 = vld [vmem:[%s5509_s4] ss:$0 sm:$0xff]  ;;  %s5529_s28 = smov 72   ;;  %s4691_s29 = smov 120   ;;  %vm734_vm5 = vcmask 195712   ;;  %vm907_vm6 = vcmask 261312  }
  0x1d   :  { %4228 = vmatpush3.msra.mxu1 %v132_v18  ;;  %v3964_v39 = vld [vmem:[%s5511_s6] ss:$0 sm:$0xff]  ;;  %s5533_s30 = smov 112   ;;  %s5531_s0 = smov 104   ;;  %vm4881_vm3 = vcmp.le.s32.totalorder %v82_v48, %v4878_v47  ;;  %vm3836_vm9 = vcmask 1040384   ;;  %vm3840_vm10 = vcmask 254976  }
  0x1e   :  { %4229 = vmatprep.subr.mxu1 %v131_v19  ;;  %s4694_s19 = smov 64   ;;  %s5535_s1 = smov 56  }
  0x1f   :  { %v73_v0 = vld [vmem:[%s5543_s21] sm:$0xff]  ;;  %4230 = vmatpush3.msra.mxu1 %v131_v19  ;;  %s5527_s20 = smov 40   ;;  %s5525_s21 = smov 48  }
  0x20   :  { %v74_v1 = vld [vmem:[%s5544_s23] sm:$0xff]  ;;  %v3961_v2 = vld [vmem:[%s5544_s23 + $0x8] sm:$0xff]  ;;  %4231 = vmatprep.subr.mxu1 %v130_v20  ;;  %s4698_s22 = smov 8   ;;  %s4699_s2 = smov 16  }
  0x21   :  { %v4809_v3 = vadd.f32 %v74_v1, %v73_v0  ;;  %v4811_v4 = vadd.f32 %v3961_v2, %v73_v0  ;;  %4232 = vmatpush3.msra.mxu1 %v130_v20  ;;  %s4700_s23 = smov 24   ;;  %s5550_s24 = smov 104  }
  0x22   :  { %4236 = vmatprep.subr.mxu1 %v4685_v37 }
  0x23   :  { %v87_v5 = vsel %vm86_vm0, %v4809_v3, 0.0  ;;  %v90_v6 = vsel %vm86_vm0, %v4811_v4, 0.0 }
  0x24   :  { %88 = vadd.xlane.f32.xlu0 %v87_v5 }
  0x28   :  { %91 = vadd.xlane.f32.xlu0 %v90_v6 }
  0xad   :  { %v89_v7 = vpop.xlane.xlu0 %88 }
  0xae   :  { %v94_v8 = vmul.f32 0.03125, %v89_v7 }
  0xb0   :  { %v96_v9 = vsub.f32 %v4809_v3, %v94_v8 }
  0xb1   :  { %v92_v10 = vpop.xlane.xlu0 %91 }
  0xb2   :  { %v95_v11 = vmul.f32 0.03125, %v92_v10  ;;  %v98_v12 = vmul.f32 %v96_v9, %v96_v9 }
  0xb4   :  { %v97_v13 = vsub.f32 %v4811_v4, %v95_v11  ;;  %v100_v14 = vsel %vm86_vm0, %v98_v12, 0.0 }
  0xb5   :  { %101 = vadd.xlane.f32.xlu1 %v100_v14 }
  0xb6   :  { %v99_v15 = vmul.f32 %v97_v13, %v97_v13 }
  0xb8   :  { %v103_v16 = vsel %vm86_vm0, %v99_v15, 0.0 }
  0xb9   :  { %104 = vadd.xlane.f32.xlu1 %v103_v16 }
 0x13e   :  { %v102_v21 = vpop.xlane.xlu1 %101 }
 0x13f   :  { %v106_v22 = vmul.f32 0.03125, %v102_v21 }
 0x141   :  { %v108_v23 = vadd.f32 1e-05, %v106_v22 }
 0x142   :  { %v105_v24 = vpop.xlane.xlu1 %104 }
 0x143   :  { %4550 = vrsqrt.f32 %v108_v23  ;;  %v107_v25 = vmul.f32 0.03125, %v105_v24 }
 0x145   :  { %v109_v26 = vadd.f32 1e-05, %v107_v25 }
 0x147   :  { %4552 = vrsqrt.f32 %v109_v26 }
 0x150   :  { %v4551_v27 = vpop.eup %4550 }
 0x151   :  { %v112_v29 = vmul.f32 %v4551_v27, %v96_v9 }
 0x153   :  { %v120_v31 = vmul.f32 %v3962_v28, %v112_v29 }
 0x154   :  { %v4553_v32 = vpop.eup %4552 }
 0x155   :  { %v113_v33 = vmul.f32 %v4553_v32, %v97_v13  ;;  %v128_v34 = vadd.f32 %v3963_v30, %v120_v31 }
 0x157   :  { %v121_v35 = vmul.f32 %v3962_v28, %v113_v33  ;;  %4233 = vmatprep.mubr.msk.f32.mxu1 %vm86_vm0, %v128_v34 }
 0x159   :  { %v129_v36 = vadd.f32 %v3963_v30, %v121_v35 }
 0x15b   :  { %4234 = vmatmul.mubr.msk.f32.vlgmr.msra.gmra.mxu1 %vm86_vm0, %v129_v36 }
 0x15c   :  { %4238 = vmatprep.mubr.msk.f32.mxu1 %vm4686_vm1, %v4685_v37 }
 0x21b   :  { %v4235_v38 = vpop.f32.mrf.mxu1 }
 0x21c   :  { %v4860_v42 = vadd.f32 %v4235_v38, %v3964_v39 }
 0x21d   :  { %v213_v40 = vpop.f32.mrf.mxu1 }
 0x21e   :  { %v4850_v41 = vadd.f32 %v3964_v39, %v213_v40 }
 0x220   :  { %223 = vrot.lane.b32.xlu0 %v4850_v41, %s4687_s25 }
 0x224   :  { %392 = vrot.lane.b32.xlu0 %v4850_v41, %s4688_s26 }
 0x228   :  { %565 = vrot.lane.b32.xlu0 %v4850_v41, %s5537_s27 }
 0x22c   :  { %738 = vrot.lane.b32.xlu0 %v4850_v41, %s5529_s28 }
 0x230   :  { %910 = vrot.lane.b32.xlu0 %v4860_v42, %s4687_s25 }
 0x234   :  { %1076 = vrot.lane.b32.xlu0 %v4860_v42, %s4691_s29 }
 0x238   :  { %1248 = vrot.lane.b32.xlu0 %v4860_v42, %s5533_s30 }
 0x23c   :  { %1420 = vrot.lane.b32.xlu0 %v4860_v42, %s5531_s0 }
 0x292   :  { %v224_v43 = vpop.permute.xlu0 %223 }
 0x293   :  { %4237 = vmatpush3.xpose.msk.msra.mxu1 %vm225_vm2, %v224_v43 }
 0x294   :  { %4241 = vmatprep.subr.mxu1 %v4685_v37 }
 0x296   :  { %4239 = vmatmul.mubr.msk.f32.vlgmr.msra.gmra.mxu1 %vm225_vm2, %v4850_v41  ;;  %v393_v44 = vpop.permute.xlu0 %392 }
 0x297   :  { %4243 = vmatprep.mubr.msk.f32.mxu1 %vm4686_vm1, %v4685_v37 }
 0x29a   :  { %v566_v45 = vpop.permute.xlu0 %565 }
 0x29b   :  { %4257 = vmatpush3.xpose.msk.msra.mxu0 %vm225_vm2, %v566_v45 }
 0x29c   :  { %4266 = vmatprep.subr.mxu0 %v4685_v37 }
 0x29e   :  { %v739_v62 = vpop.permute.xlu0 %738 }
 0x2a2   :  { %v911_v1 = vpop.permute.xlu0 %910 }
 0x2a6   :  { %v1077_v5 = vpop.permute.xlu0 %1076 }
 0x2aa   :  { %v1249_v10 = vpop.permute.xlu0 %1248 }
 0x2ae   :  { %v1421_v12 = vpop.permute.xlu0 %1420 }
 0x356   :  { %v296_v49 = vpop.f32.mrf.mxu1 }
 0x357   :  { %v300_v51 = vmul.f32 0.35355338, %v296_v49 }
 0x358   :  { %v4240_v52 = vpop.f32.mrf.mxu1 }
 0x359   :  { %v301_v53 = vsel %vm4881_vm3, %v300_v51, -1e+30 }
 0x35a   :  { %v302_v54 = vsel %vm225_vm2, %v301_v53, -inf }
 0x35b   :  { %303 = vmax.xlane.f32.xlu1 %v302_v54 }
 0x36c   :  { %313 = vrot.lane.b32.xlu1 %v4850_v41, %s4694_s19 }
 0x370   :  { %390 = vrot.lane.b32.xlu1 %v4850_v41, %s4691_s29 }
 0x3e4   :  { %v304_v55 = vpop.xlane.xlu1 %303 }
 0x3e5   :  { %v305_v56 = vsub.f32 %v301_v53, %v304_v55 }
 0x3e7   :  { %v306_v57 = vmul.f32 1.442695, %v305_v56 }
 0x3e8   :  { %v314_v58 = vpop.permute.xlu1 %313 }
 0x3e9   :  { %4554 = vpow2.f32 %v306_v57  ;;  %4242 = vmatpush3.msra.mxu1 %v314_v58 }
 0x3ea   :  { %4246 = vmatprep.subr.mxu1 %v4685_v37 }
 0x3ec   :  { %v391_v61 = vpop.permute.xlu1 %390 }
 0x3f6   :  { %v4555_v59 = vpop.eup %4554 }
 0x3f7   :  { %v308_v60 = vsel %vm225_vm2, %v4555_v59, 0.0 }
 0x3f8   :  { %309 = vadd.xlane.f32.xlu1 %v308_v60 }
 0x409   :  { %563 = vrot.lane.b32.xlu1 %v4850_v41, %s5533_s30 }
 0x40d   :  { %736 = vrot.lane.b32.xlu1 %v4850_v41, %s5531_s0 }
 0x411   :  { %1078 = vrot.lane.b32.xlu1 %v4860_v42, %s4688_s26 }
 0x415   :  { %1250 = vrot.lane.b32.xlu1 %v4860_v42, %s5537_s27  ;;  %s5551_s27 = smov 72  }
 0x419   :  { %1422 = vrot.lane.b32.xlu1 %v4860_v42, %s5529_s28 }
 0x481   :  { %v310_v63 = vpop.xlane.xlu1 %309 }
 0x482   :  { %4556 = vrcp.f32 %v310_v63 }
 0x485   :  { %v564_v0 = vpop.permute.xlu1 %563 }
 0x486   :  { %4259 = vmatmul.mubr.msk.f32.vlgmr.msra.gmra.mxu0 %vm225_vm2, %v564_v0 }
 0x487   :  { %4267 = vmatpush3.xpose.msk.msra.mxu0 %vm225_vm2, %v739_v62  ;;  %4268 = vmatprep.mubr.msk.f32.mxu0 %vm4686_vm1, %v4685_v37 }
 0x488   :  { %4276 = vmatprep.subr.mxu0 %v4685_v37 }
 0x489   :  { %v737_v2 = vpop.permute.xlu1 %736 }
 0x48a   :  { %4269 = vmatmul.mubr.msk.f32.vlgmr.msra.gmra.mxu0 %vm225_vm2, %v737_v2 }
 0x48b   :  { %4277 = vmatpush3.xpose.msk.msra.mxu0 %vm225_vm2, %v911_v1  ;;  %4278 = vmatprep.mubr.msk.f32.mxu0 %vm4686_vm1, %v4685_v37 }
 0x48c   :  { %4286 = vmatprep.subr.mxu0 %v4685_v37 }
 0x48d   :  { %v1079_v6 = vpop.permute.xlu1 %1078 }
 0x48e   :  { %4279 = vmatmul.mubr.msk.f32.vlgmr.msra.gmra.mxu0 %vm225_vm2, %v4860_v42 }
 0x48f   :  { %v4557_v7 = vpop.eup %4556  ;;  %4287 = vmatpush3.xpose.msk.msra.mxu0 %vm225_vm2, %v1079_v6  ;;  %4288 = vmatprep.mubr.msk.f32.mxu0 %vm4686_vm1, %v4685_v37 }
 0x490   :  { %4296 = vmatprep.subr.mxu0 %v4685_v37  ;;  %v312_v8 = vmul.f32 %v4557_v7, %v4555_v59 }
 0x491   :  { %v1251_v9 = vpop.permute.xlu1 %1250 }
 0x492   :  { %4244 = vmatmul.mubr.msk.f32.vlgmr.msra.gmra.mxu1 %vm225_vm2, %v312_v8  ;;  %4289 = vmatmul.mubr.msk.f32.vlgmr.msra.gmra.mxu0 %vm225_vm2, %v1077_v5 }
 0x493   :  { %4247 = vmatpush3.xpose.msk.msra.mxu1 %vm225_vm2, %v393_v44  ;;  %4297 = vmatpush3.xpose.msk.msra.mxu0 %vm225_vm2, %v1251_v9 }
 0x494   :  { %4248 = vmatprep.mubr.msk.f32.mxu1 %vm4686_vm1, %v4685_v37  ;;  %4298 = vmatprep.mubr.msk.f32.mxu0 %vm4686_vm1, %v4685_v37 }
 0x495   :  { %v1423_v11 = vpop.permute.xlu1 %1422  ;;  %4306 = vmatprep.subr.mxu0 %v4685_v37  ;;  %4251 = vmatprep.subr.mxu1 %v4685_v37 }
 0x496   :  { %4249 = vmatmul.mubr.msk.f32.vlgmr.msra.gmra.mxu1 %vm225_vm2, %v391_v61  ;;  %4299 = vmatmul.mubr.msk.f32.vlgmr.msra.gmra.mxu0 %vm225_vm2, %v1249_v10 }
 0x497   :  { %4307 = vmatpush3.xpose.msk.msra.mxu0 %vm225_vm2, %v1423_v11  ;;  %4308 = vmatprep.mubr.msk.f32.mxu0 %vm4686_vm1, %v4685_v37 }
 0x498   :  { %4253 = vmatprep.mubr.msk.f32.mxu1 %vm4686_vm1, %v4685_v37 }
 0x49a   :  { %4309 = vmatmul.mubr.msk.f32.vlgmr.msra.gmra.mxu0 %vm225_vm2, %v1421_v12 }
 0x546   :  { %v637_v13 = vpop.f32.mrf.mxu0 }
 0x547   :  { %v641_v14 = vmul.f32 0.35355338, %v637_v13 }
 0x548   :  { %v4260_v15 = vpop.f32.mrf.mxu0 }
 0x549   :  { %v642_v16 = vsel %vm4881_vm3, %v641_v14, -1e+30 }
 0x54a   :  { %v810_v17 = vpop.f32.mrf.mxu0  ;;  %v643_v18 = vsel %vm225_vm2, %v642_v16, -inf }
 0x54b   :  { %v814_v19 = vmul.f32 0.35355338, %v810_v17  ;;  %644 = vmax.xlane.f32.xlu0 %v643_v18 }
 0x54c   :  { %v4270_v20 = vpop.f32.mrf.mxu0 }
 0x54d   :  { %v815_v21 = vsel %vm4881_vm3, %v814_v19, -1e+30 }
 0x54e   :  { %v982_v22 = vpop.f32.mrf.mxu0  ;;  %v816_v23 = vsel %vm225_vm2, %v815_v21, -inf }
 0x54f   :  { %v986_v24 = vmul.f32 0.35355338, %v982_v22  ;;  %817 = vmax.xlane.f32.xlu0 %v816_v23 }
 0x550   :  { %v4280_v25 = vpop.f32.mrf.mxu0 }
 0x551   :  { %v987_v26 = vsel %vm4881_vm3, %v986_v24, -1e+30 }
 0x552   :  { %v385_v27 = vpop.f32.mrf.mxu1  ;;  %v1150_v28 = vpop.f32.mrf.mxu0  ;;  %v988_v29 = vsel %vm225_vm2, %v987_v26, -inf }
 0x553   :  { %389 = vst.msk [vmem:[#allocation2] sm:$0xff] %vm225_vm2, %v385_v27  ;;  %989 = vmax.xlane.f32.xlu0 %v988_v29  ;;  %v1154_v34 = vmul.f32 0.35355338, %v1150_v28 }
 0x554   :  { %v4245_v30 = vpop.f32.mrf.mxu1  ;;  %v4290_v31 = vpop.f32.mrf.mxu0 }
 0x555   :  { %v1155_v49 = vsel %vm4881_vm3, %v1154_v34, -1e+30 }
 0x556   :  { %v464_v32 = vpop.f32.mrf.mxu1  ;;  %v1322_v33 = vpop.f32.mrf.mxu0  ;;  %v1156_v52 = vsel %vm225_vm2, %v1155_v49, -inf }
 0x557   :  { %v468_v35 = vmul.f32 0.35355338, %v464_v32  ;;  %v1326_v36 = vmul.f32 0.35355338, %v1322_v33 }
 0x558   :  { %v4250_v38 = vpop.f32.mrf.mxu1  ;;  %v4300_v39 = vpop.f32.mrf.mxu0 }
 0x559   :  { %v469_v40 = vsel %vm4881_vm3, %v468_v35, -1e+30  ;;  %v1327_v43 = vsel %vm4881_vm3, %v1326_v36, -1e+30 }
 0x55a   :  { %v1494_v44 = vpop.f32.mrf.mxu0  ;;  %v470_v45 = vsel %vm225_vm2, %v469_v40, -inf  ;;  %v1328_v46 = vsel %vm225_vm2, %v1327_v43, -inf }
 0x55b   :  { %v1498_v48 = vmul.f32 0.35355338, %v1494_v44  ;;  %471 = vmax.xlane.f32.xlu1 %v470_v45  ;;  %1329 = vmax.xlane.f32.xlu0 %v1328_v46 }
 0x55c   :  { %v4310_v51 = vpop.f32.mrf.mxu0 }
 0x55d   :  { %v1499_v53 = vsel %vm4881_vm3, %v1498_v48, -1e+30 }
 0x55e   :  { %v1500_v54 = vsel %vm225_vm2, %v1499_v53, -inf }
 0x55f   :  { %1157 = vmax.xlane.f32.xlu1 %v1156_v52 }
 0x563   :  { %1501 = vmax.xlane.f32.xlu1 %v1500_v54 }
 0x5d4   :  { %v645_v55 = vpop.xlane.xlu0 %644 }
 0x5d5   :  { %v646_v56 = vsub.f32 %v642_v16, %v645_v55 }
 0x5d7   :  { %v647_v57 = vmul.f32 1.442695, %v646_v56 }
 0x5d8   :  { %v818_v58 = vpop.xlane.xlu0 %817 }
 0x5d9   :  { %4558 = vpow2.f32 %v647_v57  ;;  %v819_v59 = vsub.f32 %v815_v21, %v818_v58 }
 0x5db   :  { %v820_v60 = vmul.f32 1.442695, %v819_v59 }
 0x5dc   :  { %v990_v61 = vpop.xlane.xlu0 %989 }
 0x5dd   :  { %4560 = vpow2.f32 %v820_v60  ;;  %v991_v62 = vsub.f32 %v987_v26, %v990_v61 }
 0x5df   :  { %v992_v63 = vmul.f32 1.442695, %v991_v62 }
 0x5e1   :  { %4562 = vpow2.f32 %v992_v63 }
 0x5e4   :  { %v472_v0 = vpop.xlane.xlu1 %471  ;;  %v1330_v1 = vpop.xlane.xlu0 %1329 }
 0x5e5   :  { %v1331_v2 = vsub.f32 %v1327_v43, %v1330_v1  ;;  %v473_v11 = vsub.f32 %v469_v40, %v472_v0 }
 0x5e6   :  { %v4960_v5 = vpop.eup %4558 }
 0x5e7   :  { %v1332_v6 = vmul.f32 1.442695, %v1331_v2  ;;  %v649_v7 = vsel %vm225_vm2, %v4960_v5, 0.0  ;;  %v474_v17 = vmul.f32 1.442695, %v473_v11  ;;  %v1597_v2 = vld [vmem:[%s5512_s7 + $0x18] sm:$0xff] }
 0x5e8   :  { %v1158_v8 = vpop.xlane.xlu1 %1157  ;;  %650 = vadd.xlane.f32.xlu1 %v649_v7  ;;  %4316 = vmatprep.subr.mxu0 %v1597_v2  ;;  %v1595_v7 = vld [vmem:[%s5512_s7 + $0x8] sm:$0xff] }
 0x5e9   :  { %v1159_v9 = vsub.f32 %v1155_v49, %v1158_v8  ;;  %4564 = vpow2.f32 %v1332_v6  ;;  %4317 = vmatpush3.msra.mxu0 %v1597_v2  ;;  %v1854_v2 = vld [vmem:[%s5518_s13 + $0x60] sm:$0xff] }
 0x5ea   :  { %v4964_v10 = vpop.eup %4560 }
 0x5eb   :  { %v1160_v12 = vmul.f32 1.442695, %v1159_v9  ;;  %v822_v13 = vsel %vm225_vm2, %v4964_v10, 0.0  ;;  %v1594_v9 = vld [vmem:[%s5512_s7] sm:$0xff] }
 0x5ec   :  { %v1502_v14 = vpop.xlane.xlu1 %1501  ;;  %823 = vadd.xlane.f32.xlu0 %v822_v13 }
 0x5ed   :  { %4566 = vpow2.f32 %v1160_v12  ;;  %v1503_v15 = vsub.f32 %v1499_v53, %v1502_v14 }
 0x5ee   :  { %v4968_v16 = vpop.eup %4562 }
 0x5ef   :  { %v1504_v18 = vmul.f32 1.442695, %v1503_v15  ;;  %v994_v19 = vsel %vm225_vm2, %v4968_v16, 0.0 }
 0x5f0   :  { %995 = vadd.xlane.f32.xlu1 %v994_v19 }
 0x5f1   :  { %4568 = vpow2.f32 %v1504_v18 }
 0x5f2   :  { %4570 = vpow2.f32 %v474_v17 }
 0x5f6   :  { %v4972_v20 = vpop.eup %4564 }
 0x5f7   :  { %v1334_v21 = vsel %vm225_vm2, %v4972_v20, 0.0 }
 0x5f8   :  { %1335 = vadd.xlane.f32.xlu1 %v1334_v21 }
 0x5fa   :  { %v4976_v22 = vpop.eup %4566 }
 0x5fb   :  { %v1162_v23 = vsel %vm225_vm2, %v4976_v22, 0.0 }
 0x5fc   :  { %1163 = vadd.xlane.f32.xlu0 %v1162_v23 }
 0x5fe   :  { %v4980_v24 = vpop.eup %4568 }
 0x5ff   :  { %v1506_v25 = vsel %vm225_vm2, %v4980_v24, 0.0  ;;  %v4571_v26 = vpop.eup %4570 }
 0x600   :  { %1507 = vadd.xlane.f32.xlu0 %v1506_v25  ;;  %v476_v27 = vsel %vm225_vm2, %v4571_v26, 0.0 }
 0x604   :  { %477 = vadd.xlane.f32.xlu0 %v476_v27 }
 0x609   :  { %481 = vrot.lane.b32.xlu1 %v4850_v41, %s5535_s1 }
 0x60d   :  { %827 = vrot.lane.b32.xlu1 %v4850_v41, %s5527_s20 }
 0x611   :  { %999 = vrot.lane.b32.xlu1 %v4860_v42, %s4694_s19 }
 0x615   :  { %1167 = vrot.lane.b32.xlu1 %v4860_v42, %s5535_s1 }
 0x619   :  { %1511 = vrot.lane.b32.xlu1 %v4860_v42, %s5527_s20 }
 0x61a   :  { %654 = vrot.lane.b32.xlu0 %v4850_v41, %s5525_s21 }
 0x61e   :  { %1339 = vrot.lane.b32.xlu0 %v4860_v42, %s5525_s21  ;;  %s5549_s21 = smov 112  }
 0x671   :  { %v651_v28 = vpop.xlane.xlu1 %650 }
 0x675   :  { %v824_v30 = vpop.xlane.xlu0 %823 }
 0x679   :  { %v996_v29 = vpop.xlane.xlu1 %995 }
 0x681   :  { %v1336_v31 = vpop.xlane.xlu1 %1335 }
 0x685   :  { %v1164_v32 = vpop.xlane.xlu0 %1163  ;;  %v482_v33 = vpop.permute.xlu1 %481 }
 0x686   :  { %4252 = vmatpush3.msra.mxu1 %v482_v33 }
 0x687   :  { %4261 = vmatprep.subr.mxu1 %v4685_v37 }
 0x689   :  { %v1508_v34 = vpop.xlane.xlu0 %1507  ;;  %v828_v42 = vpop.permute.xlu1 %827 }
 0x68d   :  { %v478_v35 = vpop.xlane.xlu0 %477  ;;  %v1000_v44 = vpop.permute.xlu1 %999 }
 0x68e   :  { %4572 = vrcp.f32 %v478_v35 }
 0x68f   :  { %4574 = vrcp.f32 %v651_v28 }
 0x690   :  { %4576 = vrcp.f32 %v824_v30 }
 0x691   :  { %4578 = vrcp.f32 %v996_v29  ;;  %v655_v39 = vpop.permute.xlu0 %654  ;;  %v1168_v51 = vpop.permute.xlu1 %1167 }
 0x692   :  { %4580 = vrcp.f32 %v1164_v32 }
 0x693   :  { %4582 = vrcp.f32 %v1336_v31 }
 0x694   :  { %4584 = vrcp.f32 %v1508_v34 }
 0x695   :  { %v1340_v54 = vpop.permute.xlu0 %1339  ;;  %v1512_v57 = vpop.permute.xlu1 %1511 }
 0x69b   :  { %v4573_v36 = vpop.eup %4572 }
 0x69c   :  { %v480_v41 = vmul.f32 %v4573_v36, %v4571_v26  ;;  %v4575_v38 = vpop.eup %4574 }
 0x69d   :  { %v653_v40 = vmul.f32 %v4575_v38, %v4960_v5  ;;  %v4577_v43 = vpop.eup %4576  ;;  %v1596_v5 = vld [vmem:[%s5512_s7 + $0x10] sm:$0xff] }
 0x69e   :  { %4254 = vmatmul.mubr.msk.f32.vlgmr.msra.gmra.mxu1 %vm225_vm2, %v480_v41  ;;  %v826_v45 = vmul.f32 %v4577_v43, %v4964_v10  ;;  %v4579_v46 = vpop.eup %4578  ;;  %4318 = vmatprep.subr.mxu0 %v1596_v5  ;;  %v1735_v43 = vld [vmem:[%s5516_s11 + $0x8] sm:$0xff] }
 0x69f   :  { %4262 = vmatpush3.msra.mxu1 %v655_v39  ;;  %4263 = vmatprep.mubr.msk.f32.mxu1 %vm4686_vm1, %v4685_v37  ;;  %v998_v48 = vmul.f32 %v4579_v46, %v4968_v16  ;;  %v4581_v49 = vpop.eup %4580  ;;  %v1737_v39 = vld [vmem:[%s5516_s11 + $0x18] sm:$0xff] }
 0x6a0   :  { %4271 = vmatprep.subr.mxu1 %v4685_v37  ;;  %v1166_v52 = vmul.f32 %v4581_v49, %v4976_v22  ;;  %v4583_v53 = vpop.eup %4582  ;;  %4319 = vmatpush3.msra.mxu0 %v1596_v5  ;;  %v1853_v5 = vld [vmem:[%s5518_s13 + $0x58] sm:$0xff] }
 0x6a1   :  { %v1338_v55 = vmul.f32 %v4583_v53, %v4972_v20  ;;  %v4585_v56 = vpop.eup %4584  ;;  %4320 = vmatprep.subr.mxu0 %v1595_v7 }
 0x6a2   :  { %4264 = vmatmul.mubr.msk.f32.vlgmr.msra.gmra.mxu1 %vm225_vm2, %v653_v40  ;;  %v1510_v58 = vmul.f32 %v4585_v56, %v4980_v24  ;;  %4321 = vmatpush3.msra.mxu0 %v1595_v7  ;;  %v3993_v24 = vld [vmem:[%s5513_s8] ss:$0 sm:$0xff]  ;;  %v1736_v40 = vld [vmem:[%s5516_s11 + $0x10] sm:$0xff]  ;;  %v1851_v7 = vld [vmem:[%s5518_s13 + $0x48] sm:$0xff] }
 0x6a3   :  { %4272 = vmatpush3.msra.mxu1 %v828_v42  ;;  %4273 = vmatprep.mubr.msk.f32.mxu1 %vm4686_vm1, %v4685_v37  ;;  %v3995_v56 = vld [vmem:[%s5515_s10] ss:$0 sm:$0xff] }
 0x6a4   :  { %4281 = vmatprep.subr.mxu1 %v4685_v37  ;;  %4322 = vmatprep.subr.mxu0 %v1594_v9 }
 0x6a5   :  { %4323 = vmatpush3.msra.mxu0 %v1594_v9  ;;  %v1849_v9 = vld [vmem:[%s5518_s13 + $0x38] sm:$0xff] }
 0x6a6   :  { %4274 = vmatmul.mubr.msk.f32.vlgmr.msra.gmra.mxu1 %vm225_vm2, %v826_v45 }
 0x6a7   :  { %4282 = vmatpush3.msra.mxu1 %v1000_v44  ;;  %4283 = vmatprep.mubr.msk.f32.mxu1 %vm4686_vm1, %v4685_v37  ;;  %v1734_v44 = vld [vmem:[%s5516_s11] sm:$0xff] }
 0x6a8   :  { %4291 = vmatprep.subr.mxu1 %v4685_v37 }
 0x6aa   :  { %4284 = vmatmul.mubr.msk.f32.vlgmr.msra.gmra.mxu1 %vm225_vm2, %v998_v48 }
 0x6ab   :  { %4292 = vmatpush3.msra.mxu1 %v1168_v51  ;;  %4293 = vmatprep.mubr.msk.f32.mxu1 %vm4686_vm1, %v4685_v37 }
 0x6ac   :  { %4301 = vmatprep.subr.mxu1 %v4685_v37 }
 0x6ae   :  { %4294 = vmatmul.mubr.msk.f32.vlgmr.msra.gmra.mxu1 %vm225_vm2, %v1166_v52 }
 0x6af   :  { %4302 = vmatpush3.msra.mxu1 %v1340_v54  ;;  %4303 = vmatprep.mubr.msk.f32.mxu1 %vm4686_vm1, %v4685_v37  ;;  %v3994_v54 = vld [vmem:[%s5514_s9] ss:$0 sm:$0xff] }
 0x6b0   :  { %4311 = vmatprep.subr.mxu1 %v4685_v37 }
 0x6b2   :  { %4304 = vmatmul.mubr.msk.f32.vlgmr.msra.gmra.mxu1 %vm225_vm2, %v1338_v55 }
 0x6b3   :  { %4312 = vmatpush3.msra.mxu1 %v1512_v57  ;;  %4313 = vmatprep.mubr.msk.f32.mxu1 %vm4686_vm1, %v4685_v37 }
 0x6b4   :  { %4327 = vmatprep.subr.mxu1 %v1737_v39 }
 0x6b6   :  { %4314 = vmatmul.mubr.msk.f32.vlgmr.msra.gmra.mxu1 %vm225_vm2, %v1510_v58 }
 0x6b7   :  { %4328 = vmatpush3.msra.mxu1 %v1737_v39 }
 0x6b8   :  { %4329 = vmatprep.subr.mxu1 %v1736_v40 }
 0x6b9   :  { %4330 = vmatpush3.msra.mxu1 %v1736_v40 }
 0x6ba   :  { %4331 = vmatprep.subr.mxu1 %v1735_v43 }
 0x6bb   :  { %4332 = vmatpush3.msra.mxu1 %v1735_v43 }
 0x6bc   :  { %4333 = vmatprep.subr.mxu1 %v1734_v44 }
 0x6bd   :  { %4334 = vmatpush3.msra.mxu1 %v1734_v44 }
 0x75e   :  { %v553_v59 = vpop.f32.mrf.mxu1 }
 0x75f   :  { %558 = vrot.lane.b32.xlu0 %v553_v59, %s4698_s22 }
 0x760   :  { %v4255_v60 = vpop.f32.mrf.mxu1 }
 0x762   :  { %v726_v61 = vpop.f32.mrf.mxu1 }
 0x763   :  { %731 = vrot.lane.b32.xlu1 %v726_v61, %s4699_s2 }
 0x764   :  { %v4265_v62 = vpop.f32.mrf.mxu1 }
 0x766   :  { %v899_v63 = vpop.f32.mrf.mxu1 }
 0x767   :  { %904 = vrot.lane.b32.xlu1 %v899_v63, %s4700_s23  ;;  %v1857_v63 = vld [vmem:[%s5518_s13 + $0x78] sm:$0xff] }
 0x768   :  { %v4275_v0 = vpop.f32.mrf.mxu1  ;;  %4338 = vmatprep.subr.mxu0 %v1857_v63 }
 0x769   :  { %v1856_v0 = vld [vmem:[%s5518_s13 + $0x70] sm:$0xff] }
 0x76a   :  { %v1071_v1 = vpop.f32.mrf.mxu1 }
 0x76b   :  { %1075 = vst.msk [vmem:[#allocation2 + $0x8] sm:$0xff] %vm225_vm2, %v1071_v1  ;;  %v1855_v1 = vld [vmem:[%s5518_s13 + $0x68] sm:$0xff] }
 0x76c   :  { %v4285_v6 = vpop.f32.mrf.mxu1 }
 0x76d   :  { %v1852_v6 = vld [vmem:[%s5518_s13 + $0x50] sm:$0xff] }
 0x76e   :  { %v1239_v8 = vpop.f32.mrf.mxu1 }
 0x76f   :  { %1244 = vrot.lane.b32.xlu0 %v1239_v8, %s4698_s22  ;;  %v1850_v8 = vld [vmem:[%s5518_s13 + $0x40] sm:$0xff] }
 0x770   :  { %v4295_v10 = vpop.f32.mrf.mxu1 }
 0x771   :  { %v1848_v10 = vld [vmem:[%s5518_s13 + $0x30] sm:$0xff] }
 0x772   :  { %v1411_v11 = vpop.f32.mrf.mxu1 }
 0x773   :  { %1416 = vrot.lane.b32.xlu0 %v1411_v11, %s4699_s2  ;;  %v1847_v11 = vld [vmem:[%s5518_s13 + $0x28] sm:$0xff] }
 0x774   :  { %v4305_v12 = vpop.f32.mrf.mxu1 }
 0x775   :  { %v1846_v12 = vld [vmem:[%s5518_s13 + $0x20] sm:$0xff] }
 0x776   :  { %v1583_v13 = vpop.f32.mrf.mxu1 }
 0x777   :  { %1588 = vrot.lane.b32.xlu1 %v1583_v13, %s4700_s23  ;;  %v1845_v13 = vld [vmem:[%s5518_s13 + $0x18] sm:$0xff] }
 0x778   :  { %v4315_v14 = vpop.f32.mrf.mxu1 }
 0x779   :  { %v1844_v14 = vld [vmem:[%s5518_s13 + $0x10] sm:$0xff] }
 0x7d1   :  { %v559_v15 = vpop.permute.xlu0 %558 }
 0x7d2   :  { %562 = vst.msk [vmem:[#allocation2] sm:$0xff] %vm561_vm4, %v559_v15  ;;  %v1843_v15 = vld [vmem:[%s5518_s13 + $0x8] sm:$0xff] }
 0x7d5   :  { %v732_v16 = vpop.permute.xlu1 %731 }
 0x7d6   :  { %735 = vst.msk [vmem:[#allocation2] sm:$0xff] %vm734_vm5, %v732_v16  ;;  %v1842_v16 = vld [vmem:[%s5518_s13] sm:$0xff] }
 0x7d9   :  { %v905_v17 = vpop.permute.xlu1 %904 }
 0x7da   :  { %908 = vst.msk [vmem:[#allocation2] sm:$0xff] %vm907_vm6, %v905_v17  ;;  %v3996_v17 = vld [vmem:[%s5517_s12] ss:$0 sm:$0xff] }
 0x7e1   :  { %v1245_v18 = vpop.permute.xlu0 %1244  ;;  %v1592_v19 = vld [vmem:[#allocation2] sm:$0xff] }
 0x7e2   :  { %1247 = vst.msk [vmem:[#allocation2 + $0x8] sm:$0xff] %vm561_vm4, %v1245_v18  ;;  %4324 = vmatprep.mubr.msk.f32.mxu0 %vm86_vm0, %v1592_v19 }
 0x7e5   :  { %v1417_v20 = vpop.permute.xlu0 %1416 }
 0x7e6   :  { %1419 = vst.msk [vmem:[#allocation2 + $0x8] sm:$0xff] %vm734_vm5, %v1417_v20 }
 0x7e9   :  { %v1589_v21 = vpop.permute.xlu1 %1588 }
 0x7ea   :  { %1591 = vst.msk [vmem:[#allocation2 + $0x8] sm:$0xff] %vm907_vm6, %v1589_v21 }
 0x7f1   :  { %v1593_v22 = vld [vmem:[#allocation2 + $0x8] sm:$0xff] }
 0x7f2   :  { %4325 = vmatmul.mubr.msk.f32.vlgmr.msra.gmra.mxu0 %vm86_vm0, %v1593_v22 }
 0x7f3   :  { %4339 = vmatpush3.msra.mxu0 %v1857_v63 }
 0x7f4   :  { %4340 = vmatprep.subr.mxu0 %v1856_v0 }
 0x7f5   :  { %4341 = vmatpush3.msra.mxu0 %v1856_v0 }
 0x7f6   :  { %4342 = vmatprep.subr.mxu0 %v1855_v1 }
 0x7f7   :  { %4343 = vmatpush3.msra.mxu0 %v1855_v1  ;;  %v4004_v1 = vld [vmem:[%s5508_s3 + $0x1] ss:$0 sm:$0xff] }
 0x7f8   :  { %4344 = vmatprep.subr.mxu0 %v1854_v2 }
 0x7f9   :  { %4345 = vmatpush3.msra.mxu0 %v1854_v2 }
 0x7fa   :  { %4346 = vmatprep.subr.mxu0 %v1853_v5 }
 0x7fb   :  { %4347 = vmatpush3.msra.mxu0 %v1853_v5 }
 0x7fc   :  { %4348 = vmatprep.subr.mxu0 %v1852_v6 }
 0x7fd   :  { %4349 = vmatpush3.msra.mxu0 %v1852_v6 }
 0x7fe   :  { %4350 = vmatprep.subr.mxu0 %v1851_v7 }
 0x7ff   :  { %4351 = vmatpush3.msra.mxu0 %v1851_v7 }
 0x800   :  { %4352 = vmatprep.subr.mxu0 %v1850_v8 }
 0x801   :  { %4353 = vmatpush3.msra.mxu0 %v1850_v8  ;;  %v4005_v8 = vld [vmem:[%s5509_s4 + $0x1] ss:$0 sm:$0xff]  ;;  %s5547_s4 = smov 80  }
 0x802   :  { %4354 = vmatprep.subr.mxu0 %v1849_v9 }
 0x803   :  { %4355 = vmatpush3.msra.mxu0 %v1849_v9 }
 0x804   :  { %4356 = vmatprep.subr.mxu0 %v1848_v10 }
 0x805   :  { %4357 = vmatpush3.msra.mxu0 %v1848_v10 }
 0x806   :  { %4358 = vmatprep.subr.mxu0 %v1847_v11 }
 0x807   :  { %4359 = vmatpush3.msra.mxu0 %v1847_v11 }
 0x808   :  { %4360 = vmatprep.subr.mxu0 %v1846_v12 }
 0x809   :  { %4361 = vmatpush3.msra.mxu0 %v1846_v12  ;;  %v4011_v12 = vld [vmem:[%s5511_s6 + $0x1] ss:$0 sm:$0xff]  ;;  %s5548_s6 = smov 56  }
 0x80a   :  { %4362 = vmatprep.subr.mxu0 %v1845_v13 }
 0x80b   :  { %4363 = vmatpush3.msra.mxu0 %v1845_v13 }
 0x80c   :  { %4364 = vmatprep.subr.mxu0 %v1844_v14 }
 0x80d   :  { %4365 = vmatpush3.msra.mxu0 %v1844_v14 }
 0x80e   :  { %4366 = vmatprep.subr.mxu0 %v1843_v15 }
 0x80f   :  { %4367 = vmatpush3.msra.mxu0 %v1843_v15 }
 0x810   :  { %4368 = vmatprep.subr.mxu0 %v1842_v16 }
 0x811   :  { %4369 = vmatpush3.msra.mxu0 %v1842_v16 }
 0x812   :  { %4414 = vmatprep.subr.mxu0 %v4685_v37 }
 0x8b2   :  { %v4326_v23 = vpop.f32.mrf.mxu0 }
 0x8b3   :  { %v1680_v25 = vadd.f32 %v4326_v23, %v4811_v4 }
 0x8b4   :  { %v1670_v26 = vpop.f32.mrf.mxu0 }
 0x8b5   :  { %v5061_v27 = vadd.f32 %v3993_v24, %v1680_v25  ;;  %v1679_v28 = vadd.f32 %v1670_v26, %v4809_v3 }
 0x8b7   :  { %v5064_v29 = vadd.f32 %v3993_v24, %v1679_v28  ;;  %v1695_v30 = vsel %vm86_vm0, %v5061_v27, 0.0 }
 0x8b8   :  { %1696 = vadd.xlane.f32.xlu1 %v1695_v30 }
 0x8b9   :  { %v1692_v31 = vsel %vm86_vm0, %v5064_v29, 0.0 }
 0x8ba   :  { %1693 = vadd.xlane.f32.xlu0 %v1692_v31 }
 0x941   :  { %v1697_v32 = vpop.xlane.xlu1 %1696 }
 0x942   :  { %v1699_v33 = vmul.f32 0.03125, %v1697_v32 }
 0x943   :  { %v1694_v34 = vpop.xlane.xlu0 %1693 }
 0x944   :  { %v1698_v35 = vmul.f32 0.03125, %v1694_v34  ;;  %v1701_v4 = vsub.f32 %v5061_v27, %v1699_v33 }
 0x946   :  { %v1700_v36 = vsub.f32 %v5064_v29, %v1698_v35  ;;  %v1703_v38 = vmul.f32 %v1701_v4, %v1701_v4 }
 0x948   :  { %v1702_v41 = vmul.f32 %v1700_v36, %v1700_v36  ;;  %v1707_v42 = vsel %vm86_vm0, %v1703_v38, 0.0 }
 0x94a   :  { %v1704_v3 = vsel %vm86_vm0, %v1702_v41, 0.0 }
 0x94b   :  { %1705 = vadd.xlane.f32.xlu0 %v1704_v3 }
 0x94f   :  { %1708 = vadd.xlane.f32.xlu0 %v1707_v42 }
 0x9d4   :  { %v1706_v45 = vpop.xlane.xlu0 %1705 }
 0x9d5   :  { %v1710_v46 = vmul.f32 0.03125, %v1706_v45 }
 0x9d7   :  { %v1712_v48 = vadd.f32 1e-05, %v1710_v46 }
 0x9d8   :  { %v1709_v49 = vpop.xlane.xlu0 %1708 }
 0x9d9   :  { %4586 = vrsqrt.f32 %v1712_v48  ;;  %v1711_v51 = vmul.f32 0.03125, %v1709_v49 }
 0x9db   :  { %v1713_v52 = vadd.f32 1e-05, %v1711_v51 }
 0x9dd   :  { %4588 = vrsqrt.f32 %v1713_v52 }
 0x9e6   :  { %v4587_v53 = vpop.eup %4586 }
 0x9e7   :  { %v1716_v55 = vmul.f32 %v4587_v53, %v1700_v36  ;;  %v4001_v36 = vld [vmem:[%s5519_s14] ss:$0 sm:$0xff] }
 0x9e9   :  { %v1724_v57 = vmul.f32 %v3994_v54, %v1716_v55  ;;  %v4008_v55 = vld [vmem:[%s5510_s5 + $0x30] sm:$0xff] }
 0x9ea   :  { %v4589_v58 = vpop.eup %4588 }
 0x9eb   :  { %v1717_v59 = vmul.f32 %v4589_v58, %v1701_v4  ;;  %v1732_v60 = vadd.f32 %v3995_v56, %v1724_v57  ;;  %v4006_v57 = vld [vmem:[%s5510_s5 + $0x20] sm:$0xff] }
 0x9ed   :  { %v1725_v61 = vmul.f32 %v3994_v54, %v1717_v59  ;;  %4335 = vmatprep.mubr.msk.f32.mxu1 %vm86_vm0, %v1732_v60  ;;  %v4009_v54 = vld [vmem:[%s5510_s5 + $0x38] sm:$0xff] }
 0x9ee   :  { %4373 = vmatprep.subr.mxu1 %v4009_v54 }
 0x9ef   :  { %v1733_v62 = vadd.f32 %v3995_v56, %v1725_v61  ;;  %v4007_v56 = vld [vmem:[%s5510_s5 + $0x28] sm:$0xff] }
 0x9f1   :  { %4336 = vmatmul.mubr.msk.f32.vlgmr.msra.gmra.mxu1 %vm86_vm0, %v1733_v62 }
 0x9f2   :  { %4374 = vmatpush3.msra.mxu1 %v4009_v54 }
 0x9f3   :  { %4375 = vmatprep.subr.mxu1 %v4008_v55 }
 0x9f4   :  { %4376 = vmatpush3.msra.mxu1 %v4008_v55 }
 0x9f5   :  { %4377 = vmatprep.subr.mxu1 %v4007_v56 }
 0x9f6   :  { %4378 = vmatpush3.msra.mxu1 %v4007_v56 }
 0x9f7   :  { %4379 = vmatprep.subr.mxu1 %v4006_v57 }
 0x9f8   :  { %4380 = vmatpush3.msra.mxu1 %v4006_v57 }
 0x9f9   :  { %4384 = vmatprep.subr.mxu1 %v4685_v37 }
 0xab1   :  { %v4337_v18 = vpop.f32.mrf.mxu1 }
 0xab2   :  { %v1823_v19 = vadd.f32 %v4337_v18, %v3996_v17 }
 0xab3   :  { %v1817_v20 = vpop.f32.mrf.mxu1 }
 0xab4   :  { %v4000_v21 = vmul.f32 -1.702, %v1823_v19  ;;  %v1818_v22 = vadd.f32 %v3996_v17, %v1817_v20 }
 0xab6   :  { %v1832_v23 = vmul.f32 1.442695, %v4000_v21  ;;  %v3999_v24 = vmul.f32 -1.702, %v1818_v22 }
 0xab8   :  { %4590 = vpow2.f32 %v1832_v23  ;;  %v1830_v25 = vmul.f32 1.442695, %v3999_v24 }
 0xaba   :  { %4592 = vpow2.f32 %v1830_v25 }
 0xac5   :  { %v4591_v26 = vpop.eup %4590 }
 0xac6   :  { %v1835_v28 = vadd.f32 1.0, %v4591_v26 }
 0xac7   :  { %v4593_v30 = vpop.eup %4592 }
 0xac8   :  { %v1834_v31 = vadd.f32 1.0, %v4593_v30  ;;  %4594 = vrcp.f32 %v1835_v28 }
 0xaca   :  { %4596 = vrcp.f32 %v1834_v31 }
 0xad5   :  { %v4595_v32 = vpop.eup %4594 }
 0xad6   :  { %v1841_v35 = vmul.f32 %v4595_v32, %v1823_v19 }
 0xad7   :  { %v4597_v33 = vpop.eup %4596 }
 0xad8   :  { %v1840_v34 = vmul.f32 %v4597_v33, %v1818_v22 }
 0xada   :  { %4370 = vmatprep.mubr.f32.mxu0 %v1840_v34 }
 0xadb   :  { %4371 = vmatmul.mubr.f32.vlgmr.msra.gmra.mxu0 %v1841_v35 }
 0xadc   :  { %4416 = vmatprep.mubr.msk.f32.mxu0 %vm4686_vm1, %v4685_v37 }
 0xb9b   :  { %v4372_v4 = vpop.f32.mrf.mxu0 }
 0xb9c   :  { %v1934_v41 = vadd.f32 %v4372_v4, %v5061_v27 }
 0xb9d   :  { %v1924_v3 = vpop.f32.mrf.mxu0 }
 0xb9e   :  { %v5152_v38 = vadd.f32 %v4001_v36, %v1934_v41  ;;  %v1933_v42 = vadd.f32 %v1924_v3, %v5064_v29 }
 0xba0   :  { %v5155_v39 = vadd.f32 %v4001_v36, %v1933_v42  ;;  %v1951_v40 = vsel %vm86_vm0, %v5152_v38, 0.0 }
 0xba1   :  { %1952 = vadd.xlane.f32.xlu1 %v1951_v40 }
 0xba2   :  { %v1948_v43 = vsel %vm86_vm0, %v5155_v39, 0.0 }
 0xba3   :  { %1949 = vadd.xlane.f32.xlu0 %v1948_v43 }
 0xc2a   :  { %v1953_v44 = vpop.xlane.xlu1 %1952 }
 0xc2b   :  { %v1955_v45 = vmul.f32 0.03125, %v1953_v44 }
 0xc2c   :  { %v1950_v46 = vpop.xlane.xlu0 %1949 }
 0xc2d   :  { %v1957_v27 = vsub.f32 %v5152_v38, %v1955_v45  ;;  %v1954_v48 = vmul.f32 0.03125, %v1950_v46 }
 0xc2f   :  { %v1956_v49 = vsub.f32 %v5155_v39, %v1954_v48  ;;  %v1959_v51 = vmul.f32 %v1957_v27, %v1957_v27 }
 0xc31   :  { %v1963_v29 = vsel %vm86_vm0, %v1959_v51, 0.0  ;;  %v1958_v52 = vmul.f32 %v1956_v49, %v1956_v49 }
 0xc32   :  { %1964 = vadd.xlane.f32.xlu1 %v1963_v29 }
 0xc33   :  { %v1960_v53 = vsel %vm86_vm0, %v1958_v52, 0.0 }
 0xc34   :  { %1961 = vadd.xlane.f32.xlu0 %v1960_v53 }
 0xcbb   :  { %v1965_v58 = vpop.xlane.xlu1 %1964 }
 0xcbc   :  { %v1967_v59 = vmul.f32 0.03125, %v1965_v58 }
 0xcbd   :  { %v1962_v60 = vpop.xlane.xlu0 %1961 }
 0xcbe   :  { %v1969_v61 = vadd.f32 1e-05, %v1967_v59  ;;  %v1966_v62 = vmul.f32 0.03125, %v1962_v60 }
 0xcc0   :  { %4598 = vrsqrt.f32 %v1969_v61  ;;  %v1968_v63 = vadd.f32 1e-05, %v1966_v62 }
 0xcc2   :  { %4600 = vrsqrt.f32 %v1968_v63 }
 0xccd   :  { %v4599_v0 = vpop.eup %4598 }
 0xcce   :  { %v1973_v2 = vmul.f32 %v4599_v0, %v1957_v27 }
 0xccf   :  { %v4601_v5 = vpop.eup %4600 }
 0xcd0   :  { %v1972_v6 = vmul.f32 %v4601_v5, %v1956_v49  ;;  %v1981_v7 = vmul.f32 %v4004_v1, %v1973_v2 }
 0xcd2   :  { %v1980_v9 = vmul.f32 %v4004_v1, %v1972_v6  ;;  %v1989_v11 = vadd.f32 %v4005_v8, %v1981_v7 }
 0xcd4   :  { %v1988_v10 = vadd.f32 %v4005_v8, %v1980_v9 }
 0xcd6   :  { %4381 = vmatprep.mubr.msk.f32.mxu1 %vm86_vm0, %v1988_v10 }
 0xcd7   :  { %4382 = vmatmul.mubr.msk.f32.vlgmr.msra.gmra.mxu1 %vm86_vm0, %v1989_v11 }
 0xcd8   :  { %4386 = vmatprep.mubr.msk.f32.mxu1 %vm4686_vm1, %v4685_v37 }
 0xd97   :  { %v4383_v13 = vpop.f32.mrf.mxu1 }
 0xd98   :  { %v5191_v14 = vadd.f32 %v4383_v13, %v4011_v12 }
 0xd99   :  { %v2075_v15 = vpop.f32.mrf.mxu1 }
 0xd9a   :  { %v5193_v16 = vadd.f32 %v4011_v12, %v2075_v15 }
 0xd9c   :  { %2085 = vrot.lane.b32.xlu0 %v5193_v16, %s4687_s25 }
 0xda0   :  { %2253 = vrot.lane.b32.xlu0 %v5193_v16, %s4688_s26 }
 0xe0e   :  { %v2086_v17 = vpop.permute.xlu0 %2085 }
 0xe0f   :  { %4385 = vmatpush3.xpose.msk.msra.mxu1 %vm225_vm2, %v2086_v17 }
 0xe10   :  { %4389 = vmatprep.subr.mxu1 %v4685_v37 }
 0xe12   :  { %4387 = vmatmul.mubr.msk.f32.vlgmr.msra.gmra.mxu1 %vm225_vm2, %v5193_v16  ;;  %v2254_v34 = vpop.permute.xlu0 %2253 }
 0xe13   :  { %4391 = vmatprep.mubr.msk.f32.mxu1 %vm4686_vm1, %v4685_v37 }
 0xed2   :  { %v2157_v18 = vpop.f32.mrf.mxu1 }
 0xed3   :  { %v2161_v19 = vmul.f32 0.35355338, %v2157_v18 }
 0xed4   :  { %v4388_v20 = vpop.f32.mrf.mxu1 }
 0xed5   :  { %v2162_v21 = vsel %vm4881_vm3, %v2161_v19, -1e+30 }
 0xed6   :  { %v2163_v22 = vsel %vm225_vm2, %v2162_v21, -inf }
 0xed7   :  { %2164 = vmax.xlane.f32.xlu1 %v2163_v22 }
 0xee8   :  { %2174 = vrot.lane.b32.xlu1 %v5193_v16, %s4694_s19 }
 0xf60   :  { %v2165_v23 = vpop.xlane.xlu1 %2164 }
 0xf61   :  { %v2166_v24 = vsub.f32 %v2162_v21, %v2165_v23 }
 0xf63   :  { %v2167_v25 = vmul.f32 1.442695, %v2166_v24 }
 0xf64   :  { %v2175_v26 = vpop.permute.xlu1 %2174 }
 0xf65   :  { %4602 = vpow2.f32 %v2167_v25  ;;  %4390 = vmatpush3.msra.mxu1 %v2175_v26 }
 0xf66   :  { %4394 = vmatprep.subr.mxu1 %v4685_v37 }
 0xf72   :  { %v4603_v28 = vpop.eup %4602 }
 0xf73   :  { %v2169_v30 = vsel %vm225_vm2, %v4603_v28, 0.0 }
 0xf74   :  { %2170 = vadd.xlane.f32.xlu1 %v2169_v30 }
 0xf85   :  { %2251 = vrot.lane.b32.xlu1 %v5193_v16, %s4691_s29 }
 0xf89   :  { %2425 = vrot.lane.b32.xlu1 %v5193_v16, %s5547_s4 }
 0xffd   :  { %v2171_v31 = vpop.xlane.xlu1 %2170 }
 0xffe   :  { %4604 = vrcp.f32 %v2171_v31 }
0x1001   :  { %v2252_v35 = vpop.permute.xlu1 %2251 }
0x1005   :  { %v2426_v51 = vpop.permute.xlu1 %2425 }
0x100b   :  { %v4605_v32 = vpop.eup %4604 }
0x100c   :  { %v2173_v33 = vmul.f32 %v4605_v32, %v4603_v28 }
0x100e   :  { %4392 = vmatmul.mubr.msk.f32.vlgmr.msra.gmra.mxu1 %vm225_vm2, %v2173_v33 }
0x100f   :  { %4395 = vmatpush3.xpose.msk.msra.mxu1 %vm225_vm2, %v2254_v34  ;;  %4396 = vmatprep.mubr.msk.f32.mxu1 %vm4686_vm1, %v4685_v37 }
0x1010   :  { %4399 = vmatprep.subr.mxu1 %v4685_v37 }
0x1012   :  { %4397 = vmatmul.mubr.msk.f32.vlgmr.msra.gmra.mxu1 %vm225_vm2, %v2252_v35 }
0x1013   :  { %4401 = vmatprep.mubr.msk.f32.mxu1 %vm4686_vm1, %v4685_v37 }
0x10ce   :  { %v2246_v4 = vpop.f32.mrf.mxu1 }
0x10cf   :  { %2250 = vst.msk [vmem:[#allocation2] sm:$0xff] %vm225_vm2, %v2246_v4 }
0x10d0   :  { %v4393_v36 = vpop.f32.mrf.mxu1 }
0x10d2   :  { %v2325_v41 = vpop.f32.mrf.mxu1 }
0x10d3   :  { %v2329_v3 = vmul.f32 0.35355338, %v2325_v41 }
0x10d4   :  { %v4398_v42 = vpop.f32.mrf.mxu1 }
0x10d5   :  { %v2330_v40 = vsel %vm4881_vm3, %v2329_v3, -1e+30 }
0x10d6   :  { %v2331_v43 = vsel %vm225_vm2, %v2330_v40, -inf }
0x10d7   :  { %2332 = vmax.xlane.f32.xlu0 %v2331_v43 }
0x10ed   :  { %2342 = vrot.lane.b32.xlu0 %v5193_v16, %s5548_s6 }
0x10f1   :  { %2423 = vrot.lane.b32.xlu0 %v5193_v16, %s5549_s21 }
0x10f5   :  { %2595 = vrot.lane.b32.xlu0 %v5193_v16, %s5550_s24 }
0x10f9   :  { %2936 = vrot.lane.b32.xlu0 %v5191_v14, %s4688_s26  ;;  %s5553_s26 = smov 48  }
0x10fd   :  { %3108 = vrot.lane.b32.xlu0 %v5191_v14, %s5547_s4 }
0x1101   :  { %3280 = vrot.lane.b32.xlu0 %v5191_v14, %s5551_s27 }
0x1160   :  { %v2333_v44 = vpop.xlane.xlu0 %2332 }
0x1161   :  { %v2334_v45 = vsub.f32 %v2330_v40, %v2333_v44 }
0x1163   :  { %v2335_v46 = vmul.f32 1.442695, %v2334_v45 }
0x1164   :  { %v2343_v27 = vpop.permute.xlu0 %2342 }
0x1165   :  { %4606 = vpow2.f32 %v2335_v46  ;;  %4400 = vmatpush3.msra.mxu1 %v2343_v27 }
0x1166   :  { %4404 = vmatprep.subr.mxu1 %v4685_v37 }
0x1168   :  { %v2424_v29 = vpop.permute.xlu0 %2423 }
0x116c   :  { %v2596_v53 = vpop.permute.xlu0 %2595 }
0x1170   :  { %v2937_v55 = vpop.permute.xlu0 %2936 }
0x1172   :  { %v4607_v48 = vpop.eup %4606 }
0x1173   :  { %v2337_v49 = vsel %vm225_vm2, %v4607_v48, 0.0 }
0x1174   :  { %2338 = vadd.xlane.f32.xlu1 %v2337_v49  ;;  %v3109_v59 = vpop.permute.xlu0 %3108 }
0x1178   :  { %v3281_v62 = vpop.permute.xlu0 %3280 }
0x1185   :  { %2597 = vrot.lane.b32.xlu1 %v5193_v16, %s5551_s27 }
0x1189   :  { %2768 = vrot.lane.b32.xlu1 %v5191_v14, %s4687_s25  ;;  %s5552_s25 = smov 40  }
0x118d   :  { %2934 = vrot.lane.b32.xlu1 %v5191_v14, %s4691_s29 }
0x1191   :  { %3106 = vrot.lane.b32.xlu1 %v5191_v14, %s5549_s21 }
0x1195   :  { %3278 = vrot.lane.b32.xlu1 %v5191_v14, %s5550_s24 }
0x11fd   :  { %v2339_v52 = vpop.xlane.xlu1 %2338 }
0x11fe   :  { %4608 = vrcp.f32 %v2339_v52 }
0x1201   :  { %v2598_v54 = vpop.permute.xlu1 %2597 }
0x1202   :  { %4415 = vmatpush3.xpose.msk.msra.mxu0 %vm225_vm2, %v2598_v54 }
0x1203   :  { %4424 = vmatprep.subr.mxu0 %v4685_v37 }
0x1205   :  { %v2769_v56 = vpop.permute.xlu1 %2768  ;;  %4417 = vmatmul.mubr.msk.f32.vlgmr.msra.gmra.mxu0 %vm225_vm2, %v2596_v53 }
0x1206   :  { %4425 = vmatpush3.xpose.msk.msra.mxu0 %vm225_vm2, %v2769_v56  ;;  %4426 = vmatprep.mubr.msk.f32.mxu0 %vm4686_vm1, %v4685_v37 }
0x1207   :  { %4434 = vmatprep.subr.mxu0 %v4685_v37 }
0x1209   :  { %v2935_v57 = vpop.permute.xlu1 %2934  ;;  %4427 = vmatmul.mubr.msk.f32.vlgmr.msra.gmra.mxu0 %vm225_vm2, %v5191_v14 }
0x120a   :  { %4435 = vmatpush3.xpose.msk.msra.mxu0 %vm225_vm2, %v2937_v55  ;;  %4436 = vmatprep.mubr.msk.f32.mxu0 %vm4686_vm1, %v4685_v37 }
0x120b   :  { %v4609_v58 = vpop.eup %4608  ;;  %4444 = vmatprep.subr.mxu0 %v4685_v37 }
0x120c   :  { %v2341_v60 = vmul.f32 %v4609_v58, %v4607_v48 }
0x120d   :  { %4437 = vmatmul.mubr.msk.f32.vlgmr.msra.gmra.mxu0 %vm225_vm2, %v2935_v57  ;;  %v3107_v61 = vpop.permute.xlu1 %3106 }
0x120e   :  { %4402 = vmatmul.mubr.msk.f32.vlgmr.msra.gmra.mxu1 %vm225_vm2, %v2341_v60  ;;  %4445 = vmatpush3.xpose.msk.msra.mxu0 %vm225_vm2, %v3109_v59 }
0x120f   :  { %4405 = vmatpush3.xpose.msk.msra.mxu1 %vm225_vm2, %v2426_v51  ;;  %4446 = vmatprep.mubr.msk.f32.mxu0 %vm4686_vm1, %v4685_v37 }
0x1210   :  { %4406 = vmatprep.mubr.msk.f32.mxu1 %vm4686_vm1, %v4685_v37  ;;  %4454 = vmatprep.subr.mxu0 %v4685_v37 }
0x1211   :  { %4447 = vmatmul.mubr.msk.f32.vlgmr.msra.gmra.mxu0 %vm225_vm2, %v3107_v61  ;;  %4409 = vmatprep.subr.mxu1 %v4685_v37  ;;  %v3279_v63 = vpop.permute.xlu1 %3278 }
0x1212   :  { %4407 = vmatmul.mubr.msk.f32.vlgmr.msra.gmra.mxu1 %vm225_vm2, %v2424_v29  ;;  %4455 = vmatpush3.xpose.msk.msra.mxu0 %vm225_vm2, %v3281_v62 }
0x1213   :  { %4456 = vmatprep.mubr.msk.f32.mxu0 %vm4686_vm1, %v4685_v37  ;;  %4411 = vmatprep.mubr.msk.f32.mxu1 %vm4686_vm1, %v4685_v37 }
0x1215   :  { %4457 = vmatmul.mubr.msk.f32.vlgmr.msra.gmra.mxu0 %vm225_vm2, %v3279_v63 }
0x12c5   :  { %v2669_v0 = vpop.f32.mrf.mxu0 }
0x12c6   :  { %v2673_v1 = vmul.f32 0.35355338, %v2669_v0 }
0x12c7   :  { %v4418_v2 = vpop.f32.mrf.mxu0 }
0x12c8   :  { %v2674_v5 = vsel %vm4881_vm3, %v2673_v1, -1e+30 }
0x12c9   :  { %v2840_v6 = vpop.f32.mrf.mxu0  ;;  %v2675_v7 = vsel %vm225_vm2, %v2674_v5, -inf }
0x12ca   :  { %2676 = vmax.xlane.f32.xlu1 %v2675_v7  ;;  %v2844_v17 = vmul.f32 0.35355338, %v2840_v6 }
0x12cb   :  { %v4428_v8 = vpop.f32.mrf.mxu0 }
0x12cc   :  { %v2845_v28 = vsel %vm4881_vm3, %v2844_v17, -1e+30 }
0x12cd   :  { %v3008_v9 = vpop.f32.mrf.mxu0  ;;  %v2846_v32 = vsel %vm225_vm2, %v2845_v28, -inf }
0x12ce   :  { %v5286_v10 = vpop.f32.mrf.mxu1  ;;  %v3012_v25 = vmul.f32 0.35355338, %v3008_v9 }
0x12cf   :  { %v4438_v11 = vpop.f32.mrf.mxu0 }
0x12d0   :  { %v4403_v12 = vpop.f32.mrf.mxu1  ;;  %v3013_v34 = vsel %vm4881_vm3, %v3012_v25, -1e+30 }
0x12d1   :  { %v3180_v13 = vpop.f32.mrf.mxu0  ;;  %v3014_v35 = vsel %vm225_vm2, %v3013_v34, -inf }
0x12d2   :  { %v2497_v15 = vpop.f32.mrf.mxu1  ;;  %v3184_v33 = vmul.f32 0.35355338, %v3180_v13 }
0x12d3   :  { %v2501_v18 = vmul.f32 0.35355338, %v2497_v15  ;;  %v4448_v19 = vpop.f32.mrf.mxu0 }
0x12d4   :  { %v4408_v20 = vpop.f32.mrf.mxu1  ;;  %v3185_v4 = vsel %vm4881_vm3, %v3184_v33, -1e+30 }
0x12d5   :  { %v3352_v21 = vpop.f32.mrf.mxu0  ;;  %v2502_v22 = vsel %vm4881_vm3, %v2501_v18, -1e+30  ;;  %v3186_v36 = vsel %vm225_vm2, %v3185_v4, -inf }
0x12d6   :  { %v3356_v23 = vmul.f32 0.35355338, %v3352_v21  ;;  %v2503_v24 = vsel %vm225_vm2, %v2502_v22, -inf }
0x12d7   :  { %v4458_v26 = vpop.f32.mrf.mxu0  ;;  %2504 = vmax.xlane.f32.xlu0 %v2503_v24 }
0x12d8   :  { %v3357_v30 = vsel %vm4881_vm3, %v3356_v23, -1e+30 }
0x12d9   :  { %v3358_v31 = vsel %vm225_vm2, %v3357_v30, -inf }
0x12da   :  { %3359 = vmax.xlane.f32.xlu1 %v3358_v31 }
0x12db   :  { %2847 = vmax.xlane.f32.xlu0 %v2846_v32 }
0x12df   :  { %3015 = vmax.xlane.f32.xlu0 %v3014_v35 }
0x12e3   :  { %3187 = vmax.xlane.f32.xlu0 %v3186_v36 }
0x1353   :  { %v2677_v41 = vpop.xlane.xlu1 %2676 }
0x1354   :  { %v2678_v3 = vsub.f32 %v2674_v5, %v2677_v41  ;;  %v4041_v41 = vld [vmem:[%s5512_s7 + $0x38] sm:$0xff] }
0x1355   :  { %4464 = vmatprep.subr.mxu0 %v4041_v41 }
0x1356   :  { %v2679_v42 = vmul.f32 1.442695, %v2678_v3  ;;  %v4040_v3 = vld [vmem:[%s5512_s7 + $0x30] sm:$0xff]  ;;  %4465 = vmatpush3.msra.mxu0 %v4041_v41 }
0x1357   :  { %4466 = vmatprep.subr.mxu0 %v4040_v3  ;;  %v4070_v41 = vld [vmem:[%s5518_s13 + $0xd0] sm:$0xff] }
0x1358   :  { %4610 = vpow2.f32 %v2679_v42  ;;  %4467 = vmatpush3.msra.mxu0 %v4040_v3  ;;  %v4069_v3 = vld [vmem:[%s5518_s13 + $0xc8] sm:$0xff] }
0x1360   :  { %v2505_v40 = vpop.xlane.xlu0 %2504 }
0x1361   :  { %v2506_v29 = vsub.f32 %v2502_v22, %v2505_v40  ;;  %v4039_v40 = vld [vmem:[%s5512_s7 + $0x28] sm:$0xff] }
0x1362   :  { %4468 = vmatprep.subr.mxu0 %v4039_v40 }
0x1363   :  { %v3360_v43 = vpop.xlane.xlu1 %3359  ;;  %v2507_v56 = vmul.f32 1.442695, %v2506_v29  ;;  %4469 = vmatpush3.msra.mxu0 %v4039_v40  ;;  %v4067_v40 = vld [vmem:[%s5518_s13 + $0xb8] sm:$0xff] }
0x1364   :  { %v2848_v44 = vpop.xlane.xlu0 %2847  ;;  %v3361_v48 = vsub.f32 %v3357_v30, %v3360_v43 }
0x1365   :  { %v5303_v45 = vpop.eup %4610  ;;  %v2849_v46 = vsub.f32 %v2845_v28, %v2848_v44  ;;  %v4038_v44 = vld [vmem:[%s5512_s7 + $0x20] sm:$0xff] }
0x1366   :  { %v2681_v27 = vsel %vm225_vm2, %v5303_v45, 0.0  ;;  %v3362_v52 = vmul.f32 1.442695, %v3361_v48  ;;  %4470 = vmatprep.subr.mxu0 %v4038_v44 }
0x1367   :  { %v2850_v49 = vmul.f32 1.442695, %v2849_v46  ;;  %2682 = vadd.xlane.f32.xlu1 %v2681_v27  ;;  %4471 = vmatpush3.msra.mxu0 %v4038_v44  ;;  %v4065_v44 = vld [vmem:[%s5518_s13 + $0xa8] sm:$0xff] }
0x1368   :  { %v3016_v50 = vpop.xlane.xlu0 %3015 }
0x1369   :  { %4612 = vpow2.f32 %v2850_v49  ;;  %v3017_v51 = vsub.f32 %v3013_v34, %v3016_v50 }
0x136b   :  { %v3018_v53 = vmul.f32 1.442695, %v3017_v51 }
0x136c   :  { %v3188_v54 = vpop.xlane.xlu0 %3187 }
0x136d   :  { %4614 = vpow2.f32 %v3018_v53  ;;  %v3189_v55 = vsub.f32 %v3185_v4, %v3188_v54 }
0x136e   :  { %4616 = vpow2.f32 %v3362_v52 }
0x136f   :  { %v3190_v57 = vmul.f32 1.442695, %v3189_v55 }
0x1371   :  { %4618 = vpow2.f32 %v3190_v57  ;;  %v4045_v57 = vld [vmem:[%s5513_s8 + $0x1] ss:$0 sm:$0xff] }
0x1372   :  { %4620 = vpow2.f32 %v2507_v56 }
0x1376   :  { %v4613_v58 = vpop.eup %4612 }
0x1377   :  { %v2852_v59 = vsel %vm225_vm2, %v4613_v58, 0.0 }
0x1378   :  { %2853 = vadd.xlane.f32.xlu0 %v2852_v59 }
0x137a   :  { %v4615_v60 = vpop.eup %4614 }
0x137b   :  { %v3020_v61 = vsel %vm225_vm2, %v4615_v60, 0.0  ;;  %v5309_v62 = vpop.eup %4616 }
0x137c   :  { %3021 = vadd.xlane.f32.xlu1 %v3020_v61  ;;  %v3364_v0 = vsel %vm225_vm2, %v5309_v62, 0.0 }
0x137e   :  { %v4619_v63 = vpop.eup %4618 }
0x137f   :  { %v3192_v1 = vsel %vm225_vm2, %v4619_v63, 0.0  ;;  %v4621_v2 = vpop.eup %4620 }
0x1380   :  { %3365 = vadd.xlane.f32.xlu1 %v3364_v0  ;;  %3193 = vadd.xlane.f32.xlu0 %v3192_v1  ;;  %v2509_v5 = vsel %vm225_vm2, %v4621_v2, 0.0 }
0x1384   :  { %2510 = vadd.xlane.f32.xlu0 %v2509_v5 }
0x1391   :  { %2686 = vrot.lane.b32.xlu1 %v5193_v16, %s5552_s25 }
0x1395   :  { %2857 = vrot.lane.b32.xlu1 %v5191_v14, %s4694_s19 }
0x1399   :  { %3025 = vrot.lane.b32.xlu1 %v5191_v14, %s5548_s6 }
0x139a   :  { %2514 = vrot.lane.b32.xlu0 %v5193_v16, %s5553_s26 }
0x139d   :  { %3369 = vrot.lane.b32.xlu1 %v5191_v14, %s5552_s25 }
0x139e   :  { %3197 = vrot.lane.b32.xlu0 %v5191_v14, %s5553_s26 }
0x13a2   :  { %2419 = vrot.lane.b32.xlu0 %v5286_v10, %s4698_s22 }
0x13f0   :  { %v2683_v8 = vpop.xlane.xlu1 %2682 }
0x1401   :  { %v2854_v6 = vpop.xlane.xlu0 %2853 }
0x1405   :  { %v3022_v11 = vpop.xlane.xlu1 %3021 }
0x1409   :  { %v3194_v7 = vpop.xlane.xlu0 %3193  ;;  %v3366_v16 = vpop.xlane.xlu1 %3365 }
0x140d   :  { %v2511_v9 = vpop.xlane.xlu0 %2510  ;;  %v2687_v14 = vpop.permute.xlu1 %2686 }
0x140e   :  { %4622 = vrcp.f32 %v2511_v9 }
0x140f   :  { %4624 = vrcp.f32 %v2683_v8 }
0x1410   :  { %4626 = vrcp.f32 %v2854_v6 }
0x1411   :  { %v2515_v12 = vpop.permute.xlu0 %2514  ;;  %4628 = vrcp.f32 %v3022_v11  ;;  %v2858_v19 = vpop.permute.xlu1 %2857 }
0x1412   :  { %4410 = vmatpush3.msra.mxu1 %v2515_v12  ;;  %4630 = vrcp.f32 %v3194_v7  ;;  %v4053_v12 = vld [vmem:[%s5516_s11 + $0x38] sm:$0xff] }
0x1413   :  { %4419 = vmatprep.subr.mxu1 %v4685_v37  ;;  %4632 = vrcp.f32 %v3366_v16  ;;  %v4052_v16 = vld [vmem:[%s5516_s11 + $0x30] sm:$0xff] }
0x1415   :  { %v3198_v13 = vpop.permute.xlu0 %3197  ;;  %v3026_v24 = vpop.permute.xlu1 %3025 }
0x1419   :  { %v2420_v15 = vpop.permute.xlu0 %2419  ;;  %v3370_v31 = vpop.permute.xlu1 %3369 }
0x141a   :  { %2422 = vst.msk [vmem:[#allocation2] sm:$0xff] %vm561_vm4, %v2420_v15  ;;  %v4050_v15 = vld [vmem:[%s5516_s11 + $0x20] sm:$0xff] }
0x141b   :  { %v4623_v10 = vpop.eup %4622 }
0x141c   :  { %v2513_v17 = vmul.f32 %v4623_v10, %v4621_v2  ;;  %v4625_v18 = vpop.eup %4624 }
0x141d   :  { %v2685_v20 = vmul.f32 %v4625_v18, %v5303_v45  ;;  %v4627_v21 = vpop.eup %4626 }
0x141e   :  { %4412 = vmatmul.mubr.msk.f32.vlgmr.msra.gmra.mxu1 %vm225_vm2, %v2513_v17  ;;  %v2856_v22 = vmul.f32 %v4627_v21, %v4613_v58  ;;  %v4629_v23 = vpop.eup %4628 }
0x141f   :  { %4420 = vmatpush3.msra.mxu1 %v2687_v14  ;;  %4421 = vmatprep.mubr.msk.f32.mxu1 %vm4686_vm1, %v4685_v37  ;;  %v3024_v25 = vmul.f32 %v4629_v23, %v4615_v60  ;;  %v4631_v26 = vpop.eup %4630 }
0x1420   :  { %4429 = vmatprep.subr.mxu1 %v4685_v37  ;;  %v3196_v28 = vmul.f32 %v4631_v26, %v4619_v63  ;;  %v4633_v30 = vpop.eup %4632 }
0x1421   :  { %v3368_v32 = vmul.f32 %v4633_v30, %v5309_v62 }
0x1422   :  { %4422 = vmatmul.mubr.msk.f32.vlgmr.msra.gmra.mxu1 %vm225_vm2, %v2685_v20 }
0x1423   :  { %4430 = vmatpush3.msra.mxu1 %v2858_v19  ;;  %4431 = vmatprep.mubr.msk.f32.mxu1 %vm4686_vm1, %v4685_v37 }
0x1424   :  { %4439 = vmatprep.subr.mxu1 %v4685_v37 }
0x1426   :  { %4432 = vmatmul.mubr.msk.f32.vlgmr.msra.gmra.mxu1 %vm225_vm2, %v2856_v22  ;;  %v4048_v22 = vld [vmem:[%s5514_s9 + $0x1] ss:$0 sm:$0xff] }
0x1427   :  { %4440 = vmatpush3.msra.mxu1 %v3026_v24  ;;  %4441 = vmatprep.mubr.msk.f32.mxu1 %vm4686_vm1, %v4685_v37  ;;  %v4049_v24 = vld [vmem:[%s5515_s10 + $0x1] ss:$0 sm:$0xff] }
0x1428   :  { %4449 = vmatprep.subr.mxu1 %v4685_v37 }
0x142a   :  { %4442 = vmatmul.mubr.msk.f32.vlgmr.msra.gmra.mxu1 %vm225_vm2, %v3024_v25 }
0x142b   :  { %4450 = vmatpush3.msra.mxu1 %v3198_v13  ;;  %4451 = vmatprep.mubr.msk.f32.mxu1 %vm4686_vm1, %v4685_v37  ;;  %v4051_v13 = vld [vmem:[%s5516_s11 + $0x28] sm:$0xff] }
0x142c   :  { %4459 = vmatprep.subr.mxu1 %v4685_v37 }
0x142e   :  { %4452 = vmatmul.mubr.msk.f32.vlgmr.msra.gmra.mxu1 %vm225_vm2, %v3196_v28 }
0x142f   :  { %4460 = vmatpush3.msra.mxu1 %v3370_v31  ;;  %4461 = vmatprep.mubr.msk.f32.mxu1 %vm4686_vm1, %v4685_v37 }
0x1430   :  { %4475 = vmatprep.subr.mxu1 %v4053_v12 }
0x1432   :  { %4462 = vmatmul.mubr.msk.f32.vlgmr.msra.gmra.mxu1 %vm225_vm2, %v3368_v32 }
0x1433   :  { %4476 = vmatpush3.msra.mxu1 %v4053_v12 }
0x1434   :  { %4477 = vmatprep.subr.mxu1 %v4052_v16 }
0x1435   :  { %4478 = vmatpush3.msra.mxu1 %v4052_v16 }
0x1436   :  { %4479 = vmatprep.subr.mxu1 %v4051_v13 }
0x1437   :  { %4480 = vmatpush3.msra.mxu1 %v4051_v13 }
0x1438   :  { %4481 = vmatprep.subr.mxu1 %v4050_v15 }
0x1439   :  { %4482 = vmatpush3.msra.mxu1 %v4050_v15 }
0x143a   :  { %4521 = vmatprep.subr.mxu1 %v4685_v37 }
0x14de   :  { %v2586_v33 = vpop.f32.mrf.mxu1 }
0x14df   :  { %2591 = vrot.lane.b32.xlu1 %v2586_v33, %s4699_s2  ;;  %v4075_v33 = vld [vmem:[%s5518_s13 + $0xf8] sm:$0xff] }
0x14e0   :  { %v4413_v34 = vpop.f32.mrf.mxu1  ;;  %4486 = vmatprep.subr.mxu0 %v4075_v33 }
0x14e1   :  { %v4074_v34 = vld [vmem:[%s5518_s13 + $0xf0] sm:$0xff] }
0x14e2   :  { %v2758_v35 = vpop.f32.mrf.mxu1 }
0x14e3   :  { %2763 = vrot.lane.b32.xlu1 %v2758_v35, %s4700_s23  ;;  %v4073_v35 = vld [vmem:[%s5518_s13 + $0xe8] sm:$0xff] }
0x14e4   :  { %v4423_v4 = vpop.f32.mrf.mxu1 }
0x14e5   :  { %v4072_v4 = vld [vmem:[%s5518_s13 + $0xe0] sm:$0xff] }
0x14e6   :  { %v2929_v36 = vpop.f32.mrf.mxu1 }
0x14e7   :  { %2933 = vst.msk [vmem:[#allocation2 + $0x8] sm:$0xff] %vm225_vm2, %v2929_v36  ;;  %v4071_v36 = vld [vmem:[%s5518_s13 + $0xd8] sm:$0xff] }
0x14e8   :  { %v4433_v42 = vpop.f32.mrf.mxu1 }
0x14e9   :  { %v4068_v42 = vld [vmem:[%s5518_s13 + $0xc0] sm:$0xff] }
0x14ea   :  { %v3097_v43 = vpop.f32.mrf.mxu1 }
0x14eb   :  { %3102 = vrot.lane.b32.xlu0 %v3097_v43, %s4698_s22  ;;  %v4066_v43 = vld [vmem:[%s5518_s13 + $0xb0] sm:$0xff] }
0x14ec   :  { %v4443_v45 = vpop.f32.mrf.mxu1 }
0x14ed   :  { %v4064_v45 = vld [vmem:[%s5518_s13 + $0xa0] sm:$0xff] }
0x14ee   :  { %v3269_v46 = vpop.f32.mrf.mxu1 }
0x14ef   :  { %3274 = vrot.lane.b32.xlu0 %v3269_v46, %s4699_s2  ;;  %v4063_v46 = vld [vmem:[%s5518_s13 + $0x98] sm:$0xff] }
0x14f0   :  { %v4453_v27 = vpop.f32.mrf.mxu1 }
0x14f1   :  { %v4062_v27 = vld [vmem:[%s5518_s13 + $0x90] sm:$0xff] }
0x14f2   :  { %v3441_v48 = vpop.f32.mrf.mxu1 }
0x14f3   :  { %3446 = vrot.lane.b32.xlu1 %v3441_v48, %s4700_s23  ;;  %v4061_v48 = vld [vmem:[%s5518_s13 + $0x88] sm:$0xff] }
0x14f4   :  { %v4463_v49 = vpop.f32.mrf.mxu1 }
0x14f5   :  { %v4060_v49 = vld [vmem:[%s5518_s13 + $0x80] sm:$0xff]  ;;  %s3810_s13 = sld [smem:[#allocation3]] }
0x1551   :  { %v2592_v50 = vpop.permute.xlu1 %2591 }
0x1552   :  { %2594 = vst.msk [vmem:[#allocation2] sm:$0xff] %vm734_vm5, %v2592_v50  ;;  %v4055_v50 = vld [vmem:[%s5517_s12 + $0x1] ss:$0 sm:$0xff]  ;;  %s4079_s12 = sld [smem:[#allocation3 + $0x1]] }
0x1555   :  { %v2764_v51 = vpop.permute.xlu1 %2763 }
0x1556   :  { %2766 = vst.msk [vmem:[#allocation2] sm:$0xff] %vm907_vm6, %v2764_v51 }
0x155d   :  { %v3103_v29 = vpop.permute.xlu0 %3102  ;;  %v3450_v52 = vld [vmem:[#allocation2] sm:$0xff] }
0x155e   :  { %3105 = vst.msk [vmem:[#allocation2 + $0x8] sm:$0xff] %vm561_vm4, %v3103_v29  ;;  %4472 = vmatprep.mubr.msk.f32.mxu0 %vm86_vm0, %v3450_v52 }
0x1561   :  { %v3275_v53 = vpop.permute.xlu0 %3274 }
0x1562   :  { %3277 = vst.msk [vmem:[#allocation2 + $0x8] sm:$0xff] %vm734_vm5, %v3275_v53 }
0x1565   :  { %v3447_v54 = vpop.permute.xlu1 %3446 }
0x1566   :  { %3449 = vst.msk [vmem:[#allocation2 + $0x8] sm:$0xff] %vm907_vm6, %v3447_v54 }
0x156d   :  { %v3451_v55 = vld [vmem:[#allocation2 + $0x8] sm:$0xff] }
0x156e   :  { %4473 = vmatmul.mubr.msk.f32.vlgmr.msra.gmra.mxu0 %vm86_vm0, %v3451_v55 }
0x156f   :  { %4487 = vmatpush3.msra.mxu0 %v4075_v33 }
0x1570   :  { %4488 = vmatprep.subr.mxu0 %v4074_v34 }
0x1571   :  { %4489 = vmatpush3.msra.mxu0 %v4074_v34 }
0x1572   :  { %4490 = vmatprep.subr.mxu0 %v4073_v35 }
0x1573   :  { %4491 = vmatpush3.msra.mxu0 %v4073_v35 }
0x1574   :  { %4492 = vmatprep.subr.mxu0 %v4072_v4 }
0x1575   :  { %4493 = vmatpush3.msra.mxu0 %v4072_v4 }
0x1576   :  { %4494 = vmatprep.subr.mxu0 %v4071_v36 }
0x1577   :  { %4495 = vmatpush3.msra.mxu0 %v4071_v36  ;;  %v3871_v36 = vld [vmem:[%s5522_s17 + $0x18] sm:$0xff] }
0x1578   :  { %4496 = vmatprep.subr.mxu0 %v4070_v41 }
0x1579   :  { %4497 = vmatpush3.msra.mxu0 %v4070_v41  ;;  %v3870_v41 = vld [vmem:[%s5522_s17 + $0x10] sm:$0xff] }
0x157a   :  { %4498 = vmatprep.subr.mxu0 %v4069_v3 }
0x157b   :  { %4499 = vmatpush3.msra.mxu0 %v4069_v3  ;;  %v3869_v3 = vld [vmem:[%s5522_s17 + $0x8] sm:$0xff] }
0x157c   :  { %4500 = vmatprep.subr.mxu0 %v4068_v42 }
0x157d   :  { %4501 = vmatpush3.msra.mxu0 %v4068_v42  ;;  %v3868_v42 = vld [vmem:[%s5522_s17] sm:$0xff]  ;;  %s4701_s17 = smov [#allocation6]  }
0x157e   :  { %4502 = vmatprep.subr.mxu0 %v4067_v40  ;;  %s3952_s11 = sshll.u32 %s4701_s17, 4  ;;  %s3953_s11 = int_to_ptr.vmem [resolvable:$true] %s3952_s11 }
0x157f   :  { %4503 = vmatpush3.msra.mxu0 %v4067_v40  ;;  %s4660_s29 = scalar_lea.vmem %s3953_s11, 32  ;;  %p4665_p6 = scmp.lt.s32.totalorder %s3953_s11, %s3953_s11 }
0x1580   :  { %4504 = vmatprep.subr.mxu0 %v4066_v43  ;;  %p4661_p5 = scmp.ne.s32.totalorder %s3953_s11, %s4660_s29  ;;  %p4666_p7 = scmp.lt.s32.totalorder %s4660_s29, %s4660_s29 }
0x1581   :  { %4505 = vmatpush3.msra.mxu0 %v4066_v43 }
0x1582   :  { %4506 = vmatprep.subr.mxu0 %v4065_v44  ;;  %p4667_p8 = por %p4666_p7, %p4665_p6 }
0x1583   :  { %4507 = vmatpush3.msra.mxu0 %v4065_v44 }
0x1584   :  { %4508 = vmatprep.subr.mxu0 %v4064_v45  ;;  %p4668_p9 = pnand %p4667_p8, %p4661_p5 }
0x1585   :  { %4509 = vmatpush3.msra.mxu0 %v4064_v45 }
0x1586   :  { %4510 = vmatprep.subr.mxu0 %v4063_v46 }
0x1587   :  { %4511 = vmatpush3.msra.mxu0 %v4063_v46  ;;  %v4081_v46 = vld [vmem:[%s5520_s15] ss:$0 sm:$0xff] }
0x1588   :  { %4512 = vmatprep.subr.mxu0 %v4062_v27 }
0x1589   :  { %4513 = vmatpush3.msra.mxu0 %v4062_v27 }
0x158a   :  { %4514 = vmatprep.subr.mxu0 %v4061_v48 }
0x158b   :  { %4515 = vmatpush3.msra.mxu0 %v4061_v48  ;;  %v4082_v48 = vld [vmem:[%s5521_s16] ss:$0 sm:$0xff] }
0x158c   :  { %4516 = vmatprep.subr.mxu0 %v4060_v49 }
0x158d   :  { %4517 = vmatpush3.msra.mxu0 %v4060_v49 }
0x162e   :  { %v4474_v56 = vpop.f32.mrf.mxu0 }
0x162f   :  { %v3539_v58 = vadd.f32 %v4474_v56, %v5152_v38 }
0x1630   :  { %v3529_v59 = vpop.f32.mrf.mxu0 }
0x1631   :  { %v5382_v60 = vadd.f32 %v4045_v57, %v3539_v58  ;;  %v3538_v61 = vadd.f32 %v3529_v59, %v5155_v39 }
0x1633   :  { %v5385_v62 = vadd.f32 %v4045_v57, %v3538_v61  ;;  %v3557_v63 = vsel %vm86_vm0, %v5382_v60, 0.0 }
0x1634   :  { %3558 = vadd.xlane.f32.xlu1 %v3557_v63 }
0x1635   :  { %v3554_v0 = vsel %vm86_vm0, %v5385_v62, 0.0 }
0x1636   :  { %3555 = vadd.xlane.f32.xlu0 %v3554_v0 }
0x16bd   :  { %v3559_v1 = vpop.xlane.xlu1 %3558 }
0x16be   :  { %v3561_v2 = vmul.f32 0.03125, %v3559_v1 }
0x16bf   :  { %v3556_v5 = vpop.xlane.xlu0 %3555 }
0x16c0   :  { %v3560_v6 = vmul.f32 0.03125, %v3556_v5  ;;  %v3563_v38 = vsub.f32 %v5382_v60, %v3561_v2 }
0x16c2   :  { %v3562_v7 = vsub.f32 %v5385_v62, %v3560_v6  ;;  %v3565_v9 = vmul.f32 %v3563_v38, %v3563_v38  ;;  %v3824_v6 = vstv %s4079_s12 }
0x16c3   :  { %vm3825_vm7 = vcmp.eq.s32.totalorder %v4878_v47, %v3824_v6 }
0x16c4   :  { %v3564_v8 = vmul.f32 %v3562_v7, %v3562_v7  ;;  %v3569_v11 = vsel %vm86_vm0, %v3565_v9, 0.0  ;;  %v4080_v9 = vsel %vm3825_vm7, 1.0, %v4685_v37 }
0x16c6   :  { %v3566_v39 = vsel %vm86_vm0, %v3564_v8, 0.0  ;;  %v4077_v8 = vld [vmem:[%s5519_s14 + $0x1] ss:$0 sm:$0xff] }
0x16c7   :  { %3567 = vadd.xlane.f32.xlu0 %v3566_v39 }
0x16cb   :  { %3570 = vadd.xlane.f32.xlu0 %v3569_v11 }
0x1750   :  { %v3568_v14 = vpop.xlane.xlu0 %3567 }
0x1751   :  { %v3572_v10 = vmul.f32 0.03125, %v3568_v14 }
0x1753   :  { %v3574_v17 = vadd.f32 1e-05, %v3572_v10 }
0x1754   :  { %v3571_v18 = vpop.xlane.xlu0 %3570 }
0x1755   :  { %4634 = vrsqrt.f32 %v3574_v17  ;;  %v3573_v19 = vmul.f32 0.03125, %v3571_v18 }
0x1757   :  { %v3575_v20 = vadd.f32 1e-05, %v3573_v19 }
0x1759   :  { %4636 = vrsqrt.f32 %v3575_v20 }
0x1762   :  { %v4635_v21 = vpop.eup %4634 }
0x1763   :  { %v3578_v23 = vmul.f32 %v4635_v21, %v3562_v7 }
0x1765   :  { %v3586_v25 = vmul.f32 %v4048_v22, %v3578_v23 }
0x1766   :  { %v4637_v26 = vpop.eup %4636 }
0x1767   :  { %v3579_v28 = vmul.f32 %v4637_v26, %v3563_v38  ;;  %v3594_v30 = vadd.f32 %v4049_v24, %v3586_v25  ;;  %v3811_v38 = vstv %s3810_s13 }
0x1768   :  { %vm3812_vm8 = vcmp.eq.s32.totalorder %v4878_v47, %v3811_v38 }
0x1769   :  { %v3587_v31 = vmul.f32 %v4048_v22, %v3579_v28  ;;  %4483 = vmatprep.mubr.msk.f32.mxu1 %vm86_vm0, %v3594_v30  ;;  %v4078_v13 = vsel %vm3812_vm8, 1.0, %v4685_v37 }
0x176b   :  { %v3595_v32 = vadd.f32 %v4049_v24, %v3587_v31 }
0x176d   :  { %4484 = vmatmul.mubr.msk.f32.vlgmr.msra.gmra.mxu1 %vm86_vm0, %v3595_v32 }
0x176e   :  { %4529 = vmatprep.mubr.msk.f32.mxu1 %vm4686_vm1, %v4685_v37  ;;  %4522 = vmatpush3.msra.mxu1 %v3871_v36 }
0x176f   :  { %4523 = vmatprep.subr.mxu1 %v4685_v37 }
0x1770   :  { %4524 = vmatpush3.msra.mxu1 %v3870_v41 }
0x1771   :  { %4525 = vmatprep.subr.mxu1 %v4685_v37 }
0x1772   :  { %4526 = vmatpush3.msra.mxu1 %v3869_v3 }
0x1773   :  { %4527 = vmatprep.subr.mxu1 %v4685_v37 }
0x1774   :  { %4528 = vmatpush3.msra.mxu1 %v3868_v42 }
0x182d   :  { %v4485_v51 = vpop.f32.mrf.mxu1 }
0x182e   :  { %v3687_v29 = vadd.f32 %v4485_v51, %v4055_v50 }
0x182f   :  { %v3681_v52 = vpop.f32.mrf.mxu1 }
0x1830   :  { %v4059_v53 = vmul.f32 -1.702, %v3687_v29  ;;  %v3682_v54 = vadd.f32 %v4055_v50, %v3681_v52 }
0x1832   :  { %v3696_v55 = vmul.f32 1.442695, %v4059_v53  ;;  %v4058_v56 = vmul.f32 -1.702, %v3682_v54 }
0x1834   :  { %4638 = vpow2.f32 %v3696_v55  ;;  %v3694_v57 = vmul.f32 1.442695, %v4058_v56 }
0x1836   :  { %4640 = vpow2.f32 %v3694_v57 }
0x1841   :  { %v4639_v58 = vpop.eup %4638 }
0x1842   :  { %v3699_v59 = vadd.f32 1.0, %v4639_v58 }
0x1843   :  { %v4641_v61 = vpop.eup %4640 }
0x1844   :  { %v3698_v63 = vadd.f32 1.0, %v4641_v61  ;;  %4642 = vrcp.f32 %v3699_v59 }
0x1846   :  { %4644 = vrcp.f32 %v3698_v63 }
0x1851   :  { %v4643_v0 = vpop.eup %4642 }
0x1852   :  { %v3705_v5 = vmul.f32 %v4643_v0, %v3687_v29 }
0x1853   :  { %v4645_v1 = vpop.eup %4644 }
0x1854   :  { %v3704_v2 = vmul.f32 %v4645_v1, %v3682_v54 }
0x1856   :  { %4518 = vmatprep.mubr.f32.mxu0 %v3704_v2 }
0x1857   :  { %4519 = vmatmul.mubr.f32.vlgmr.msra.gmra.mxu0 %v3705_v5 }
0x1917   :  { %v4520_v7 = vpop.f32.mrf.mxu0 }
0x1918   :  { %v3799_v39 = vadd.f32 %v4520_v7, %v5382_v60 }
0x1919   :  { %v3789_v11 = vpop.f32.mrf.mxu0 }
0x191a   :  { %v3809_v12 = vadd.f32 %v4077_v8, %v3799_v39  ;;  %v3798_v16 = vadd.f32 %v3789_v11, %v5385_v62 }
0x191c   :  { %v3828_v15 = vmul.f32 %v4080_v9, %v3809_v12  ;;  %v3808_v14 = vadd.f32 %v4077_v8, %v3798_v16 }
0x191e   :  { %v3829_v10 = vsel %vm86_vm0, %v3828_v15, 0.0  ;;  %v3815_v17 = vmul.f32 %v4078_v13, %v3808_v14 }
0x191f   :  { %v3830_v18 = vrot.slane %v3829_v10, 4 }
0x1920   :  { %v3816_v19 = vsel %vm86_vm0, %v3815_v17, 0.0 }
0x1921   :  { %v3831_v20 = vadd.f32 %v3830_v18, %v3829_v10  ;;  %v3817_v60 = vrot.slane %v3816_v19, 4 }
0x1923   :  { %v3832_v21 = vrot.slane %v3831_v20, 2  ;;  %v3818_v47 = vadd.f32 %v3817_v60, %v3816_v19 }
0x1925   :  { %v3819_v22 = vrot.slane %v3818_v47, 2  ;;  %v3833_v23 = vadd.f32 %v3832_v21, %v3831_v20 }
0x1927   :  { %v3820_v24 = vadd.f32 %v3819_v22, %v3818_v47  ;;  %v3834_v25 = vrot.slane %v3833_v23, 1 }
0x1929   :  { %v3821_v26 = vrot.slane %v3820_v24, 1  ;;  %v3835_v28 = vadd.f32 %v3834_v25, %v3833_v23 }
0x192b   :  { %v3822_v62 = vadd.f32 %v3821_v26, %v3820_v24 }
0x192d   :  { %v3837_v30 = vsel %vm3836_vm9, %v3822_v62, %v3835_v28 }
0x192e   :  { %v3841_v31 = vsel %vm3840_vm10, %v3837_v30, 0.0 }
0x192f   :  { %3842 = vadd.xlane.f32.xlu0 %v3841_v31 }
0x19b8   :  { %v3843_v32 = vpop.xlane.xlu0 %3842 }
0x19b9   :  { %v3844_v33 = vmul.f32 0.03125, %v3843_v32 }
0x19bb   :  { %v3845_v34 = vsub.f32 %v3837_v30, %v3844_v33 }
0x19bd   :  { %v3846_v35 = vmul.f32 %v3845_v34, %v3845_v34 }
0x19bf   :  { %v3847_v4 = vsel %vm3840_vm10, %v3846_v35, 0.0 }
0x19c0   :  { %3848 = vadd.xlane.f32.xlu1 %v3847_v4 }
0x1a49   :  { %v3849_v40 = vpop.xlane.xlu1 %3848 }
0x1a4a   :  { %v3850_v43 = vmul.f32 0.03125, %v3849_v40 }
0x1a4c   :  { %v3851_v44 = vadd.f32 1e-05, %v3850_v43 }
0x1a4e   :  { %4646 = vrsqrt.f32 %v3851_v44 }
0x1a5b   :  { %v4647_v45 = vpop.eup %4646 }
0x1a5c   :  { %v3853_v27 = vmul.f32 %v4647_v45, %v3845_v34 }
0x1a5e   :  { %v3860_v49 = vmul.f32 %v4081_v46, %v3853_v27 }
0x1a60   :  { %v3867_v50 = vadd.f32 %v4082_v48, %v3860_v49 }
0x1a62   :  { %4530 = vmatmul.mubr.msk.f32.vlgmr.msra.gmra.mxu1 %vm86_vm0, %v3867_v50 }
0x1b22   :  { %v3941_v37 = vpop.f32.mrf.mxu1 }
0x1b23   :  { %3945 = vst [vmem:[#allocation6] sm:$0x3] %v3941_v37 }
0x1b24   :  { %v4531_v51 = vpop.f32.mrf.mxu1 }
0x1b25   :  { %4671 = shalt.err (!%p4668_p9)
}
0x1b26   :  { %3955 = dma.vmem_to_hbm [thread:$0]  %s3953_s11, 32, %s5523_s18, [#allocation4]  }
0x1b27   :  { %4682 = dma.done.wait [#allocation4], 32  }
0x1b28   :  { %4683 = vsyncadd [#allocation4], 4294967264 }
0x1b29   :  { %3959 = vsyncpa [#allocation4], 1 }
0x1b2a   :  { %3960 = vsyncpa [#allocation5], 1 }

</bundles_post_ra>
